<compile_context>
chip_gen: v7x
topology: tpu7x:2x2x1
jax: 0.10.0
libtpu: 0.0.40
codegen_flags: <defaults>
</compile_context>

<pallas_src>
import functools

import numpy as np

import jax
import jax.numpy as jnp
from jax.experimental import pallas as pl
from jax.experimental.pallas import tpu as pltpu

K = 7            # spatial-attention kernel size
PAD = K // 2     # = 3


def _spatial_attention_kernel(x_ref, wa_ref, wm_ref, o_ref, sum_ref, max_ref,
                              *, C, W):
    # x_ref   (VMEM): (NB, CBLK, HW)  lane-dense channel chunk of NB images
    # wa_ref  (VMEM): (K*K, HW)       per-tap avg-channel weight * pad-validity
    # wm_ref  (VMEM): (K*K, HW)       per-tap max-channel weight * pad-validity
    # o_ref   (VMEM): (NB, HW)        lane-dense output block
    # sum_ref/max_ref (VMEM scratch): (NB, HW) f32 channel-reduce accumulators
    NB, HW = sum_ref.shape
    c_idx = pl.program_id(1)

    @pl.when(c_idx == 0)
    def _init():
        sum_ref[...] = jnp.zeros_like(sum_ref)
        max_ref[...] = jnp.full(max_ref.shape, -jnp.inf, max_ref.dtype)

    # ---- channel mean/max over this chunk (full-lane VPU/XLU ops) -----------
    x = x_ref[...].astype(jnp.float32)                      # (NB, CBLK, HW)
    sum_ref[...] = sum_ref[...] + jnp.sum(x, axis=1)
    max_ref[...] = jnp.maximum(max_ref[...], jnp.max(x, axis=1))

    # ---- finalize: 7x7 conv (2 -> 1) + Hardsigmoid, once per image block ----
    @pl.when(c_idx == pl.num_programs(1) - 1)
    def _finalize():
        padf = PAD * W + PAD                                # flat halo = 51
        avg = sum_ref[...] * (1.0 / C)                      # (NB, HW)
        mx = max_ref[...]
        zpad = jnp.zeros((NB, padf), jnp.float32)
        avg_p = jnp.concatenate([zpad, avg, zpad], axis=1)  # (NB, HW + 2*padf)
        mx_p = jnp.concatenate([zpad, mx, zpad], axis=1)

        # Tap (kh, kw) reads source pixel (h + kh - PAD, w + kw - PAD); in the
        # flat domain that is a static lane shift by dh*W + dw.  Row/column
        # zero-padding validity is already folded into wa_ref / wm_ref planes.
        # TODO(synk): for large H*W (e.g. 112x112+) tile this loop over row
        # strips so acc/avg_p/mx_p stay within the 64-vreg register file.
        acc = jnp.zeros((NB, HW), jnp.float32)
        for t in range(K * K):
            dh = t // K - PAD
            dw = t % K - PAD
            s = padf + dh * W + dw                          # static, >= 0
            acc = (acc
                   + avg_p[:, s:s + HW] * wa_ref[t]
                   + mx_p[:, s:s + HW] * wm_ref[t])

        # Hardsigmoid: clip(x/6 + 0.5, 0, 1)  (matches torch.nn.Hardsigmoid)
        o_ref[...] = jnp.clip(acc * (1.0 / 6.0) + 0.5, 0.0, 1.0).astype(o_ref.dtype)


def spatial_attention(x, w):
    """x: (N, C, H, W) float (f32 or bf16).  w: (1, 2, K, K) conv1.weight (OIHW)."""
    N, C, H, W_ = x.shape
    assert w.shape == (1, 2, K, K)
    HW = H * W_

    # ---- lane-dense layouts (wrapper-side plumbing, free XLA reshapes) ------
    x_flat = x.reshape(N, C, HW)

    # ---- per-tap weight * zero-pad-validity planes (host precompute) --------
    idx = np.arange(HW)
    row, col = idx // W_, idx % W_
    mask = np.zeros((K * K, HW), np.float32)
    for kh in range(K):
        for kw in range(K):
            dh, dw = kh - PAD, kw - PAD
            ok = ((row + dh >= 0) & (row + dh < H)
                  & (col + dw >= 0) & (col + dw < W_))
            mask[kh * K + kw] = ok
    mask = jnp.asarray(mask)                                 # (K*K, HW) const
    wa_planes = w[0, 0].astype(jnp.float32).reshape(K * K, 1) * mask
    wm_planes = w[0, 1].astype(jnp.float32).reshape(K * K, 1) * mask

    # ---- block sizes ---------------------------------------------------------
    # Batch block: amortize per-grid-step overhead; must be a multiple of 8 or
    # the full batch to satisfy the (8, 128) block rule on the output's
    # second-to-last dim.
    nb = 8 if N % 8 == 0 else N
    # Channel chunk: bound per-step VMEM (double-buffered by the pipeline).
    if C <= 8:
        cblk = C
    else:
        cblk = 8 if C % 8 == 0 else C
        while C % (cblk * 2) == 0 and nb * (cblk * 2) * HW * x.dtype.itemsize <= (2 << 20):
            cblk *= 2
    # TODO(synk): pad ragged N / C instead of falling back to full-dim blocks.

    kernel = functools.partial(_spatial_attention_kernel, C=C, W=W_)
    out_flat = pl.pallas_call(
        kernel,
        out_shape=jax.ShapeDtypeStruct((N, HW), jnp.float32),
        grid=(N // nb, C // cblk),
        in_specs=[
            pl.BlockSpec((nb, cblk, HW), lambda n, c: (n, c, 0)),   # x chunk
            pl.BlockSpec((K * K, HW), lambda n, c: (0, 0)),         # avg planes
            pl.BlockSpec((K * K, HW), lambda n, c: (0, 0)),         # max planes
        ],
        out_specs=pl.BlockSpec((nb, HW), lambda n, c: (n, 0)),
        scratch_shapes=[
            pltpu.VMEM((nb, HW), jnp.float32),   # channel-sum accumulator
            pltpu.VMEM((nb, HW), jnp.float32),   # channel-max accumulator
        ],
        compiler_params=pltpu.CompilerParams(
            # TODO(synk): use pltpu.CORE_PARALLEL on the batch axis for v7x
            # (2 TensorCores); "parallel" is effectively a no-op on v5e/v6e.
            dimension_semantics=("parallel", "arbitrary"),
            vmem_limit_bytes=32 * 1024 * 1024,
        ),
    )(x_flat, wa_planes, wm_planes)

    return out_flat.reshape(N, 1, H, W_)


# ----------------------------------------------------------------------------
# Pure-JAX reference (mirrors the PyTorch module exactly)
# ----------------------------------------------------------------------------
def ref_spatial_attention(x, w):
    avg = jnp.mean(x, axis=1, keepdims=True)
    mx = jnp.max(x, axis=1, keepdims=True)
    s = jnp.concatenate([avg, mx], axis=1)                   # (N, 2, H, W)
    y = jax.lax.conv_general_dilated(
        s, w, (1, 1), ((PAD, PAD), (PAD, PAD)),
        dimension_numbers=("NCHW", "OIHW", "NCHW"),
        precision=jax.lax.Precision.HIGHEST)
    return jnp.clip(y / 6.0 + 0.5, 0.0, 1.0)                 # Hardsigmoid


if __name__ == "__main__":
    N, C, H, W = 2, 4, 16, 16

    key = jax.random.PRNGKey(0)
    kx, kw = jax.random.split(key)
    x = jax.random.normal(kx, (N, C, H, W), jnp.float32)
    w = 0.1 * jax.random.normal(kw, (1, 2, K, K), jnp.float32)  # conv1.weight

    out = spatial_attention(x, w)
    out = jax.block_until_ready(out)

    ref = ref_spatial_attention(x, w)
    assert out.shape == (N, 1, H, W), out.shape
    err = float(jnp.max(jnp.abs(out - ref)))
    assert err < 1e-4, f"mismatch vs reference: max abs err = {err}"

    print("KERNEL_OK")
</pallas_src>

<mosaic_0001>
module attributes {stable_mosaic.version = 11 : i64} {
  func.func @_spatial_attention_kernel(%arg0: i32, %arg1: i32, %arg2: memref<2x4x256xf32, #tpu.memory_space<vmem>>, %arg3: memref<49x256xf32, #tpu.memory_space<vmem>>, %arg4: memref<49x256xf32, #tpu.memory_space<vmem>>, %arg5: memref<2x256xf32, #tpu.memory_space<vmem>>, %arg6: memref<2x256xf32, #tpu.memory_space<vmem>>, %arg7: memref<2x256xf32, #tpu.memory_space<vmem>>) attributes {dimension_semantics = [#tpu.dimension_semantics<parallel>, #tpu.dimension_semantics<arbitrary>], iteration_bounds = array<i64: 1, 1>, scalar_prefetch = 0 : i64, scratch_operands = 2 : i64, tpu.core_type = #tpu.core_type<tc>, window_params = [{transform_indices = @transform_0, window_bounds = array<i64: 2, 4, 256>}, {pipeline_mode = #tpu.pipeline_mode<synchronous>, transform_indices = @transform_1, window_bounds = array<i64: 49, 256>}, {pipeline_mode = #tpu.pipeline_mode<synchronous>, transform_indices = @transform_2, window_bounds = array<i64: 49, 256>}, {transform_indices = @transform_3, window_bounds = array<i64: 2, 256>}]} {
    %c0_i32 = arith.constant 0 : i32
    %0 = arith.cmpi eq, %arg1, %c0_i32 : i32
    %1 = arith.extui %0 : i1 to i32
    %c0_i32_0 = arith.constant 0 : i32
    %2 = arith.cmpi ne, %1, %c0_i32_0 : i32
    scf.if %2 {
      %cst_14 = arith.constant 0.000000e+00 : f32
      %15 = vector.broadcast %cst_14 : f32 to vector<2x256xf32>
      %c0_15 = arith.constant 0 : index
      %c0_16 = arith.constant 0 : index
      %16 = vector.load %arg6[%c0_15, %c0_16] : memref<2x256xf32, #tpu.memory_space<vmem>>, vector<2x256xf32>
      tpu.vector_store %arg6[%c0_15, %c0_16], %15 {strides = array<i32>} : memref<2x256xf32, #tpu.memory_space<vmem>>, vector<2x256xf32>,
      %cst_17 = arith.constant 0xFF800000 : f32
      %17 = vector.broadcast %cst_17 : f32 to vector<2x256xf32>
      %c0_18 = arith.constant 0 : index
      %c0_19 = arith.constant 0 : index
      %18 = vector.load %arg7[%c0_18, %c0_19] : memref<2x256xf32, #tpu.memory_space<vmem>>, vector<2x256xf32>
      tpu.vector_store %arg7[%c0_18, %c0_19], %17 {strides = array<i32>} : memref<2x256xf32, #tpu.memory_space<vmem>>, vector<2x256xf32>,
    } else {
    }
    %c0 = arith.constant 0 : index
    %c0_1 = arith.constant 0 : index
    %c0_2 = arith.constant 0 : index
    %3 = vector.load %arg2[%c0, %c0_1, %c0_2] : memref<2x4x256xf32, #tpu.memory_space<vmem>>, vector<2x4x256xf32>
    %c0_3 = arith.constant 0 : index
    %c0_4 = arith.constant 0 : index
    %4 = vector.load %arg6[%c0_3, %c0_4] : memref<2x256xf32, #tpu.memory_space<vmem>>, vector<2x256xf32>
    %cst = arith.constant dense<0.000000e+00> : vector<2x256xf32>
    %5 = vector.multi_reduction <add>, %3, %cst [1] : vector<2x4x256xf32> to vector<2x256xf32>
    %6 = arith.addf %4, %5 : vector<2x256xf32>
    %c0_5 = arith.constant 0 : index
    %c0_6 = arith.constant 0 : index
    %7 = vector.load %arg6[%c0_5, %c0_6] : memref<2x256xf32, #tpu.memory_space<vmem>>, vector<2x256xf32>
    tpu.vector_store %arg6[%c0_5, %c0_6], %6 {strides = array<i32>} : memref<2x256xf32, #tpu.memory_space<vmem>>, vector<2x256xf32>,
    %c0_7 = arith.constant 0 : index
    %c0_8 = arith.constant 0 : index
    %8 = vector.load %arg7[%c0_7, %c0_8] : memref<2x256xf32, #tpu.memory_space<vmem>>, vector<2x256xf32>
    %cst_9 = arith.constant dense<0xFF800000> : vector<2x256xf32>
    %9 = vector.multi_reduction <maximumf>, %3, %cst_9 [1] : vector<2x4x256xf32> to vector<2x256xf32>
    %10 = arith.maximumf %8, %9 : vector<2x256xf32>
    %c0_10 = arith.constant 0 : index
    %c0_11 = arith.constant 0 : index
    %11 = vector.load %arg7[%c0_10, %c0_11] : memref<2x256xf32, #tpu.memory_space<vmem>>, vector<2x256xf32>
    tpu.vector_store %arg7[%c0_10, %c0_11], %10 {strides = array<i32>} : memref<2x256xf32, #tpu.memory_space<vmem>>, vector<2x256xf32>,
    %c0_i32_12 = arith.constant 0 : i32
    %12 = arith.cmpi eq, %arg1, %c0_i32_12 : i32
    %13 = arith.extui %12 : i1 to i32
    %c0_i32_13 = arith.constant 0 : i32
    %14 = arith.cmpi ne, %13, %c0_i32_13 : i32
    scf.if %14 {
      %c0_14 = arith.constant 0 : index
      %c0_15 = arith.constant 0 : index
      %15 = vector.load %arg6[%c0_14, %c0_15] : memref<2x256xf32, #tpu.memory_space<vmem>>, vector<2x256xf32>
      %cst_16 = arith.constant 2.500000e-01 : f32
      %16 = vector.broadcast %cst_16 : f32 to vector<2x256xf32>
      %17 = arith.mulf %15, %16 : vector<2x256xf32>
      %c0_17 = arith.constant 0 : index
      %c0_18 = arith.constant 0 : index
      %18 = vector.load %arg7[%c0_17, %c0_18] : memref<2x256xf32, #tpu.memory_space<vmem>>, vector<2x256xf32>
      %cst_19 = arith.constant 0.000000e+00 : f32
      %19 = vector.broadcast %cst_19 : f32 to vector<2x51xf32>
      %20 = tpu.concatenate %19, %17, %19 in 1 : vector<2x51xf32>, vector<2x256xf32>, vector<2x51xf32> -> vector<2x358xf32>
      %21 = tpu.concatenate %19, %18, %19 in 1 : vector<2x51xf32>, vector<2x256xf32>, vector<2x51xf32> -> vector<2x358xf32>
      %cst_20 = arith.constant 0.000000e+00 : f32
      %22 = vector.broadcast %cst_20 : f32 to vector<2x256xf32>
      %23 = vector.extract_strided_slice %20 {offsets = [0, 0], sizes = [2, 256], strides = [1, 1]} : vector<2x358xf32> to vector<2x256xf32>
      %c0_21 = arith.constant 0 : index
      %c0_22 = arith.constant 0 : index
      %24 = vector.load %arg3[%c0_21, %c0_22] : memref<49x256xf32, #tpu.memory_space<vmem>>, vector<1x256xf32>
      %25 = vector.shape_cast %24 : vector<1x256xf32> to vector<256xf32>
      %26 = vector.shape_cast %25 : vector<256xf32> to vector<1x256xf32>
      %27 = vector.broadcast %26 : vector<1x256xf32> to vector<2x256xf32>
      %28 = arith.mulf %23, %27 : vector<2x256xf32>
      %29 = arith.addf %22, %28 : vector<2x256xf32>
      %30 = vector.extract_strided_slice %21 {offsets = [0, 0], sizes = [2, 256], strides = [1, 1]} : vector<2x358xf32> to vector<2x256xf32>
      %c0_23 = arith.constant 0 : index
      %c0_24 = arith.constant 0 : index
      %31 = vector.load %arg4[%c0_23, %c0_24] : memref<49x256xf32, #tpu.memory_space<vmem>>, vector<1x256xf32>
      %32 = vector.shape_cast %31 : vector<1x256xf32> to vector<256xf32>
      %33 = vector.shape_cast %32 : vector<256xf32> to vector<1x256xf32>
      %34 = vector.broadcast %33 : vector<1x256xf32> to vector<2x256xf32>
      %35 = arith.mulf %30, %34 : vector<2x256xf32>
      %36 = arith.addf %29, %35 : vector<2x256xf32>
      %37 = vector.extract_strided_slice %20 {offsets = [0, 1], sizes = [2, 256], strides = [1, 1]} : vector<2x358xf32> to vector<2x256xf32>
      %c1 = arith.constant 1 : index
      %c0_25 = arith.constant 0 : index
      %38 = vector.load %arg3[%c1, %c0_25] : memref<49x256xf32, #tpu.memory_space<vmem>>, vector<1x256xf32>
      %39 = vector.shape_cast %38 : vector<1x256xf32> to vector<256xf32>
      %40 = vector.shape_cast %39 : vector<256xf32> to vector<1x256xf32>
      %41 = vector.broadcast %40 : vector<1x256xf32> to vector<2x256xf32>
      %42 = arith.mulf %37, %41 : vector<2x256xf32>
      %43 = arith.addf %36, %42 : vector<2x256xf32>
      %44 = vector.extract_strided_slice %21 {offsets = [0, 1], sizes = [2, 256], strides = [1, 1]} : vector<2x358xf32> to vector<2x256xf32>
      %c1_26 = arith.constant 1 : index
      %c0_27 = arith.constant 0 : index
      %45 = vector.load %arg4[%c1_26, %c0_27] : memref<49x256xf32, #tpu.memory_space<vmem>>, vector<1x256xf32>
      %46 = vector.shape_cast %45 : vector<1x256xf32> to vector<256xf32>
      %47 = vector.shape_cast %46 : vector<256xf32> to vector<1x256xf32>
      %48 = vector.broadcast %47 : vector<1x256xf32> to vector<2x256xf32>
      %49 = arith.mulf %44, %48 : vector<2x256xf32>
      %50 = arith.addf %43, %49 : vector<2x256xf32>
      %51 = vector.extract_strided_slice %20 {offsets = [0, 2], sizes = [2, 256], strides = [1, 1]} : vector<2x358xf32> to vector<2x256xf32>
      %c2 = arith.constant 2 : index
      %c0_28 = arith.constant 0 : index
      %52 = vector.load %arg3[%c2, %c0_28] : memref<49x256xf32, #tpu.memory_space<vmem>>, vector<1x256xf32>
      %53 = vector.shape_cast %52 : vector<1x256xf32> to vector<256xf32>
      %54 = vector.shape_cast %53 : vector<256xf32> to vector<1x256xf32>
      %55 = vector.broadcast %54 : vector<1x256xf32> to vector<2x256xf32>
      %56 = arith.mulf %51, %55 : vector<2x256xf32>
      %57 = arith.addf %50, %56 : vector<2x256xf32>
      %58 = vector.extract_strided_slice %21 {offsets = [0, 2], sizes = [2, 256], strides = [1, 1]} : vector<2x358xf32> to vector<2x256xf32>
      %c2_29 = arith.constant 2 : index
      %c0_30 = arith.constant 0 : index
      %59 = vector.load %arg4[%c2_29, %c0_30] : memref<49x256xf32, #tpu.memory_space<vmem>>, vector<1x256xf32>
      %60 = vector.shape_cast %59 : vector<1x256xf32> to vector<256xf32>
      %61 = vector.shape_cast %60 : vector<256xf32> to vector<1x256xf32>
      %62 = vector.broadcast %61 : vector<1x256xf32> to vector<2x256xf32>
      %63 = arith.mulf %58, %62 : vector<2x256xf32>
      %64 = arith.addf %57, %63 : vector<2x256xf32>
      %65 = vector.extract_strided_slice %20 {offsets = [0, 3], sizes = [2, 256], strides = [1, 1]} : vector<2x358xf32> to vector<2x256xf32>
      %c3 = arith.constant 3 : index
      %c0_31 = arith.constant 0 : index
      %66 = vector.load %arg3[%c3, %c0_31] : memref<49x256xf32, #tpu.memory_space<vmem>>, vector<1x256xf32>
      %67 = vector.shape_cast %66 : vector<1x256xf32> to vector<256xf32>
      %68 = vector.shape_cast %67 : vector<256xf32> to vector<1x256xf32>
      %69 = vector.broadcast %68 : vector<1x256xf32> to vector<2x256xf32>
      %70 = arith.mulf %65, %69 : vector<2x256xf32>
      %71 = arith.addf %64, %70 : vector<2x256xf32>
      %72 = vector.extract_strided_slice %21 {offsets = [0, 3], sizes = [2, 256], strides = [1, 1]} : vector<2x358xf32> to vector<2x256xf32>
      %c3_32 = arith.constant 3 : index
      %c0_33 = arith.constant 0 : index
      %73 = vector.load %arg4[%c3_32, %c0_33] : memref<49x256xf32, #tpu.memory_space<vmem>>, vector<1x256xf32>
      %74 = vector.shape_cast %73 : vector<1x256xf32> to vector<256xf32>
      %75 = vector.shape_cast %74 : vector<256xf32> to vector<1x256xf32>
      %76 = vector.broadcast %75 : vector<1x256xf32> to vector<2x256xf32>
      %77 = arith.mulf %72, %76 : vector<2x256xf32>
      %78 = arith.addf %71, %77 : vector<2x256xf32>
      %79 = vector.extract_strided_slice %20 {offsets = [0, 4], sizes = [2, 256], strides = [1, 1]} : vector<2x358xf32> to vector<2x256xf32>
      %c4 = arith.constant 4 : index
      %c0_34 = arith.constant 0 : index
      %80 = vector.load %arg3[%c4, %c0_34] : memref<49x256xf32, #tpu.memory_space<vmem>>, vector<1x256xf32>
      %81 = vector.shape_cast %80 : vector<1x256xf32> to vector<256xf32>
      %82 = vector.shape_cast %81 : vector<256xf32> to vector<1x256xf32>
      %83 = vector.broadcast %82 : vector<1x256xf32> to vector<2x256xf32>
      %84 = arith.mulf %79, %83 : vector<2x256xf32>
      %85 = arith.addf %78, %84 : vector<2x256xf32>
      %86 = vector.extract_strided_slice %21 {offsets = [0, 4], sizes = [2, 256], strides = [1, 1]} : vector<2x358xf32> to vector<2x256xf32>
      %c4_35 = arith.constant 4 : index
      %c0_36 = arith.constant 0 : index
      %87 = vector.load %arg4[%c4_35, %c0_36] : memref<49x256xf32, #tpu.memory_space<vmem>>, vector<1x256xf32>
      %88 = vector.shape_cast %87 : vector<1x256xf32> to vector<256xf32>
      %89 = vector.shape_cast %88 : vector<256xf32> to vector<1x256xf32>
      %90 = vector.broadcast %89 : vector<1x256xf32> to vector<2x256xf32>
      %91 = arith.mulf %86, %90 : vector<2x256xf32>
      %92 = arith.addf %85, %91 : vector<2x256xf32>
      %93 = vector.extract_strided_slice %20 {offsets = [0, 5], sizes = [2, 256], strides = [1, 1]} : vector<2x358xf32> to vector<2x256xf32>
      %c5 = arith.constant 5 : index
      %c0_37 = arith.constant 0 : index
      %94 = vector.load %arg3[%c5, %c0_37] : memref<49x256xf32, #tpu.memory_space<vmem>>, vector<1x256xf32>
      %95 = vector.shape_cast %94 : vector<1x256xf32> to vector<256xf32>
      %96 = vector.shape_cast %95 : vector<256xf32> to vector<1x256xf32>
      %97 = vector.broadcast %96 : vector<1x256xf32> to vector<2x256xf32>
      %98 = arith.mulf %93, %97 : vector<2x256xf32>
      %99 = arith.addf %92, %98 : vector<2x256xf32>
      %100 = vector.extract_strided_slice %21 {offsets = [0, 5], sizes = [2, 256], strides = [1, 1]} : vector<2x358xf32> to vector<2x256xf32>
      %c5_38 = arith.constant 5 : index
      %c0_39 = arith.constant 0 : index
      %101 = vector.load %arg4[%c5_38, %c0_39] : memref<49x256xf32, #tpu.memory_space<vmem>>, vector<1x256xf32>
      %102 = vector.shape_cast %101 : vector<1x256xf32> to vector<256xf32>
      %103 = vector.shape_cast %102 : vector<256xf32> to vector<1x256xf32>
      %104 = vector.broadcast %103 : vector<1x256xf32> to vector<2x256xf32>
      %105 = arith.mulf %100, %104 : vector<2x256xf32>
      %106 = arith.addf %99, %105 : vector<2x256xf32>
      %107 = vector.extract_strided_slice %20 {offsets = [0, 6], sizes = [2, 256], strides = [1, 1]} : vector<2x358xf32> to vector<2x256xf32>
      %c6 = arith.constant 6 : index
      %c0_40 = arith.constant 0 : index
      %108 = vector.load %arg3[%c6, %c0_40] : memref<49x256xf32, #tpu.memory_space<vmem>>, vector<1x256xf32>
      %109 = vector.shape_cast %108 : vector<1x256xf32> to vector<256xf32>
      %110 = vector.shape_cast %109 : vector<256xf32> to vector<1x256xf32>
      %111 = vector.broadcast %110 : vector<1x256xf32> to vector<2x256xf32>
      %112 = arith.mulf %107, %111 : vector<2x256xf32>
      %113 = arith.addf %106, %112 : vector<2x256xf32>
      %114 = vector.extract_strided_slice %21 {offsets = [0, 6], sizes = [2, 256], strides = [1, 1]} : vector<2x358xf32> to vector<2x256xf32>
      %c6_41 = arith.constant 6 : index
      %c0_42 = arith.constant 0 : index
      %115 = vector.load %arg4[%c6_41, %c0_42] : memref<49x256xf32, #tpu.memory_space<vmem>>, vector<1x256xf32>
      %116 = vector.shape_cast %115 : vector<1x256xf32> to vector<256xf32>
      %117 = vector.shape_cast %116 : vector<256xf32> to vector<1x256xf32>
      %118 = vector.broadcast %117 : vector<1x256xf32> to vector<2x256xf32>
      %119 = arith.mulf %114, %118 : vector<2x256xf32>
      %120 = arith.addf %113, %119 : vector<2x256xf32>
      %121 = vector.extract_strided_slice %20 {offsets = [0, 16], sizes = [2, 256], strides = [1, 1]} : vector<2x358xf32> to vector<2x256xf32>
      %c7 = arith.constant 7 : index
      %c0_43 = arith.constant 0 : index
      %122 = vector.load %arg3[%c7, %c0_43] : memref<49x256xf32, #tpu.memory_space<vmem>>, vector<1x256xf32>
      %123 = vector.shape_cast %122 : vector<1x256xf32> to vector<256xf32>
      %124 = vector.shape_cast %123 : vector<256xf32> to vector<1x256xf32>
      %125 = vector.broadcast %124 : vector<1x256xf32> to vector<2x256xf32>
      %126 = arith.mulf %121, %125 : vector<2x256xf32>
      %127 = arith.addf %120, %126 : vector<2x256xf32>
      %128 = vector.extract_strided_slice %21 {offsets = [0, 16], sizes = [2, 256], strides = [1, 1]} : vector<2x358xf32> to vector<2x256xf32>
      %c7_44 = arith.constant 7 : index
      %c0_45 = arith.constant 0 : index
      %129 = vector.load %arg4[%c7_44, %c0_45] : memref<49x256xf32, #tpu.memory_space<vmem>>, vector<1x256xf32>
      %130 = vector.shape_cast %129 : vector<1x256xf32> to vector<256xf32>
      %131 = vector.shape_cast %130 : vector<256xf32> to vector<1x256xf32>
      %132 = vector.broadcast %131 : vector<1x256xf32> to vector<2x256xf32>
      %133 = arith.mulf %128, %132 : vector<2x256xf32>
      %134 = arith.addf %127, %133 : vector<2x256xf32>
      %135 = vector.extract_strided_slice %20 {offsets = [0, 17], sizes = [2, 256], strides = [1, 1]} : vector<2x358xf32> to vector<2x256xf32>
      %c8 = arith.constant 8 : index
      %c0_46 = arith.constant 0 : index
      %136 = vector.load %arg3[%c8, %c0_46] : memref<49x256xf32, #tpu.memory_space<vmem>>, vector<1x256xf32>
      %137 = vector.shape_cast %136 : vector<1x256xf32> to vector<256xf32>
      %138 = vector.shape_cast %137 : vector<256xf32> to vector<1x256xf32>
      %139 = vector.broadcast %138 : vector<1x256xf32> to vector<2x256xf32>
      %140 = arith.mulf %135, %139 : vector<2x256xf32>
      %141 = arith.addf %134, %140 : vector<2x256xf32>
      %142 = vector.extract_strided_slice %21 {offsets = [0, 17], sizes = [2, 256], strides = [1, 1]} : vector<2x358xf32> to vector<2x256xf32>
      %c8_47 = arith.constant 8 : index
      %c0_48 = arith.constant 0 : index
      %143 = vector.load %arg4[%c8_47, %c0_48] : memref<49x256xf32, #tpu.memory_space<vmem>>, vector<1x256xf32>
      %144 = vector.shape_cast %143 : vector<1x256xf32> to vector<256xf32>
      %145 = vector.shape_cast %144 : vector<256xf32> to vector<1x256xf32>
      %146 = vector.broadcast %145 : vector<1x256xf32> to vector<2x256xf32>
      %147 = arith.mulf %142, %146 : vector<2x256xf32>
      %148 = arith.addf %141, %147 : vector<2x256xf32>
      %149 = vector.extract_strided_slice %20 {offsets = [0, 18], sizes = [2, 256], strides = [1, 1]} : vector<2x358xf32> to vector<2x256xf32>
      %c9 = arith.constant 9 : index
      %c0_49 = arith.constant 0 : index
      %150 = vector.load %arg3[%c9, %c0_49] : memref<49x256xf32, #tpu.memory_space<vmem>>, vector<1x256xf32>
      %151 = vector.shape_cast %150 : vector<1x256xf32> to vector<256xf32>
      %152 = vector.shape_cast %151 : vector<256xf32> to vector<1x256xf32>
      %153 = vector.broadcast %152 : vector<1x256xf32> to vector<2x256xf32>
      %154 = arith.mulf %149, %153 : vector<2x256xf32>
      %155 = arith.addf %148, %154 : vector<2x256xf32>
      %156 = vector.extract_strided_slice %21 {offsets = [0, 18], sizes = [2, 256], strides = [1, 1]} : vector<2x358xf32> to vector<2x256xf32>
      %c9_50 = arith.constant 9 : index
      %c0_51 = arith.constant 0 : index
      %157 = vector.load %arg4[%c9_50, %c0_51] : memref<49x256xf32, #tpu.memory_space<vmem>>, vector<1x256xf32>
      %158 = vector.shape_cast %157 : vector<1x256xf32> to vector<256xf32>
      %159 = vector.shape_cast %158 : vector<256xf32> to vector<1x256xf32>
      %160 = vector.broadcast %159 : vector<1x256xf32> to vector<2x256xf32>
      %161 = arith.mulf %156, %160 : vector<2x256xf32>
      %162 = arith.addf %155, %161 : vector<2x256xf32>
      %163 = vector.extract_strided_slice %20 {offsets = [0, 19], sizes = [2, 256], strides = [1, 1]} : vector<2x358xf32> to vector<2x256xf32>
      %c10 = arith.constant 10 : index
      %c0_52 = arith.constant 0 : index
      %164 = vector.load %arg3[%c10, %c0_52] : memref<49x256xf32, #tpu.memory_space<vmem>>, vector<1x256xf32>
      %165 = vector.shape_cast %164 : vector<1x256xf32> to vector<256xf32>
      %166 = vector.shape_cast %165 : vector<256xf32> to vector<1x256xf32>
      %167 = vector.broadcast %166 : vector<1x256xf32> to vector<2x256xf32>
      %168 = arith.mulf %163, %167 : vector<2x256xf32>
      %169 = arith.addf %162, %168 : vector<2x256xf32>
      %170 = vector.extract_strided_slice %21 {offsets = [0, 19], sizes = [2, 256], strides = [1, 1]} : vector<2x358xf32> to vector<2x256xf32>
      %c10_53 = arith.constant 10 : index
      %c0_54 = arith.constant 0 : index
      %171 = vector.load %arg4[%c10_53, %c0_54] : memref<49x256xf32, #tpu.memory_space<vmem>>, vector<1x256xf32>
      %172 = vector.shape_cast %171 : vector<1x256xf32> to vector<256xf32>
      %173 = vector.shape_cast %172 : vector<256xf32> to vector<1x256xf32>
      %174 = vector.broadcast %173 : vector<1x256xf32> to vector<2x256xf32>
      %175 = arith.mulf %170, %174 : vector<2x256xf32>
      %176 = arith.addf %169, %175 : vector<2x256xf32>
      %177 = vector.extract_strided_slice %20 {offsets = [0, 20], sizes = [2, 256], strides = [1, 1]} : vector<2x358xf32> to vector<2x256xf32>
      %c11 = arith.constant 11 : index
      %c0_55 = arith.constant 0 : index
      %178 = vector.load %arg3[%c11, %c0_55] : memref<49x256xf32, #tpu.memory_space<vmem>>, vector<1x256xf32>
      %179 = vector.shape_cast %178 : vector<1x256xf32> to vector<256xf32>
      %180 = vector.shape_cast %179 : vector<256xf32> to vector<1x256xf32>
      %181 = vector.broadcast %180 : vector<1x256xf32> to vector<2x256xf32>
      %182 = arith.mulf %177, %181 : vector<2x256xf32>
      %183 = arith.addf %176, %182 : vector<2x256xf32>
      %184 = vector.extract_strided_slice %21 {offsets = [0, 20], sizes = [2, 256], strides = [1, 1]} : vector<2x358xf32> to vector<2x256xf32>
      %c11_56 = arith.constant 11 : index
      %c0_57 = arith.constant 0 : index
      %185 = vector.load %arg4[%c11_56, %c0_57] : memref<49x256xf32, #tpu.memory_space<vmem>>, vector<1x256xf32>
      %186 = vector.shape_cast %185 : vector<1x256xf32> to vector<256xf32>
      %187 = vector.shape_cast %186 : vector<256xf32> to vector<1x256xf32>
      %188 = vector.broadcast %187 : vector<1x256xf32> to vector<2x256xf32>
      %189 = arith.mulf %184, %188 : vector<2x256xf32>
      %190 = arith.addf %183, %189 : vector<2x256xf32>
      %191 = vector.extract_strided_slice %20 {offsets = [0, 21], sizes = [2, 256], strides = [1, 1]} : vector<2x358xf32> to vector<2x256xf32>
      %c12 = arith.constant 12 : index
      %c0_58 = arith.constant 0 : index
      %192 = vector.load %arg3[%c12, %c0_58] : memref<49x256xf32, #tpu.memory_space<vmem>>, vector<1x256xf32>
      %193 = vector.shape_cast %192 : vector<1x256xf32> to vector<256xf32>
      %194 = vector.shape_cast %193 : vector<256xf32> to vector<1x256xf32>
      %195 = vector.broadcast %194 : vector<1x256xf32> to vector<2x256xf32>
      %196 = arith.mulf %191, %195 : vector<2x256xf32>
      %197 = arith.addf %190, %196 : vector<2x256xf32>
      %198 = vector.extract_strided_slice %21 {offsets = [0, 21], sizes = [2, 256], strides = [1, 1]} : vector<2x358xf32> to vector<2x256xf32>
      %c12_59 = arith.constant 12 : index
      %c0_60 = arith.constant 0 : index
      %199 = vector.load %arg4[%c12_59, %c0_60] : memref<49x256xf32, #tpu.memory_space<vmem>>, vector<1x256xf32>
      %200 = vector.shape_cast %199 : vector<1x256xf32> to vector<256xf32>
      %201 = vector.shape_cast %200 : vector<256xf32> to vector<1x256xf32>
      %202 = vector.broadcast %201 : vector<1x256xf32> to vector<2x256xf32>
      %203 = arith.mulf %198, %202 : vector<2x256xf32>
      %204 = arith.addf %197, %203 : vector<2x256xf32>
      %205 = vector.extract_strided_slice %20 {offsets = [0, 22], sizes = [2, 256], strides = [1, 1]} : vector<2x358xf32> to vector<2x256xf32>
      %c13 = arith.constant 13 : index
      %c0_61 = arith.constant 0 : index
      %206 = vector.load %arg3[%c13, %c0_61] : memref<49x256xf32, #tpu.memory_space<vmem>>, vector<1x256xf32>
      %207 = vector.shape_cast %206 : vector<1x256xf32> to vector<256xf32>
      %208 = vector.shape_cast %207 : vector<256xf32> to vector<1x256xf32>
      %209 = vector.broadcast %208 : vector<1x256xf32> to vector<2x256xf32>
      %210 = arith.mulf %205, %209 : vector<2x256xf32>
      %211 = arith.addf %204, %210 : vector<2x256xf32>
      %212 = vector.extract_strided_slice %21 {offsets = [0, 22], sizes = [2, 256], strides = [1, 1]} : vector<2x358xf32> to vector<2x256xf32>
      %c13_62 = arith.constant 13 : index
      %c0_63 = arith.constant 0 : index
      %213 = vector.load %arg4[%c13_62, %c0_63] : memref<49x256xf32, #tpu.memory_space<vmem>>, vector<1x256xf32>
      %214 = vector.shape_cast %213 : vector<1x256xf32> to vector<256xf32>
      %215 = vector.shape_cast %214 : vector<256xf32> to vector<1x256xf32>
      %216 = vector.broadcast %215 : vector<1x256xf32> to vector<2x256xf32>
      %217 = arith.mulf %212, %216 : vector<2x256xf32>
      %218 = arith.addf %211, %217 : vector<2x256xf32>
      %219 = vector.extract_strided_slice %20 {offsets = [0, 32], sizes = [2, 256], strides = [1, 1]} : vector<2x358xf32> to vector<2x256xf32>
      %c14 = arith.constant 14 : index
      %c0_64 = arith.constant 0 : index
      %220 = vector.load %arg3[%c14, %c0_64] : memref<49x256xf32, #tpu.memory_space<vmem>>, vector<1x256xf32>
      %221 = vector.shape_cast %220 : vector<1x256xf32> to vector<256xf32>
      %222 = vector.shape_cast %221 : vector<256xf32> to vector<1x256xf32>
      %223 = vector.broadcast %222 : vector<1x256xf32> to vector<2x256xf32>
      %224 = arith.mulf %219, %223 : vector<2x256xf32>
      %225 = arith.addf %218, %224 : vector<2x256xf32>
      %226 = vector.extract_strided_slice %21 {offsets = [0, 32], sizes = [2, 256], strides = [1, 1]} : vector<2x358xf32> to vector<2x256xf32>
      %c14_65 = arith.constant 14 : index
      %c0_66 = arith.constant 0 : index
      %227 = vector.load %arg4[%c14_65, %c0_66] : memref<49x256xf32, #tpu.memory_space<vmem>>, vector<1x256xf32>
      %228 = vector.shape_cast %227 : vector<1x256xf32> to vector<256xf32>
      %229 = vector.shape_cast %228 : vector<256xf32> to vector<1x256xf32>
      %230 = vector.broadcast %229 : vector<1x256xf32> to vector<2x256xf32>
      %231 = arith.mulf %226, %230 : vector<2x256xf32>
      %232 = arith.addf %225, %231 : vector<2x256xf32>
      %233 = vector.extract_strided_slice %20 {offsets = [0, 33], sizes = [2, 256], strides = [1, 1]} : vector<2x358xf32> to vector<2x256xf32>
      %c15 = arith.constant 15 : index
      %c0_67 = arith.constant 0 : index
      %234 = vector.load %arg3[%c15, %c0_67] : memref<49x256xf32, #tpu.memory_space<vmem>>, vector<1x256xf32>
      %235 = vector.shape_cast %234 : vector<1x256xf32> to vector<256xf32>
      %236 = vector.shape_cast %235 : vector<256xf32> to vector<1x256xf32>
      %237 = vector.broadcast %236 : vector<1x256xf32> to vector<2x256xf32>
      %238 = arith.mulf %233, %237 : vector<2x256xf32>
      %239 = arith.addf %232, %238 : vector<2x256xf32>
      %240 = vector.extract_strided_slice %21 {offsets = [0, 33], sizes = [2, 256], strides = [1, 1]} : vector<2x358xf32> to vector<2x256xf32>
      %c15_68 = arith.constant 15 : index
      %c0_69 = arith.constant 0 : index
      %241 = vector.load %arg4[%c15_68, %c0_69] : memref<49x256xf32, #tpu.memory_space<vmem>>, vector<1x256xf32>
      %242 = vector.shape_cast %241 : vector<1x256xf32> to vector<256xf32>
      %243 = vector.shape_cast %242 : vector<256xf32> to vector<1x256xf32>
      %244 = vector.broadcast %243 : vector<1x256xf32> to vector<2x256xf32>
      %245 = arith.mulf %240, %244 : vector<2x256xf32>
      %246 = arith.addf %239, %245 : vector<2x256xf32>
      %247 = vector.extract_strided_slice %20 {offsets = [0, 34], sizes = [2, 256], strides = [1, 1]} : vector<2x358xf32> to vector<2x256xf32>
      %c16 = arith.constant 16 : index
      %c0_70 = arith.constant 0 : index
      %248 = vector.load %arg3[%c16, %c0_70] : memref<49x256xf32, #tpu.memory_space<vmem>>, vector<1x256xf32>
      %249 = vector.shape_cast %248 : vector<1x256xf32> to vector<256xf32>
      %250 = vector.shape_cast %249 : vector<256xf32> to vector<1x256xf32>
      %251 = vector.broadcast %250 : vector<1x256xf32> to vector<2x256xf32>
      %252 = arith.mulf %247, %251 : vector<2x256xf32>
      %253 = arith.addf %246, %252 : vector<2x256xf32>
      %254 = vector.extract_strided_slice %21 {offsets = [0, 34], sizes = [2, 256], strides = [1, 1]} : vector<2x358xf32> to vector<2x256xf32>
      %c16_71 = arith.constant 16 : index
      %c0_72 = arith.constant 0 : index
      %255 = vector.load %arg4[%c16_71, %c0_72] : memref<49x256xf32, #tpu.memory_space<vmem>>, vector<1x256xf32>
      %256 = vector.shape_cast %255 : vector<1x256xf32> to vector<256xf32>
      %257 = vector.shape_cast %256 : vector<256xf32> to vector<1x256xf32>
      %258 = vector.broadcast %257 : vector<1x256xf32> to vector<2x256xf32>
      %259 = arith.mulf %254, %258 : vector<2x256xf32>
      %260 = arith.addf %253, %259 : vector<2x256xf32>
      %261 = vector.extract_strided_slice %20 {offsets = [0, 35], sizes = [2, 256], strides = [1, 1]} : vector<2x358xf32> to vector<2x256xf32>
      %c17 = arith.constant 17 : index
      %c0_73 = arith.constant 0 : index
      %262 = vector.load %arg3[%c17, %c0_73] : memref<49x256xf32, #tpu.memory_space<vmem>>, vector<1x256xf32>
      %263 = vector.shape_cast %262 : vector<1x256xf32> to vector<256xf32>
      %264 = vector.shape_cast %263 : vector<256xf32> to vector<1x256xf32>
      %265 = vector.broadcast %264 : vector<1x256xf32> to vector<2x256xf32>
      %266 = arith.mulf %261, %265 : vector<2x256xf32>
      %267 = arith.addf %260, %266 : vector<2x256xf32>
      %268 = vector.extract_strided_slice %21 {offsets = [0, 35], sizes = [2, 256], strides = [1, 1]} : vector<2x358xf32> to vector<2x256xf32>
      %c17_74 = arith.constant 17 : index
      %c0_75 = arith.constant 0 : index
      %269 = vector.load %arg4[%c17_74, %c0_75] : memref<49x256xf32, #tpu.memory_space<vmem>>, vector<1x256xf32>
      %270 = vector.shape_cast %269 : vector<1x256xf32> to vector<256xf32>
      %271 = vector.shape_cast %270 : vector<256xf32> to vector<1x256xf32>
      %272 = vector.broadcast %271 : vector<1x256xf32> to vector<2x256xf32>
      %273 = arith.mulf %268, %272 : vector<2x256xf32>
      %274 = arith.addf %267, %273 : vector<2x256xf32>
      %275 = vector.extract_strided_slice %20 {offsets = [0, 36], sizes = [2, 256], strides = [1, 1]} : vector<2x358xf32> to vector<2x256xf32>
      %c18 = arith.constant 18 : index
      %c0_76 = arith.constant 0 : index
      %276 = vector.load %arg3[%c18, %c0_76] : memref<49x256xf32, #tpu.memory_space<vmem>>, vector<1x256xf32>
      %277 = vector.shape_cast %276 : vector<1x256xf32> to vector<256xf32>
      %278 = vector.shape_cast %277 : vector<256xf32> to vector<1x256xf32>
      %279 = vector.broadcast %278 : vector<1x256xf32> to vector<2x256xf32>
      %280 = arith.mulf %275, %279 : vector<2x256xf32>
      %281 = arith.addf %274, %280 : vector<2x256xf32>
      %282 = vector.extract_strided_slice %21 {offsets = [0, 36], sizes = [2, 256], strides = [1, 1]} : vector<2x358xf32> to vector<2x256xf32>
      %c18_77 = arith.constant 18 : index
      %c0_78 = arith.constant 0 : index
      %283 = vector.load %arg4[%c18_77, %c0_78] : memref<49x256xf32, #tpu.memory_space<vmem>>, vector<1x256xf32>
      %284 = vector.shape_cast %283 : vector<1x256xf32> to vector<256xf32>
      %285 = vector.shape_cast %284 : vector<256xf32> to vector<1x256xf32>
      %286 = vector.broadcast %285 : vector<1x256xf32> to vector<2x256xf32>
      %287 = arith.mulf %282, %286 : vector<2x256xf32>
      %288 = arith.addf %281, %287 : vector<2x256xf32>
      %289 = vector.extract_strided_slice %20 {offsets = [0, 37], sizes = [2, 256], strides = [1, 1]} : vector<2x358xf32> to vector<2x256xf32>
      %c19 = arith.constant 19 : index
      %c0_79 = arith.constant 0 : index
      %290 = vector.load %arg3[%c19, %c0_79] : memref<49x256xf32, #tpu.memory_space<vmem>>, vector<1x256xf32>
      %291 = vector.shape_cast %290 : vector<1x256xf32> to vector<256xf32>
      %292 = vector.shape_cast %291 : vector<256xf32> to vector<1x256xf32>
      %293 = vector.broadcast %292 : vector<1x256xf32> to vector<2x256xf32>
      %294 = arith.mulf %289, %293 : vector<2x256xf32>
      %295 = arith.addf %288, %294 : vector<2x256xf32>
      %296 = vector.extract_strided_slice %21 {offsets = [0, 37], sizes = [2, 256], strides = [1, 1]} : vector<2x358xf32> to vector<2x256xf32>
      %c19_80 = arith.constant 19 : index
      %c0_81 = arith.constant 0 : index
      %297 = vector.load %arg4[%c19_80, %c0_81] : memref<49x256xf32, #tpu.memory_space<vmem>>, vector<1x256xf32>
      %298 = vector.shape_cast %297 : vector<1x256xf32> to vector<256xf32>
      %299 = vector.shape_cast %298 : vector<256xf32> to vector<1x256xf32>
      %300 = vector.broadcast %299 : vector<1x256xf32> to vector<2x256xf32>
      %301 = arith.mulf %296, %300 : vector<2x256xf32>
      %302 = arith.addf %295, %301 : vector<2x256xf32>
      %303 = vector.extract_strided_slice %20 {offsets = [0, 38], sizes = [2, 256], strides = [1, 1]} : vector<2x358xf32> to vector<2x256xf32>
      %c20 = arith.constant 20 : index
      %c0_82 = arith.constant 0 : index
      %304 = vector.load %arg3[%c20, %c0_82] : memref<49x256xf32, #tpu.memory_space<vmem>>, vector<1x256xf32>
      %305 = vector.shape_cast %304 : vector<1x256xf32> to vector<256xf32>
      %306 = vector.shape_cast %305 : vector<256xf32> to vector<1x256xf32>
      %307 = vector.broadcast %306 : vector<1x256xf32> to vector<2x256xf32>
      %308 = arith.mulf %303, %307 : vector<2x256xf32>
      %309 = arith.addf %302, %308 : vector<2x256xf32>
      %310 = vector.extract_strided_slice %21 {offsets = [0, 38], sizes = [2, 256], strides = [1, 1]} : vector<2x358xf32> to vector<2x256xf32>
      %c20_83 = arith.constant 20 : index
      %c0_84 = arith.constant 0 : index
      %311 = vector.load %arg4[%c20_83, %c0_84] : memref<49x256xf32, #tpu.memory_space<vmem>>, vector<1x256xf32>
      %312 = vector.shape_cast %311 : vector<1x256xf32> to vector<256xf32>
      %313 = vector.shape_cast %312 : vector<256xf32> to vector<1x256xf32>
      %314 = vector.broadcast %313 : vector<1x256xf32> to vector<2x256xf32>
      %315 = arith.mulf %310, %314 : vector<2x256xf32>
      %316 = arith.addf %309, %315 : vector<2x256xf32>
      %317 = vector.extract_strided_slice %20 {offsets = [0, 48], sizes = [2, 256], strides = [1, 1]} : vector<2x358xf32> to vector<2x256xf32>
      %c21 = arith.constant 21 : index
      %c0_85 = arith.constant 0 : index
      %318 = vector.load %arg3[%c21, %c0_85] : memref<49x256xf32, #tpu.memory_space<vmem>>, vector<1x256xf32>
      %319 = vector.shape_cast %318 : vector<1x256xf32> to vector<256xf32>
      %320 = vector.shape_cast %319 : vector<256xf32> to vector<1x256xf32>
      %321 = vector.broadcast %320 : vector<1x256xf32> to vector<2x256xf32>
      %322 = arith.mulf %317, %321 : vector<2x256xf32>
      %323 = arith.addf %316, %322 : vector<2x256xf32>
      %324 = vector.extract_strided_slice %21 {offsets = [0, 48], sizes = [2, 256], strides = [1, 1]} : vector<2x358xf32> to vector<2x256xf32>
      %c21_86 = arith.constant 21 : index
      %c0_87 = arith.constant 0 : index
      %325 = vector.load %arg4[%c21_86, %c0_87] : memref<49x256xf32, #tpu.memory_space<vmem>>, vector<1x256xf32>
      %326 = vector.shape_cast %325 : vector<1x256xf32> to vector<256xf32>
      %327 = vector.shape_cast %326 : vector<256xf32> to vector<1x256xf32>
      %328 = vector.broadcast %327 : vector<1x256xf32> to vector<2x256xf32>
      %329 = arith.mulf %324, %328 : vector<2x256xf32>
      %330 = arith.addf %323, %329 : vector<2x256xf32>
      %331 = vector.extract_strided_slice %20 {offsets = [0, 49], sizes = [2, 256], strides = [1, 1]} : vector<2x358xf32> to vector<2x256xf32>
      %c22 = arith.constant 22 : index
      %c0_88 = arith.constant 0 : index
      %332 = vector.load %arg3[%c22, %c0_88] : memref<49x256xf32, #tpu.memory_space<vmem>>, vector<1x256xf32>
      %333 = vector.shape_cast %332 : vector<1x256xf32> to vector<256xf32>
      %334 = vector.shape_cast %333 : vector<256xf32> to vector<1x256xf32>
      %335 = vector.broadcast %334 : vector<1x256xf32> to vector<2x256xf32>
      %336 = arith.mulf %331, %335 : vector<2x256xf32>
      %337 = arith.addf %330, %336 : vector<2x256xf32>
      %338 = vector.extract_strided_slice %21 {offsets = [0, 49], sizes = [2, 256], strides = [1, 1]} : vector<2x358xf32> to vector<2x256xf32>
      %c22_89 = arith.constant 22 : index
      %c0_90 = arith.constant 0 : index
      %339 = vector.load %arg4[%c22_89, %c0_90] : memref<49x256xf32, #tpu.memory_space<vmem>>, vector<1x256xf32>
      %340 = vector.shape_cast %339 : vector<1x256xf32> to vector<256xf32>
      %341 = vector.shape_cast %340 : vector<256xf32> to vector<1x256xf32>
      %342 = vector.broadcast %341 : vector<1x256xf32> to vector<2x256xf32>
      %343 = arith.mulf %338, %342 : vector<2x256xf32>
      %344 = arith.addf %337, %343 : vector<2x256xf32>
      %345 = vector.extract_strided_slice %20 {offsets = [0, 50], sizes = [2, 256], strides = [1, 1]} : vector<2x358xf32> to vector<2x256xf32>
      %c23 = arith.constant 23 : index
      %c0_91 = arith.constant 0 : index
      %346 = vector.load %arg3[%c23, %c0_91] : memref<49x256xf32, #tpu.memory_space<vmem>>, vector<1x256xf32>
      %347 = vector.shape_cast %346 : vector<1x256xf32> to vector<256xf32>
      %348 = vector.shape_cast %347 : vector<256xf32> to vector<1x256xf32>
      %349 = vector.broadcast %348 : vector<1x256xf32> to vector<2x256xf32>
      %350 = arith.mulf %345, %349 : vector<2x256xf32>
      %351 = arith.addf %344, %350 : vector<2x256xf32>
      %352 = vector.extract_strided_slice %21 {offsets = [0, 50], sizes = [2, 256], strides = [1, 1]} : vector<2x358xf32> to vector<2x256xf32>
      %c23_92 = arith.constant 23 : index
      %c0_93 = arith.constant 0 : index
      %353 = vector.load %arg4[%c23_92, %c0_93] : memref<49x256xf32, #tpu.memory_space<vmem>>, vector<1x256xf32>
      %354 = vector.shape_cast %353 : vector<1x256xf32> to vector<256xf32>
      %355 = vector.shape_cast %354 : vector<256xf32> to vector<1x256xf32>
      %356 = vector.broadcast %355 : vector<1x256xf32> to vector<2x256xf32>
      %357 = arith.mulf %352, %356 : vector<2x256xf32>
      %358 = arith.addf %351, %357 : vector<2x256xf32>
      %359 = vector.extract_strided_slice %20 {offsets = [0, 51], sizes = [2, 256], strides = [1, 1]} : vector<2x358xf32> to vector<2x256xf32>
      %c24 = arith.constant 24 : index
      %c0_94 = arith.constant 0 : index
      %360 = vector.load %arg3[%c24, %c0_94] : memref<49x256xf32, #tpu.memory_space<vmem>>, vector<1x256xf32>
      %361 = vector.shape_cast %360 : vector<1x256xf32> to vector<256xf32>
      %362 = vector.shape_cast %361 : vector<256xf32> to vector<1x256xf32>
      %363 = vector.broadcast %362 : vector<1x256xf32> to vector<2x256xf32>
      %364 = arith.mulf %359, %363 : vector<2x256xf32>
      %365 = arith.addf %358, %364 : vector<2x256xf32>
      %366 = vector.extract_strided_slice %21 {offsets = [0, 51], sizes = [2, 256], strides = [1, 1]} : vector<2x358xf32> to vector<2x256xf32>
      %c24_95 = arith.constant 24 : index
      %c0_96 = arith.constant 0 : index
      %367 = vector.load %arg4[%c24_95, %c0_96] : memref<49x256xf32, #tpu.memory_space<vmem>>, vector<1x256xf32>
      %368 = vector.shape_cast %367 : vector<1x256xf32> to vector<256xf32>
      %369 = vector.shape_cast %368 : vector<256xf32> to vector<1x256xf32>
      %370 = vector.broadcast %369 : vector<1x256xf32> to vector<2x256xf32>
      %371 = arith.mulf %366, %370 : vector<2x256xf32>
      %372 = arith.addf %365, %371 : vector<2x256xf32>
      %373 = vector.extract_strided_slice %20 {offsets = [0, 52], sizes = [2, 256], strides = [1, 1]} : vector<2x358xf32> to vector<2x256xf32>
      %c25 = arith.constant 25 : index
      %c0_97 = arith.constant 0 : index
      %374 = vector.load %arg3[%c25, %c0_97] : memref<49x256xf32, #tpu.memory_space<vmem>>, vector<1x256xf32>
      %375 = vector.shape_cast %374 : vector<1x256xf32> to vector<256xf32>
      %376 = vector.shape_cast %375 : vector<256xf32> to vector<1x256xf32>
      %377 = vector.broadcast %376 : vector<1x256xf32> to vector<2x256xf32>
      %378 = arith.mulf %373, %377 : vector<2x256xf32>
      %379 = arith.addf %372, %378 : vector<2x256xf32>
      %380 = vector.extract_strided_slice %21 {offsets = [0, 52], sizes = [2, 256], strides = [1, 1]} : vector<2x358xf32> to vector<2x256xf32>
      %c25_98 = arith.constant 25 : index
      %c0_99 = arith.constant 0 : index
      %381 = vector.load %arg4[%c25_98, %c0_99] : memref<49x256xf32, #tpu.memory_space<vmem>>, vector<1x256xf32>
      %382 = vector.shape_cast %381 : vector<1x256xf32> to vector<256xf32>
      %383 = vector.shape_cast %382 : vector<256xf32> to vector<1x256xf32>
      %384 = vector.broadcast %383 : vector<1x256xf32> to vector<2x256xf32>
      %385 = arith.mulf %380, %384 : vector<2x256xf32>
      %386 = arith.addf %379, %385 : vector<2x256xf32>
      %387 = vector.extract_strided_slice %20 {offsets = [0, 53], sizes = [2, 256], strides = [1, 1]} : vector<2x358xf32> to vector<2x256xf32>
      %c26 = arith.constant 26 : index
      %c0_100 = arith.constant 0 : index
      %388 = vector.load %arg3[%c26, %c0_100] : memref<49x256xf32, #tpu.memory_space<vmem>>, vector<1x256xf32>
      %389 = vector.shape_cast %388 : vector<1x256xf32> to vector<256xf32>
      %390 = vector.shape_cast %389 : vector<256xf32> to vector<1x256xf32>
      %391 = vector.broadcast %390 : vector<1x256xf32> to vector<2x256xf32>
      %392 = arith.mulf %387, %391 : vector<2x256xf32>
      %393 = arith.addf %386, %392 : vector<2x256xf32>
      %394 = vector.extract_strided_slice %21 {offsets = [0, 53], sizes = [2, 256], strides = [1, 1]} : vector<2x358xf32> to vector<2x256xf32>
      %c26_101 = arith.constant 26 : index
      %c0_102 = arith.constant 0 : index
      %395 = vector.load %arg4[%c26_101, %c0_102] : memref<49x256xf32, #tpu.memory_space<vmem>>, vector<1x256xf32>
      %396 = vector.shape_cast %395 : vector<1x256xf32> to vector<256xf32>
      %397 = vector.shape_cast %396 : vector<256xf32> to vector<1x256xf32>
      %398 = vector.broadcast %397 : vector<1x256xf32> to vector<2x256xf32>
      %399 = arith.mulf %394, %398 : vector<2x256xf32>
      %400 = arith.addf %393, %399 : vector<2x256xf32>
      %401 = vector.extract_strided_slice %20 {offsets = [0, 54], sizes = [2, 256], strides = [1, 1]} : vector<2x358xf32> to vector<2x256xf32>
      %c27 = arith.constant 27 : index
      %c0_103 = arith.constant 0 : index
      %402 = vector.load %arg3[%c27, %c0_103] : memref<49x256xf32, #tpu.memory_space<vmem>>, vector<1x256xf32>
      %403 = vector.shape_cast %402 : vector<1x256xf32> to vector<256xf32>
      %404 = vector.shape_cast %403 : vector<256xf32> to vector<1x256xf32>
      %405 = vector.broadcast %404 : vector<1x256xf32> to vector<2x256xf32>
      %406 = arith.mulf %401, %405 : vector<2x256xf32>
      %407 = arith.addf %400, %406 : vector<2x256xf32>
      %408 = vector.extract_strided_slice %21 {offsets = [0, 54], sizes = [2, 256], strides = [1, 1]} : vector<2x358xf32> to vector<2x256xf32>
      %c27_104 = arith.constant 27 : index
      %c0_105 = arith.constant 0 : index
      %409 = vector.load %arg4[%c27_104, %c0_105] : memref<49x256xf32, #tpu.memory_space<vmem>>, vector<1x256xf32>
      %410 = vector.shape_cast %409 : vector<1x256xf32> to vector<256xf32>
      %411 = vector.shape_cast %410 : vector<256xf32> to vector<1x256xf32>
      %412 = vector.broadcast %411 : vector<1x256xf32> to vector<2x256xf32>
      %413 = arith.mulf %408, %412 : vector<2x256xf32>
      %414 = arith.addf %407, %413 : vector<2x256xf32>
      %415 = vector.extract_strided_slice %20 {offsets = [0, 64], sizes = [2, 256], strides = [1, 1]} : vector<2x358xf32> to vector<2x256xf32>
      %c28 = arith.constant 28 : index
      %c0_106 = arith.constant 0 : index
      %416 = vector.load %arg3[%c28, %c0_106] : memref<49x256xf32, #tpu.memory_space<vmem>>, vector<1x256xf32>
      %417 = vector.shape_cast %416 : vector<1x256xf32> to vector<256xf32>
      %418 = vector.shape_cast %417 : vector<256xf32> to vector<1x256xf32>
      %419 = vector.broadcast %418 : vector<1x256xf32> to vector<2x256xf32>
      %420 = arith.mulf %415, %419 : vector<2x256xf32>
      %421 = arith.addf %414, %420 : vector<2x256xf32>
      %422 = vector.extract_strided_slice %21 {offsets = [0, 64], sizes = [2, 256], strides = [1, 1]} : vector<2x358xf32> to vector<2x256xf32>
      %c28_107 = arith.constant 28 : index
      %c0_108 = arith.constant 0 : index
      %423 = vector.load %arg4[%c28_107, %c0_108] : memref<49x256xf32, #tpu.memory_space<vmem>>, vector<1x256xf32>
      %424 = vector.shape_cast %423 : vector<1x256xf32> to vector<256xf32>
      %425 = vector.shape_cast %424 : vector<256xf32> to vector<1x256xf32>
      %426 = vector.broadcast %425 : vector<1x256xf32> to vector<2x256xf32>
      %427 = arith.mulf %422, %426 : vector<2x256xf32>
      %428 = arith.addf %421, %427 : vector<2x256xf32>
      %429 = vector.extract_strided_slice %20 {offsets = [0, 65], sizes = [2, 256], strides = [1, 1]} : vector<2x358xf32> to vector<2x256xf32>
      %c29 = arith.constant 29 : index
      %c0_109 = arith.constant 0 : index
      %430 = vector.load %arg3[%c29, %c0_109] : memref<49x256xf32, #tpu.memory_space<vmem>>, vector<1x256xf32>
      %431 = vector.shape_cast %430 : vector<1x256xf32> to vector<256xf32>
      %432 = vector.shape_cast %431 : vector<256xf32> to vector<1x256xf32>
      %433 = vector.broadcast %432 : vector<1x256xf32> to vector<2x256xf32>
      %434 = arith.mulf %429, %433 : vector<2x256xf32>
      %435 = arith.addf %428, %434 : vector<2x256xf32>
      %436 = vector.extract_strided_slice %21 {offsets = [0, 65], sizes = [2, 256], strides = [1, 1]} : vector<2x358xf32> to vector<2x256xf32>
      %c29_110 = arith.constant 29 : index
      %c0_111 = arith.constant 0 : index
      %437 = vector.load %arg4[%c29_110, %c0_111] : memref<49x256xf32, #tpu.memory_space<vmem>>, vector<1x256xf32>
      %438 = vector.shape_cast %437 : vector<1x256xf32> to vector<256xf32>
      %439 = vector.shape_cast %438 : vector<256xf32> to vector<1x256xf32>
      %440 = vector.broadcast %439 : vector<1x256xf32> to vector<2x256xf32>
      %441 = arith.mulf %436, %440 : vector<2x256xf32>
      %442 = arith.addf %435, %441 : vector<2x256xf32>
      %443 = vector.extract_strided_slice %20 {offsets = [0, 66], sizes = [2, 256], strides = [1, 1]} : vector<2x358xf32> to vector<2x256xf32>
      %c30 = arith.constant 30 : index
      %c0_112 = arith.constant 0 : index
      %444 = vector.load %arg3[%c30, %c0_112] : memref<49x256xf32, #tpu.memory_space<vmem>>, vector<1x256xf32>
      %445 = vector.shape_cast %444 : vector<1x256xf32> to vector<256xf32>
      %446 = vector.shape_cast %445 : vector<256xf32> to vector<1x256xf32>
      %447 = vector.broadcast %446 : vector<1x256xf32> to vector<2x256xf32>
      %448 = arith.mulf %443, %447 : vector<2x256xf32>
      %449 = arith.addf %442, %448 : vector<2x256xf32>
      %450 = vector.extract_strided_slice %21 {offsets = [0, 66], sizes = [2, 256], strides = [1, 1]} : vector<2x358xf32> to vector<2x256xf32>
      %c30_113 = arith.constant 30 : index
      %c0_114 = arith.constant 0 : index
      %451 = vector.load %arg4[%c30_113, %c0_114] : memref<49x256xf32, #tpu.memory_space<vmem>>, vector<1x256xf32>
      %452 = vector.shape_cast %451 : vector<1x256xf32> to vector<256xf32>
      %453 = vector.shape_cast %452 : vector<256xf32> to vector<1x256xf32>
      %454 = vector.broadcast %453 : vector<1x256xf32> to vector<2x256xf32>
      %455 = arith.mulf %450, %454 : vector<2x256xf32>
      %456 = arith.addf %449, %455 : vector<2x256xf32>
      %457 = vector.extract_strided_slice %20 {offsets = [0, 67], sizes = [2, 256], strides = [1, 1]} : vector<2x358xf32> to vector<2x256xf32>
      %c31 = arith.constant 31 : index
      %c0_115 = arith.constant 0 : index
      %458 = vector.load %arg3[%c31, %c0_115] : memref<49x256xf32, #tpu.memory_space<vmem>>, vector<1x256xf32>
      %459 = vector.shape_cast %458 : vector<1x256xf32> to vector<256xf32>
      %460 = vector.shape_cast %459 : vector<256xf32> to vector<1x256xf32>
      %461 = vector.broadcast %460 : vector<1x256xf32> to vector<2x256xf32>
      %462 = arith.mulf %457, %461 : vector<2x256xf32>
      %463 = arith.addf %456, %462 : vector<2x256xf32>
      %464 = vector.extract_strided_slice %21 {offsets = [0, 67], sizes = [2, 256], strides = [1, 1]} : vector<2x358xf32> to vector<2x256xf32>
      %c31_116 = arith.constant 31 : index
      %c0_117 = arith.constant 0 : index
      %465 = vector.load %arg4[%c31_116, %c0_117] : memref<49x256xf32, #tpu.memory_space<vmem>>, vector<1x256xf32>
      %466 = vector.shape_cast %465 : vector<1x256xf32> to vector<256xf32>
      %467 = vector.shape_cast %466 : vector<256xf32> to vector<1x256xf32>
      %468 = vector.broadcast %467 : vector<1x256xf32> to vector<2x256xf32>
      %469 = arith.mulf %464, %468 : vector<2x256xf32>
      %470 = arith.addf %463, %469 : vector<2x256xf32>
      %471 = vector.extract_strided_slice %20 {offsets = [0, 68], sizes = [2, 256], strides = [1, 1]} : vector<2x358xf32> to vector<2x256xf32>
      %c32 = arith.constant 32 : index
      %c0_118 = arith.constant 0 : index
      %472 = vector.load %arg3[%c32, %c0_118] : memref<49x256xf32, #tpu.memory_space<vmem>>, vector<1x256xf32>
      %473 = vector.shape_cast %472 : vector<1x256xf32> to vector<256xf32>
      %474 = vector.shape_cast %473 : vector<256xf32> to vector<1x256xf32>
      %475 = vector.broadcast %474 : vector<1x256xf32> to vector<2x256xf32>
      %476 = arith.mulf %471, %475 : vector<2x256xf32>
      %477 = arith.addf %470, %476 : vector<2x256xf32>
      %478 = vector.extract_strided_slice %21 {offsets = [0, 68], sizes = [2, 256], strides = [1, 1]} : vector<2x358xf32> to vector<2x256xf32>
      %c32_119 = arith.constant 32 : index
      %c0_120 = arith.constant 0 : index
      %479 = vector.load %arg4[%c32_119, %c0_120] : memref<49x256xf32, #tpu.memory_space<vmem>>, vector<1x256xf32>
      %480 = vector.shape_cast %479 : vector<1x256xf32> to vector<256xf32>
      %481 = vector.shape_cast %480 : vector<256xf32> to vector<1x256xf32>
      %482 = vector.broadcast %481 : vector<1x256xf32> to vector<2x256xf32>
      %483 = arith.mulf %478, %482 : vector<2x256xf32>
      %484 = arith.addf %477, %483 : vector<2x256xf32>
      %485 = vector.extract_strided_slice %20 {offsets = [0, 69], sizes = [2, 256], strides = [1, 1]} : vector<2x358xf32> to vector<2x256xf32>
      %c33 = arith.constant 33 : index
      %c0_121 = arith.constant 0 : index
      %486 = vector.load %arg3[%c33, %c0_121] : memref<49x256xf32, #tpu.memory_space<vmem>>, vector<1x256xf32>
      %487 = vector.shape_cast %486 : vector<1x256xf32> to vector<256xf32>
      %488 = vector.shape_cast %487 : vector<256xf32> to vector<1x256xf32>
      %489 = vector.broadcast %488 : vector<1x256xf32> to vector<2x256xf32>
      %490 = arith.mulf %485, %489 : vector<2x256xf32>
      %491 = arith.addf %484, %490 : vector<2x256xf32>
      %492 = vector.extract_strided_slice %21 {offsets = [0, 69], sizes = [2, 256], strides = [1, 1]} : vector<2x358xf32> to vector<2x256xf32>
      %c33_122 = arith.constant 33 : index
      %c0_123 = arith.constant 0 : index
      %493 = vector.load %arg4[%c33_122, %c0_123] : memref<49x256xf32, #tpu.memory_space<vmem>>, vector<1x256xf32>
      %494 = vector.shape_cast %493 : vector<1x256xf32> to vector<256xf32>
      %495 = vector.shape_cast %494 : vector<256xf32> to vector<1x256xf32>
      %496 = vector.broadcast %495 : vector<1x256xf32> to vector<2x256xf32>
      %497 = arith.mulf %492, %496 : vector<2x256xf32>
      %498 = arith.addf %491, %497 : vector<2x256xf32>
      %499 = vector.extract_strided_slice %20 {offsets = [0, 70], sizes = [2, 256], strides = [1, 1]} : vector<2x358xf32> to vector<2x256xf32>
      %c34 = arith.constant 34 : index
      %c0_124 = arith.constant 0 : index
      %500 = vector.load %arg3[%c34, %c0_124] : memref<49x256xf32, #tpu.memory_space<vmem>>, vector<1x256xf32>
      %501 = vector.shape_cast %500 : vector<1x256xf32> to vector<256xf32>
      %502 = vector.shape_cast %501 : vector<256xf32> to vector<1x256xf32>
      %503 = vector.broadcast %502 : vector<1x256xf32> to vector<2x256xf32>
      %504 = arith.mulf %499, %503 : vector<2x256xf32>
      %505 = arith.addf %498, %504 : vector<2x256xf32>
      %506 = vector.extract_strided_slice %21 {offsets = [0, 70], sizes = [2, 256], strides = [1, 1]} : vector<2x358xf32> to vector<2x256xf32>
      %c34_125 = arith.constant 34 : index
      %c0_126 = arith.constant 0 : index
      %507 = vector.load %arg4[%c34_125, %c0_126] : memref<49x256xf32, #tpu.memory_space<vmem>>, vector<1x256xf32>
      %508 = vector.shape_cast %507 : vector<1x256xf32> to vector<256xf32>
      %509 = vector.shape_cast %508 : vector<256xf32> to vector<1x256xf32>
      %510 = vector.broadcast %509 : vector<1x256xf32> to vector<2x256xf32>
      %511 = arith.mulf %506, %510 : vector<2x256xf32>
      %512 = arith.addf %505, %511 : vector<2x256xf32>
      %513 = vector.extract_strided_slice %20 {offsets = [0, 80], sizes = [2, 256], strides = [1, 1]} : vector<2x358xf32> to vector<2x256xf32>
      %c35 = arith.constant 35 : index
      %c0_127 = arith.constant 0 : index
      %514 = vector.load %arg3[%c35, %c0_127] : memref<49x256xf32, #tpu.memory_space<vmem>>, vector<1x256xf32>
      %515 = vector.shape_cast %514 : vector<1x256xf32> to vector<256xf32>
      %516 = vector.shape_cast %515 : vector<256xf32> to vector<1x256xf32>
      %517 = vector.broadcast %516 : vector<1x256xf32> to vector<2x256xf32>
      %518 = arith.mulf %513, %517 : vector<2x256xf32>
      %519 = arith.addf %512, %518 : vector<2x256xf32>
      %520 = vector.extract_strided_slice %21 {offsets = [0, 80], sizes = [2, 256], strides = [1, 1]} : vector<2x358xf32> to vector<2x256xf32>
      %c35_128 = arith.constant 35 : index
      %c0_129 = arith.constant 0 : index
      %521 = vector.load %arg4[%c35_128, %c0_129] : memref<49x256xf32, #tpu.memory_space<vmem>>, vector<1x256xf32>
      %522 = vector.shape_cast %521 : vector<1x256xf32> to vector<256xf32>
      %523 = vector.shape_cast %522 : vector<256xf32> to vector<1x256xf32>
      %524 = vector.broadcast %523 : vector<1x256xf32> to vector<2x256xf32>
      %525 = arith.mulf %520, %524 : vector<2x256xf32>
      %526 = arith.addf %519, %525 : vector<2x256xf32>
      %527 = vector.extract_strided_slice %20 {offsets = [0, 81], sizes = [2, 256], strides = [1, 1]} : vector<2x358xf32> to vector<2x256xf32>
      %c36 = arith.constant 36 : index
      %c0_130 = arith.constant 0 : index
      %528 = vector.load %arg3[%c36, %c0_130] : memref<49x256xf32, #tpu.memory_space<vmem>>, vector<1x256xf32>
      %529 = vector.shape_cast %528 : vector<1x256xf32> to vector<256xf32>
      %530 = vector.shape_cast %529 : vector<256xf32> to vector<1x256xf32>
      %531 = vector.broadcast %530 : vector<1x256xf32> to vector<2x256xf32>
      %532 = arith.mulf %527, %531 : vector<2x256xf32>
      %533 = arith.addf %526, %532 : vector<2x256xf32>
      %534 = vector.extract_strided_slice %21 {offsets = [0, 81], sizes = [2, 256], strides = [1, 1]} : vector<2x358xf32> to vector<2x256xf32>
      %c36_131 = arith.constant 36 : index
      %c0_132 = arith.constant 0 : index
      %535 = vector.load %arg4[%c36_131, %c0_132] : memref<49x256xf32, #tpu.memory_space<vmem>>, vector<1x256xf32>
      %536 = vector.shape_cast %535 : vector<1x256xf32> to vector<256xf32>
      %537 = vector.shape_cast %536 : vector<256xf32> to vector<1x256xf32>
      %538 = vector.broadcast %537 : vector<1x256xf32> to vector<2x256xf32>
      %539 = arith.mulf %534, %538 : vector<2x256xf32>
      %540 = arith.addf %533, %539 : vector<2x256xf32>
      %541 = vector.extract_strided_slice %20 {offsets = [0, 82], sizes = [2, 256], strides = [1, 1]} : vector<2x358xf32> to vector<2x256xf32>
      %c37 = arith.constant 37 : index
      %c0_133 = arith.constant 0 : index
      %542 = vector.load %arg3[%c37, %c0_133] : memref<49x256xf32, #tpu.memory_space<vmem>>, vector<1x256xf32>
      %543 = vector.shape_cast %542 : vector<1x256xf32> to vector<256xf32>
      %544 = vector.shape_cast %543 : vector<256xf32> to vector<1x256xf32>
      %545 = vector.broadcast %544 : vector<1x256xf32> to vector<2x256xf32>
      %546 = arith.mulf %541, %545 : vector<2x256xf32>
      %547 = arith.addf %540, %546 : vector<2x256xf32>
      %548 = vector.extract_strided_slice %21 {offsets = [0, 82], sizes = [2, 256], strides = [1, 1]} : vector<2x358xf32> to vector<2x256xf32>
      %c37_134 = arith.constant 37 : index
      %c0_135 = arith.constant 0 : index
      %549 = vector.load %arg4[%c37_134, %c0_135] : memref<49x256xf32, #tpu.memory_space<vmem>>, vector<1x256xf32>
      %550 = vector.shape_cast %549 : vector<1x256xf32> to vector<256xf32>
      %551 = vector.shape_cast %550 : vector<256xf32> to vector<1x256xf32>
      %552 = vector.broadcast %551 : vector<1x256xf32> to vector<2x256xf32>
      %553 = arith.mulf %548, %552 : vector<2x256xf32>
      %554 = arith.addf %547, %553 : vector<2x256xf32>
      %555 = vector.extract_strided_slice %20 {offsets = [0, 83], sizes = [2, 256], strides = [1, 1]} : vector<2x358xf32> to vector<2x256xf32>
      %c38 = arith.constant 38 : index
      %c0_136 = arith.constant 0 : index
      %556 = vector.load %arg3[%c38, %c0_136] : memref<49x256xf32, #tpu.memory_space<vmem>>, vector<1x256xf32>
      %557 = vector.shape_cast %556 : vector<1x256xf32> to vector<256xf32>
      %558 = vector.shape_cast %557 : vector<256xf32> to vector<1x256xf32>
      %559 = vector.broadcast %558 : vector<1x256xf32> to vector<2x256xf32>
      %560 = arith.mulf %555, %559 : vector<2x256xf32>
      %561 = arith.addf %554, %560 : vector<2x256xf32>
      %562 = vector.extract_strided_slice %21 {offsets = [0, 83], sizes = [2, 256], strides = [1, 1]} : vector<2x358xf32> to vector<2x256xf32>
      %c38_137 = arith.constant 38 : index
      %c0_138 = arith.constant 0 : index
      %563 = vector.load %arg4[%c38_137, %c0_138] : memref<49x256xf32, #tpu.memory_space<vmem>>, vector<1x256xf32>
      %564 = vector.shape_cast %563 : vector<1x256xf32> to vector<256xf32>
      %565 = vector.shape_cast %564 : vector<256xf32> to vector<1x256xf32>
      %566 = vector.broadcast %565 : vector<1x256xf32> to vector<2x256xf32>
      %567 = arith.mulf %562, %566 : vector<2x256xf32>
      %568 = arith.addf %561, %567 : vector<2x256xf32>
      %569 = vector.extract_strided_slice %20 {offsets = [0, 84], sizes = [2, 256], strides = [1, 1]} : vector<2x358xf32> to vector<2x256xf32>
      %c39 = arith.constant 39 : index
      %c0_139 = arith.constant 0 : index
      %570 = vector.load %arg3[%c39, %c0_139] : memref<49x256xf32, #tpu.memory_space<vmem>>, vector<1x256xf32>
      %571 = vector.shape_cast %570 : vector<1x256xf32> to vector<256xf32>
      %572 = vector.shape_cast %571 : vector<256xf32> to vector<1x256xf32>
      %573 = vector.broadcast %572 : vector<1x256xf32> to vector<2x256xf32>
      %574 = arith.mulf %569, %573 : vector<2x256xf32>
      %575 = arith.addf %568, %574 : vector<2x256xf32>
      %576 = vector.extract_strided_slice %21 {offsets = [0, 84], sizes = [2, 256], strides = [1, 1]} : vector<2x358xf32> to vector<2x256xf32>
      %c39_140 = arith.constant 39 : index
      %c0_141 = arith.constant 0 : index
      %577 = vector.load %arg4[%c39_140, %c0_141] : memref<49x256xf32, #tpu.memory_space<vmem>>, vector<1x256xf32>
      %578 = vector.shape_cast %577 : vector<1x256xf32> to vector<256xf32>
      %579 = vector.shape_cast %578 : vector<256xf32> to vector<1x256xf32>
      %580 = vector.broadcast %579 : vector<1x256xf32> to vector<2x256xf32>
      %581 = arith.mulf %576, %580 : vector<2x256xf32>
      %582 = arith.addf %575, %581 : vector<2x256xf32>
      %583 = vector.extract_strided_slice %20 {offsets = [0, 85], sizes = [2, 256], strides = [1, 1]} : vector<2x358xf32> to vector<2x256xf32>
      %c40 = arith.constant 40 : index
      %c0_142 = arith.constant 0 : index
      %584 = vector.load %arg3[%c40, %c0_142] : memref<49x256xf32, #tpu.memory_space<vmem>>, vector<1x256xf32>
      %585 = vector.shape_cast %584 : vector<1x256xf32> to vector<256xf32>
      %586 = vector.shape_cast %585 : vector<256xf32> to vector<1x256xf32>
      %587 = vector.broadcast %586 : vector<1x256xf32> to vector<2x256xf32>
      %588 = arith.mulf %583, %587 : vector<2x256xf32>
      %589 = arith.addf %582, %588 : vector<2x256xf32>
      %590 = vector.extract_strided_slice %21 {offsets = [0, 85], sizes = [2, 256], strides = [1, 1]} : vector<2x358xf32> to vector<2x256xf32>
      %c40_143 = arith.constant 40 : index
      %c0_144 = arith.constant 0 : index
      %591 = vector.load %arg4[%c40_143, %c0_144] : memref<49x256xf32, #tpu.memory_space<vmem>>, vector<1x256xf32>
      %592 = vector.shape_cast %591 : vector<1x256xf32> to vector<256xf32>
      %593 = vector.shape_cast %592 : vector<256xf32> to vector<1x256xf32>
      %594 = vector.broadcast %593 : vector<1x256xf32> to vector<2x256xf32>
      %595 = arith.mulf %590, %594 : vector<2x256xf32>
      %596 = arith.addf %589, %595 : vector<2x256xf32>
      %597 = vector.extract_strided_slice %20 {offsets = [0, 86], sizes = [2, 256], strides = [1, 1]} : vector<2x358xf32> to vector<2x256xf32>
      %c41 = arith.constant 41 : index
      %c0_145 = arith.constant 0 : index
      %598 = vector.load %arg3[%c41, %c0_145] : memref<49x256xf32, #tpu.memory_space<vmem>>, vector<1x256xf32>
      %599 = vector.shape_cast %598 : vector<1x256xf32> to vector<256xf32>
      %600 = vector.shape_cast %599 : vector<256xf32> to vector<1x256xf32>
      %601 = vector.broadcast %600 : vector<1x256xf32> to vector<2x256xf32>
      %602 = arith.mulf %597, %601 : vector<2x256xf32>
      %603 = arith.addf %596, %602 : vector<2x256xf32>
      %604 = vector.extract_strided_slice %21 {offsets = [0, 86], sizes = [2, 256], strides = [1, 1]} : vector<2x358xf32> to vector<2x256xf32>
      %c41_146 = arith.constant 41 : index
      %c0_147 = arith.constant 0 : index
      %605 = vector.load %arg4[%c41_146, %c0_147] : memref<49x256xf32, #tpu.memory_space<vmem>>, vector<1x256xf32>
      %606 = vector.shape_cast %605 : vector<1x256xf32> to vector<256xf32>
      %607 = vector.shape_cast %606 : vector<256xf32> to vector<1x256xf32>
      %608 = vector.broadcast %607 : vector<1x256xf32> to vector<2x256xf32>
      %609 = arith.mulf %604, %608 : vector<2x256xf32>
      %610 = arith.addf %603, %609 : vector<2x256xf32>
      %611 = vector.extract_strided_slice %20 {offsets = [0, 96], sizes = [2, 256], strides = [1, 1]} : vector<2x358xf32> to vector<2x256xf32>
      %c42 = arith.constant 42 : index
      %c0_148 = arith.constant 0 : index
      %612 = vector.load %arg3[%c42, %c0_148] : memref<49x256xf32, #tpu.memory_space<vmem>>, vector<1x256xf32>
      %613 = vector.shape_cast %612 : vector<1x256xf32> to vector<256xf32>
      %614 = vector.shape_cast %613 : vector<256xf32> to vector<1x256xf32>
      %615 = vector.broadcast %614 : vector<1x256xf32> to vector<2x256xf32>
      %616 = arith.mulf %611, %615 : vector<2x256xf32>
      %617 = arith.addf %610, %616 : vector<2x256xf32>
      %618 = vector.extract_strided_slice %21 {offsets = [0, 96], sizes = [2, 256], strides = [1, 1]} : vector<2x358xf32> to vector<2x256xf32>
      %c42_149 = arith.constant 42 : index
      %c0_150 = arith.constant 0 : index
      %619 = vector.load %arg4[%c42_149, %c0_150] : memref<49x256xf32, #tpu.memory_space<vmem>>, vector<1x256xf32>
      %620 = vector.shape_cast %619 : vector<1x256xf32> to vector<256xf32>
      %621 = vector.shape_cast %620 : vector<256xf32> to vector<1x256xf32>
      %622 = vector.broadcast %621 : vector<1x256xf32> to vector<2x256xf32>
      %623 = arith.mulf %618, %622 : vector<2x256xf32>
      %624 = arith.addf %617, %623 : vector<2x256xf32>
      %625 = vector.extract_strided_slice %20 {offsets = [0, 97], sizes = [2, 256], strides = [1, 1]} : vector<2x358xf32> to vector<2x256xf32>
      %c43 = arith.constant 43 : index
      %c0_151 = arith.constant 0 : index
      %626 = vector.load %arg3[%c43, %c0_151] : memref<49x256xf32, #tpu.memory_space<vmem>>, vector<1x256xf32>
      %627 = vector.shape_cast %626 : vector<1x256xf32> to vector<256xf32>
      %628 = vector.shape_cast %627 : vector<256xf32> to vector<1x256xf32>
      %629 = vector.broadcast %628 : vector<1x256xf32> to vector<2x256xf32>
      %630 = arith.mulf %625, %629 : vector<2x256xf32>
      %631 = arith.addf %624, %630 : vector<2x256xf32>
      %632 = vector.extract_strided_slice %21 {offsets = [0, 97], sizes = [2, 256], strides = [1, 1]} : vector<2x358xf32> to vector<2x256xf32>
      %c43_152 = arith.constant 43 : index
      %c0_153 = arith.constant 0 : index
      %633 = vector.load %arg4[%c43_152, %c0_153] : memref<49x256xf32, #tpu.memory_space<vmem>>, vector<1x256xf32>
      %634 = vector.shape_cast %633 : vector<1x256xf32> to vector<256xf32>
      %635 = vector.shape_cast %634 : vector<256xf32> to vector<1x256xf32>
      %636 = vector.broadcast %635 : vector<1x256xf32> to vector<2x256xf32>
      %637 = arith.mulf %632, %636 : vector<2x256xf32>
      %638 = arith.addf %631, %637 : vector<2x256xf32>
      %639 = vector.extract_strided_slice %20 {offsets = [0, 98], sizes = [2, 256], strides = [1, 1]} : vector<2x358xf32> to vector<2x256xf32>
      %c44 = arith.constant 44 : index
      %c0_154 = arith.constant 0 : index
      %640 = vector.load %arg3[%c44, %c0_154] : memref<49x256xf32, #tpu.memory_space<vmem>>, vector<1x256xf32>
      %641 = vector.shape_cast %640 : vector<1x256xf32> to vector<256xf32>
      %642 = vector.shape_cast %641 : vector<256xf32> to vector<1x256xf32>
      %643 = vector.broadcast %642 : vector<1x256xf32> to vector<2x256xf32>
      %644 = arith.mulf %639, %643 : vector<2x256xf32>
      %645 = arith.addf %638, %644 : vector<2x256xf32>
      %646 = vector.extract_strided_slice %21 {offsets = [0, 98], sizes = [2, 256], strides = [1, 1]} : vector<2x358xf32> to vector<2x256xf32>
      %c44_155 = arith.constant 44 : index
      %c0_156 = arith.constant 0 : index
      %647 = vector.load %arg4[%c44_155, %c0_156] : memref<49x256xf32, #tpu.memory_space<vmem>>, vector<1x256xf32>
      %648 = vector.shape_cast %647 : vector<1x256xf32> to vector<256xf32>
      %649 = vector.shape_cast %648 : vector<256xf32> to vector<1x256xf32>
      %650 = vector.broadcast %649 : vector<1x256xf32> to vector<2x256xf32>
      %651 = arith.mulf %646, %650 : vector<2x256xf32>
      %652 = arith.addf %645, %651 : vector<2x256xf32>
      %653 = vector.extract_strided_slice %20 {offsets = [0, 99], sizes = [2, 256], strides = [1, 1]} : vector<2x358xf32> to vector<2x256xf32>
      %c45 = arith.constant 45 : index
      %c0_157 = arith.constant 0 : index
      %654 = vector.load %arg3[%c45, %c0_157] : memref<49x256xf32, #tpu.memory_space<vmem>>, vector<1x256xf32>
      %655 = vector.shape_cast %654 : vector<1x256xf32> to vector<256xf32>
      %656 = vector.shape_cast %655 : vector<256xf32> to vector<1x256xf32>
      %657 = vector.broadcast %656 : vector<1x256xf32> to vector<2x256xf32>
      %658 = arith.mulf %653, %657 : vector<2x256xf32>
      %659 = arith.addf %652, %658 : vector<2x256xf32>
      %660 = vector.extract_strided_slice %21 {offsets = [0, 99], sizes = [2, 256], strides = [1, 1]} : vector<2x358xf32> to vector<2x256xf32>
      %c45_158 = arith.constant 45 : index
      %c0_159 = arith.constant 0 : index
      %661 = vector.load %arg4[%c45_158, %c0_159] : memref<49x256xf32, #tpu.memory_space<vmem>>, vector<1x256xf32>
      %662 = vector.shape_cast %661 : vector<1x256xf32> to vector<256xf32>
      %663 = vector.shape_cast %662 : vector<256xf32> to vector<1x256xf32>
      %664 = vector.broadcast %663 : vector<1x256xf32> to vector<2x256xf32>
      %665 = arith.mulf %660, %664 : vector<2x256xf32>
      %666 = arith.addf %659, %665 : vector<2x256xf32>
      %667 = vector.extract_strided_slice %20 {offsets = [0, 100], sizes = [2, 256], strides = [1, 1]} : vector<2x358xf32> to vector<2x256xf32>
      %c46 = arith.constant 46 : index
      %c0_160 = arith.constant 0 : index
      %668 = vector.load %arg3[%c46, %c0_160] : memref<49x256xf32, #tpu.memory_space<vmem>>, vector<1x256xf32>
      %669 = vector.shape_cast %668 : vector<1x256xf32> to vector<256xf32>
      %670 = vector.shape_cast %669 : vector<256xf32> to vector<1x256xf32>
      %671 = vector.broadcast %670 : vector<1x256xf32> to vector<2x256xf32>
      %672 = arith.mulf %667, %671 : vector<2x256xf32>
      %673 = arith.addf %666, %672 : vector<2x256xf32>
      %674 = vector.extract_strided_slice %21 {offsets = [0, 100], sizes = [2, 256], strides = [1, 1]} : vector<2x358xf32> to vector<2x256xf32>
      %c46_161 = arith.constant 46 : index
      %c0_162 = arith.constant 0 : index
      %675 = vector.load %arg4[%c46_161, %c0_162] : memref<49x256xf32, #tpu.memory_space<vmem>>, vector<1x256xf32>
      %676 = vector.shape_cast %675 : vector<1x256xf32> to vector<256xf32>
      %677 = vector.shape_cast %676 : vector<256xf32> to vector<1x256xf32>
      %678 = vector.broadcast %677 : vector<1x256xf32> to vector<2x256xf32>
      %679 = arith.mulf %674, %678 : vector<2x256xf32>
      %680 = arith.addf %673, %679 : vector<2x256xf32>
      %681 = vector.extract_strided_slice %20 {offsets = [0, 101], sizes = [2, 256], strides = [1, 1]} : vector<2x358xf32> to vector<2x256xf32>
      %c47 = arith.constant 47 : index
      %c0_163 = arith.constant 0 : index
      %682 = vector.load %arg3[%c47, %c0_163] : memref<49x256xf32, #tpu.memory_space<vmem>>, vector<1x256xf32>
      %683 = vector.shape_cast %682 : vector<1x256xf32> to vector<256xf32>
      %684 = vector.shape_cast %683 : vector<256xf32> to vector<1x256xf32>
      %685 = vector.broadcast %684 : vector<1x256xf32> to vector<2x256xf32>
      %686 = arith.mulf %681, %685 : vector<2x256xf32>
      %687 = arith.addf %680, %686 : vector<2x256xf32>
      %688 = vector.extract_strided_slice %21 {offsets = [0, 101], sizes = [2, 256], strides = [1, 1]} : vector<2x358xf32> to vector<2x256xf32>
      %c47_164 = arith.constant 47 : index
      %c0_165 = arith.constant 0 : index
      %689 = vector.load %arg4[%c47_164, %c0_165] : memref<49x256xf32, #tpu.memory_space<vmem>>, vector<1x256xf32>
      %690 = vector.shape_cast %689 : vector<1x256xf32> to vector<256xf32>
      %691 = vector.shape_cast %690 : vector<256xf32> to vector<1x256xf32>
      %692 = vector.broadcast %691 : vector<1x256xf32> to vector<2x256xf32>
      %693 = arith.mulf %688, %692 : vector<2x256xf32>
      %694 = arith.addf %687, %693 : vector<2x256xf32>
      %695 = vector.extract_strided_slice %20 {offsets = [0, 102], sizes = [2, 256], strides = [1, 1]} : vector<2x358xf32> to vector<2x256xf32>
      %c48 = arith.constant 48 : index
      %c0_166 = arith.constant 0 : index
      %696 = vector.load %arg3[%c48, %c0_166] : memref<49x256xf32, #tpu.memory_space<vmem>>, vector<1x256xf32>
      %697 = vector.shape_cast %696 : vector<1x256xf32> to vector<256xf32>
      %698 = vector.shape_cast %697 : vector<256xf32> to vector<1x256xf32>
      %699 = vector.broadcast %698 : vector<1x256xf32> to vector<2x256xf32>
      %700 = arith.mulf %695, %699 : vector<2x256xf32>
      %701 = arith.addf %694, %700 : vector<2x256xf32>
      %702 = vector.extract_strided_slice %21 {offsets = [0, 102], sizes = [2, 256], strides = [1, 1]} : vector<2x358xf32> to vector<2x256xf32>
      %c48_167 = arith.constant 48 : index
      %c0_168 = arith.constant 0 : index
      %703 = vector.load %arg4[%c48_167, %c0_168] : memref<49x256xf32, #tpu.memory_space<vmem>>, vector<1x256xf32>
      %704 = vector.shape_cast %703 : vector<1x256xf32> to vector<256xf32>
      %705 = vector.shape_cast %704 : vector<256xf32> to vector<1x256xf32>
      %706 = vector.broadcast %705 : vector<1x256xf32> to vector<2x256xf32>
      %707 = arith.mulf %702, %706 : vector<2x256xf32>
      %708 = arith.addf %701, %707 : vector<2x256xf32>
      %cst_169 = arith.constant 0.166666672 : f32
      %709 = vector.broadcast %cst_169 : f32 to vector<2x256xf32>
      %710 = arith.mulf %708, %709 : vector<2x256xf32>
      %cst_170 = arith.constant 5.000000e-01 : f32
      %711 = vector.broadcast %cst_170 : f32 to vector<2x256xf32>
      %712 = arith.addf %710, %711 : vector<2x256xf32>
      %cst_171 = arith.constant 0.000000e+00 : f32
      %cst_172 = arith.constant 1.000000e+00 : f32
      %713 = vector.broadcast %cst_171 : f32 to vector<2x256xf32>
      %714 = arith.maximumf %713, %712 : vector<2x256xf32>
      %715 = vector.broadcast %cst_172 : f32 to vector<2x256xf32>
      %716 = arith.minimumf %715, %714 : vector<2x256xf32>
      %c0_173 = arith.constant 0 : index
      %c0_174 = arith.constant 0 : index
      %717 = vector.load %arg5[%c0_173, %c0_174] : memref<2x256xf32, #tpu.memory_space<vmem>>, vector<2x256xf32>
      tpu.vector_store %arg5[%c0_173, %c0_174], %716 {strides = array<i32>} : memref<2x256xf32, #tpu.memory_space<vmem>>, vector<2x256xf32>,
    } else {
    }
    return
  }
  func.func @transform_0(%arg0: i32, %arg1: i32) -> (i32, i32, i32) {
    %c0_i32 = arith.constant 0 : i32
    %c0_i32_0 = arith.constant 0 : i32
    return %arg0, %arg1, %c0_i32 : i32, i32, i32
  }
  func.func @transform_1(%arg0: i32, %arg1: i32) -> (i32, i32) {
    %c0_i32 = arith.constant 0 : i32
    %c0_i32_0 = arith.constant 0 : i32
    %c0_i32_1 = arith.constant 0 : i32
    return %c0_i32, %c0_i32_0 : i32, i32
  }
  func.func @transform_2(%arg0: i32, %arg1: i32) -> (i32, i32) {
    %c0_i32 = arith.constant 0 : i32
    %c0_i32_0 = arith.constant 0 : i32
    %c0_i32_1 = arith.constant 0 : i32
    return %c0_i32, %c0_i32_0 : i32, i32
  }
  func.func @transform_3(%arg0: i32, %arg1: i32) -> (i32, i32) {
    %c0_i32 = arith.constant 0 : i32
    %c0_i32_0 = arith.constant 0 : i32
    return %arg0, %c0_i32 : i32, i32
  }
}

</mosaic_0001>

<bundles_post_ra>
// kernel: tpu_custom_call.1
= control target key start
LH: loop header
LB: loop body
LE: loop exit
PB: predicated region body
PF: predicated region fallthrough
CT: control target
= control target key end

     0   :  { %8 = vsyncpa [#allocation5], 0  ;;  %s6045_s0 = inlined_call_operand.hbm [shape: f32[2,4,256], index: 0, kind: input, shape index: {}]   ;;  %s6046_s1 = inlined_call_operand.hbm [shape: f32[49,256], index: 1, kind: input, shape index: {}]   ;;  %s6047_s2 = inlined_call_operand.hbm [shape: f32[49,256], index: 2, kind: input, shape index: {}]   ;;  %s6048_s3 = inlined_call_operand.hbm [shape: f32[2,256], index: 3, kind: output, shape index: {}]  }
   0x1   :  { %9 = vsyncpa [#allocation8], 0 }
   0x2   :  { %10 = vsyncpa [#allocation6], 0  ;;  %s4149_s12 = smov [#allocation7]   ;;  %s4055_s16 = scalar_lea.hbm %s6046_s1, 1792 }
   0x3   :  { %s28_s13 = sshll.u32 %s4149_s12, 4  ;;  %p4056_p0 = scmp.ne.s32.totalorder %s6046_s1, %s4055_s16  ;;  %s29_s13 = int_to_ptr.vmem [resolvable:$true] %s28_s13 }
   0x4   :  { %p4059_p1 = scmp.lt.u32.totalorder %s4055_s16, %s6046_s1 }
   0x6   :  { %p4061_p2 = pnand %p4059_p1, %p4056_p0 }
   0x8   :  { %4064 = shalt.err (!%p4061_p2)
}
   0x9   :  { %s4065_s21 = scalar_lea.vmem %s29_s13, 1792  ;;  %p4070_p4 = scmp.lt.s32.totalorder %s29_s13, %s29_s13 }
   0xa   :  { %p4066_p3 = scmp.ne.s32.totalorder %s29_s13, %s4065_s21  ;;  %p4071_p5 = scmp.lt.s32.totalorder %s4065_s21, %s4065_s21 }
   0xc   :  { %p4072_p6 = por %p4071_p5, %p4070_p4 }
   0xe   :  { %p4073_p7 = pnand %p4072_p6, %p4066_p3 }
  0x10   :  { %4076 = shalt.err (!%p4073_p7)
}
  0x11   :  { %s4150_s22 = smov 256   ;;  %s4151_s23 = smov 16  }
  0x12   :  { %34 = dma.hbm_to_vmem [thread:$0]  %s6046_s1, 1792, %s29_s13, [#allocation8], %s4150_s22, %s4150_s22, %s4151_s23  }
  0x13   :  { %s4152_s26 = smov [#allocation4]   ;;  %s4077_s30 = scalar_lea.hbm %s6045_s0, 256 }
  0x14   :  { %s16_s27 = sshll.u32 %s4152_s26, 4  ;;  %p4078_p8 = scmp.ne.s32.totalorder %s6045_s0, %s4077_s30  ;;  %s17_s27 = int_to_ptr.vmem [resolvable:$true] %s16_s27 }
  0x15   :  { %p4081_p9 = scmp.lt.u32.totalorder %s4077_s30, %s6045_s0 }
  0x17   :  { %p4083_p10 = pnand %p4081_p9, %p4078_p8 }
  0x19   :  { %4086 = shalt.err (!%p4083_p10)
}
  0x1a   :  { %s4087_s8 = scalar_lea.vmem %s17_s27, 256  ;;  %p4092_p12 = scmp.lt.s32.totalorder %s17_s27, %s17_s27 }
  0x1b   :  { %p4088_p11 = scmp.ne.s32.totalorder %s17_s27, %s4087_s8  ;;  %p4093_p13 = scmp.lt.s32.totalorder %s4087_s8, %s4087_s8 }
  0x1d   :  { %p4094_p0 = por %p4093_p13, %p4092_p12 }
  0x1f   :  { %p4095_p1 = pnand %p4094_p0, %p4088_p11 }
  0x21   :  { %4098 = shalt.err (!%p4095_p1)
}
  0x22   :  { %s4153_s1 = smov 128   ;;  %s4154_s9 = smov 8  }
  0x23   :  { %22 = dma.hbm_to_vmem [thread:$0]  %s6045_s0, 256, %s17_s27, [#allocation5], %s4153_s1, %s4153_s1, %s4154_s9  }
  0x24   :  { %s4155_s12 = smov [#allocation9]   ;;  %s4099_s16 = scalar_lea.hbm %s6047_s2, 1792 }
  0x25   :  { %s40_s13 = sshll.u32 %s4155_s12, 4  ;;  %p4100_p2 = scmp.ne.s32.totalorder %s6047_s2, %s4099_s16  ;;  %s41_s13 = int_to_ptr.vmem [resolvable:$true] %s40_s13 }
  0x26   :  { %p4103_p3 = scmp.lt.u32.totalorder %s4099_s16, %s6047_s2 }
  0x28   :  { %p4105_p4 = pnand %p4103_p3, %p4100_p2 }
  0x2a   :  { %4108 = shalt.err (!%p4105_p4)
}
  0x2b   :  { %s4109_s21 = scalar_lea.vmem %s41_s13, 1792  ;;  %p4114_p6 = scmp.lt.s32.totalorder %s41_s13, %s41_s13 }
  0x2c   :  { %p4110_p5 = scmp.ne.s32.totalorder %s41_s13, %s4109_s21  ;;  %p4115_p7 = scmp.lt.s32.totalorder %s4109_s21, %s4109_s21 }
  0x2e   :  { %p4116_p8 = por %p4115_p7, %p4114_p6 }
  0x30   :  { %p4117_p9 = pnand %p4116_p8, %p4110_p5 }
  0x32   :  { %4120 = shalt.err (!%p4117_p9)
}
  0x33   :  { %46 = dma.hbm_to_vmem [thread:$0]  %s6047_s2, 1792, %s41_s13, [#allocation8], %s4150_s22, %s4150_s22, %s4151_s23  }
  0x34   :  { %4143 = dma.done.wait [#allocation5], 256  }
  0x35   :  { %4144 = vsyncadd [#allocation5], 4294967040 }
  0x36   :  { %4145 = dma.done.wait [#allocation8], 3584  }
  0x37   :  { %4146 = vsyncadd [#allocation8], 4294963712  ;;  %v108_v0 = vlaneseq  ;;  %v4156_v1 = vmov -inf   ;;  %v4157_v5 = vmov 0.0   ;;  %v4158_v8 = vmov 1983009808  }
  0x38   :  { %61 = vst [vmem:[#allocation3] sm:$0xf] %v4156_v1  ;;  %60 = vst [vmem:[#allocation2] sm:$0xf] %v4157_v5  ;;  %v4320_v9 = vunpack.c.l.s4 %v4158_v8  ;;  %s4159_s2 = smov 1   ;;  %vm71_vm0 = vcmask 1043456  }
  0x39   :  { %v4312_v2 = vshrl.u32 %v108_v0, 7  ;;  %v273_v6 = vld [vmem:[#allocation7 + $0x1] ss:$8 sm:$0x3]  ;;  %v62_v25 = vld [vmem:[#allocation4] sm:$0xff]  ;;  %v63_v26 = vld [vmem:[#allocation4 + $0x8] sm:$0xff] }
  0x3a   :  { %v312_v7 = vld [vmem:[#allocation9 + $0x1] ss:$8 sm:$0x3]  ;;  %v349_v12 = vld [vmem:[#allocation7 + $0x2] ss:$8 sm:$0x3]  ;;  %v107_v20 = vunpack.c.0.s8 %v4320_v9  ;;  %v67_v29 = vcombine.high %v62_v25, %v62_v25  ;;  %v68_v30 = vcombine.high %v63_v26, %v63_v26 }
  0x3b   :  { %v4315_v3 = vsub.s32 1, %v4312_v2  ;;  %v4318_v4 = vsub.s32 0, %v4312_v2  ;;  %v388_v13 = vld [vmem:[#allocation9 + $0x2] ss:$8 sm:$0x3]  ;;  %v137_v31 = vsel %vm71_vm0, %v62_v25, -inf }
  0x3c   :  { %v4324_v14 = vld [vmem:[#allocation7 + $0x3] ss:$8 sm:$0x3]  ;;  %v4328_v17 = vld [vmem:[#allocation9 + $0x3] ss:$8 sm:$0x3] }
  0x3d   :  { %6116 = vst [vmem:[#allocation14_spill] sm:$0xff] %v4318_v4  ;;  %v282_v10 = vrot.slane %v273_v6, %v4315_v3  ;;  %v278_v11 = vrot.slane %v273_v6, %v4318_v4  ;;  %v317_v15 = vrot.slane %v312_v7, %v4318_v4  ;;  %v321_v16 = vrot.slane %v312_v7, %v4315_v3  ;;  %s4160_s22 = smov 2   ;;  %s4161_s25 = smov 3  }
  0x3e   :  { %v358_v18 = vrot.slane %v349_v12, %v4315_v3  ;;  %v354_v19 = vrot.slane %v349_v12, %v4318_v4  ;;  %v393_v21 = vrot.slane %v388_v13, %v4318_v4  ;;  %v397_v22 = vrot.slane %v388_v13, %v4315_v3  ;;  %s4162_s26 = smov 4   ;;  %s4163_s27 = smov 5  }
  0x3f   :  { %285 = vrot.lane.b32.xlu1 %v282_v10, %s4159_s2  ;;  %283 = vrot.lane.b32.xlu0 %v278_v11, %s4159_s2  ;;  %v434_v23 = vrot.slane %v4324_v14, %v4315_v3  ;;  %v430_v24 = vrot.slane %v4324_v14, %v4318_v4  ;;  %v469_v27 = vrot.slane %v4328_v17, %v4318_v4  ;;  %v151_v32 = vsel %vm71_vm0, %v63_v26, -inf  ;;  %s4164_s28 = smov 6   ;;  %s4165_s29 = smov 51  }
  0x40   :  { %v473_v28 = vrot.slane %v4328_v17, %v4315_v3  ;;  %v72_v33 = vsel %vm71_vm0, %v62_v25, 0.0  ;;  %v86_v34 = vsel %vm71_vm0, %v63_v26, 0.0  ;;  %v79_v35 = vsel %vm71_vm0, %v67_v29, 0.0  ;;  %s4166_s30 = smov 17   ;;  %s4168_s4 = smov 126  }
  0x41   :  { %v93_v36 = vsel %vm71_vm0, %v68_v30, 0.0  ;;  %v138_v37 = vrot.slane %v137_v31, 4  ;;  %v144_v38 = vsel %vm71_vm0, %v67_v29, -inf  ;;  %v80_v39 = vrot.slane %v79_v35, 4  ;;  %s4169_s5 = smov 125   ;;  %s4170_s6 = smov 124  }
  0x42   :  { %v94_v40 = vrot.slane %v93_v36, 4  ;;  %v145_v41 = vrot.slane %v144_v38, 4  ;;  %v152_v42 = vrot.slane %v151_v32, 4  ;;  %v158_v44 = vsel %vm71_vm0, %v68_v30, -inf  ;;  %s4171_s7 = smov 123   ;;  %s4172_s8 = smov 122  }
  0x43   :  { %322 = vrot.lane.b32.xlu1 %v317_v15, %s4159_s2  ;;  %324 = vrot.lane.b32.xlu0 %v321_v16, %s4159_s2  ;;  %v139_v43 = vmax.f32 %v137_v31, %v138_v37  ;;  %v73_v45 = vrot.slane %v72_v33, 4  ;;  %v87_v46 = vrot.slane %v86_v34, 4  ;;  %v159_v49 = vrot.slane %v158_v44, 4  ;;  %v501_v30 = vld [vmem:[#allocation7 + $0x4] ss:$8 sm:$0x3] }
  0x44   :  { %v146_v47 = vmax.f32 %v144_v38, %v145_v41  ;;  %v153_v48 = vmax.f32 %v151_v32, %v152_v42  ;;  %v81_v50 = vadd.f32 %v80_v39, %v79_v35  ;;  %v95_v54 = vadd.f32 %v94_v40, %v93_v36  ;;  %v577_v41 = vld [vmem:[#allocation7 + $0x5] ss:$8 sm:$0x3]  ;;  %s4173_s1 = smov 112   ;;  %s4174_s9 = smov 111  }
  0x45   :  { %v140_v51 = vrot.slane %v139_v43, 2  ;;  %v74_v52 = vadd.f32 %v73_v45, %v72_v33  ;;  %v88_v53 = vadd.f32 %v87_v46, %v86_v34  ;;  %v160_v57 = vmax.f32 %v158_v44, %v159_v49  ;;  %v64_v45 = vld [vmem:[#allocation2] sm:$0xf]  ;;  %s4175_s10 = smov 18   ;;  %s4176_s11 = smov 110  }
  0x46   :  { %v147_v55 = vrot.slane %v146_v47, 2  ;;  %v154_v56 = vrot.slane %v153_v48, 2  ;;  %v82_v58 = vrot.slane %v81_v50, 2  ;;  %v96_v62 = vrot.slane %v95_v54, 2  ;;  %s4177_s12 = smov 19   ;;  %s4178_s13 = smov 109  }
  0x47   :  { %361 = vrot.lane.b32.xlu1 %v358_v18, %s4160_s22  ;;  %359 = vrot.lane.b32.xlu0 %v354_v19, %s4160_s22  ;;  %v141_v59 = vmax.f32 %v139_v43, %v140_v51  ;;  %v75_v60 = vrot.slane %v74_v52, 2  ;;  %v89_v61 = vrot.slane %v88_v53, 2  ;;  %v161_v1 = vrot.slane %v160_v57, 2  ;;  %s4179_s14 = smov 20   ;;  %s4180_s15 = smov 108  }
  0x48   :  { %v148_v63 = vmax.f32 %v146_v47, %v147_v55  ;;  %v155_v0 = vmax.f32 %v153_v48, %v154_v56  ;;  %v83_v5 = vadd.f32 %v82_v58, %v81_v50  ;;  %v97_v10 = vadd.f32 %v96_v62, %v95_v54  ;;  %v136_v48 = vld [vmem:[#allocation3] sm:$0xf]  ;;  %v616_v54 = vld [vmem:[#allocation9 + $0x5] ss:$8 sm:$0x3]  ;;  %s4181_s16 = smov 21  }
  0x49   :  { %v142_v6 = vrot.slane %v141_v59, 1  ;;  %v76_v7 = vadd.f32 %v75_v60, %v74_v52  ;;  %v90_v8 = vadd.f32 %v89_v61, %v88_v53  ;;  %v162_v13 = vmax.f32 %v160_v57, %v161_v1  ;;  %v653_v60 = vld [vmem:[#allocation7 + $0x6] ss:$8 sm:$0x3]  ;;  %s4182_s17 = smov 107   ;;  %s4183_s18 = smov 22  }
  0x4a   :  { %v149_v11 = vrot.slane %v148_v63, 1  ;;  %v156_v12 = vrot.slane %v155_v0, 1  ;;  %v84_v15 = vrot.slane %v83_v5, 1  ;;  %v98_v25 = vrot.slane %v97_v10, 1  ;;  %s4184_s19 = smov 106   ;;  %s4185_s20 = smov 32  }
  0x4b   :  { %398 = vrot.lane.b32.xlu1 %v393_v21, %s4160_s22  ;;  %400 = vrot.lane.b32.xlu0 %v397_v22, %s4160_s22  ;;  %v143_v16 = vmax.f32 %v141_v59, %v142_v6  ;;  %v77_v18 = vrot.slane %v76_v7, 1  ;;  %v91_v19 = vrot.slane %v90_v8, 1  ;;  %v163_v26 = vrot.slane %v162_v13, 1  ;;  %s4186_s21 = smov 96   ;;  %s4187_s0 = smov 33  }
  0x4c   :  { %v150_v21 = vmax.f32 %v148_v63, %v149_v11  ;;  %v157_v22 = vmax.f32 %v155_v0, %v156_v12  ;;  %v85_v29 = vadd.f32 %v84_v15, %v83_v5  ;;  %v4360_v31 = vsub.s32 %v107_v20, %v4312_v2  ;;  %v540_v20 = vld [vmem:[#allocation9 + $0x4] ss:$8 sm:$0x3]  ;;  %v729_v12 = vld [vmem:[#allocation7 + $0x7] ss:$8 sm:$0x3] }
  0x4d   :  { %v78_v32 = vadd.f32 %v77_v18, %v76_v7  ;;  %v92_v33 = vadd.f32 %v91_v19, %v90_v8  ;;  %v99_v34 = vadd.f32 %v98_v25, %v97_v10  ;;  %v164_v35 = vmax.f32 %v162_v13, %v163_v26  ;;  %v692_v8 = vld [vmem:[#allocation9 + $0x6] ss:$8 sm:$0x3]  ;;  %v805_v25 = vld [vmem:[#allocation7 + $0x10] ss:$8 sm:$0x3] }
  0x4e   :  { %v169_v36 = vcombine.low %v143_v16, %v150_v21  ;;  %v510_v14 = vrot.slane %v501_v30, %v4315_v3  ;;  %v506_v2 = vrot.slane %v501_v30, %v4318_v4  ;;  %vm125_vm1 = vcmask 1041409   ;;  %v768_v16 = vld [vmem:[#allocation9 + $0x7] ss:$8 sm:$0x3]  ;;  %s4188_s24 = smov 95   ;;  %s4189_s2 = smov 34  }
  0x4f   :  { %437 = vrot.lane.b32.xlu1 %v434_v23, %s4161_s25  ;;  %435 = vrot.lane.b32.xlu0 %v430_v24, %s4161_s25  ;;  %v104_v23 = vcombine.low %v78_v32, %v85_v29  ;;  %v112_v37 = vcombine.low %v92_v33, %v99_v34  ;;  %v177_v9 = vcombine.low %v157_v22, %v164_v35  ;;  %vm127_vm2 = vcmask 1043459   ;;  %v844_v26 = vld [vmem:[#allocation9 + $0x10] ss:$8 sm:$0x3]  ;;  %s4190_s22 = smov 94  }
  0x50   :  { %v176_v39 = vrot.slane %v169_v36, %v4360_v31  ;;  %v545_v17 = vrot.slane %v540_v20, %v4318_v4  ;;  %vm129_vm3 = vcmask 1045509   ;;  %vm131_vm4 = vcmask 1047559  }
  0x51   :  { %v111_v24 = vrot.slane %v104_v23, %v4360_v31  ;;  %v119_v38 = vrot.slane %v112_v37, %v4360_v31  ;;  %v184_v40 = vrot.slane %v177_v9, %v4360_v31  ;;  %v586_v47 = vrot.slane %v577_v41, %v4315_v3 }
  0x52   :  { %v582_v51 = vrot.slane %v577_v41, %v4318_v4  ;;  %v621_v58 = vrot.slane %v616_v54, %v4318_v4  ;;  %v625_v59 = vrot.slane %v616_v54, %v4315_v3  ;;  %v658_v61 = vrot.slane %v653_v60, %v4318_v4 }
  0x53   :  { %474 = vrot.lane.b32.xlu1 %v469_v27, %s4161_s25  ;;  %476 = vrot.lane.b32.xlu0 %v473_v28, %s4161_s25  ;;  %v124_v27 = vrot.slane %v119_v38, 7  ;;  %v549_v28 = vrot.slane %v540_v20, %v4315_v3  ;;  %v187_v42 = vrot.slane %v184_v40, 7  ;;  %v662_v6 = vrot.slane %v653_v60, %v4315_v3  ;;  %s4191_s25 = smov 35  }
  0x54   :  { %v697_v10 = vrot.slane %v692_v8, %v4318_v4  ;;  %v701_v11 = vrot.slane %v692_v8, %v4315_v3  ;;  %v738_v13 = vrot.slane %v729_v12, %v4315_v3  ;;  %v734_v15 = vrot.slane %v729_v12, %v4318_v4 }
  0x55   :  { %v126_v43 = vsel %vm125_vm1, %v124_v27, %v111_v24  ;;  %v188_v44 = vsel %vm125_vm1, %v187_v42, %v176_v39  ;;  %v773_v18 = vrot.slane %v768_v16, %v4318_v4  ;;  %v777_v19 = vrot.slane %v768_v16, %v4315_v3 }
  0x56   :  { %v128_v46 = vsel %vm127_vm2, %v124_v27, %v126_v43  ;;  %v189_v49 = vsel %vm127_vm2, %v187_v42, %v188_v44  ;;  %v814_v21 = vrot.slane %v805_v25, %v4315_v3  ;;  %v810_v22 = vrot.slane %v805_v25, %v4318_v4 }
  0x57   :  { %513 = vrot.lane.b32.xlu1 %v510_v14, %s4162_s26  ;;  %511 = vrot.lane.b32.xlu0 %v506_v2, %s4162_s26  ;;  %v130_v50 = vsel %vm129_vm3, %v124_v27, %v128_v46  ;;  %v190_v52 = vsel %vm129_vm3, %v187_v42, %v189_v49  ;;  %v849_v29 = vrot.slane %v844_v26, %v4318_v4  ;;  %vm214_vm5 = vcmask 416768  }
  0x58   :  { %v132_v53 = vsel %vm131_vm4, %v124_v27, %v130_v50  ;;  %v191_v55 = vsel %vm131_vm4, %v187_v42, %v190_v52  ;;  %v853_v30 = vrot.slane %v844_v26, %v4315_v3  ;;  %vm287_vm6 = vcmask 7168  }
  0x59   :  { %v134_v56 = vadd.f32 %v132_v53, %v64_v45  ;;  %v193_v57 = vmax.f32 %v136_v48, %v191_v55  ;;  %vm363_vm7 = vcmask 15360   ;;  %vm439_vm8 = vcmask 23552  }
  0x5a   :  { %vm515_vm9 = vcmask 31744   ;;  %vm591_vm10 = vcmask 39936   ;;  %vm667_vm11 = vcmask 48128   ;;  %vm743_vm12 = vcmask 130048  }
  0x5b   :  { %550 = vrot.lane.b32.xlu1 %v545_v17, %s4162_s26  ;;  %552 = vrot.lane.b32.xlu0 %v549_v28, %s4162_s26  ;;  %135 = vst [vmem:[#allocation2] sm:$0xf] %v134_v56  ;;  %194 = vst [vmem:[#allocation3] sm:$0xf] %v193_v57  ;;  %vm819_vm13 = vcmask 138240   ;;  %vm895_vm14 = vcmask 146432  }
  0x5c   :  { %vm971_vm15 = vcmask 154624   ;;  %vm1047_vm0 = vcmask 162816   ;;  %vm1123_vm1 = vcmask 171008   ;;  %vm1199_vm2 = vcmask 179200   ;;  %s4192_s26 = smov 93  }
  0x5d   :  { %vm1275_vm3 = vcmask 261120   ;;  %vm1351_vm4 = vcmask 269312  }
  0x5f   :  { %589 = vrot.lane.b32.xlu1 %v586_v47, %s4163_s27  ;;  %587 = vrot.lane.b32.xlu0 %v582_v51, %s4163_s27 }
  0x62   :  { %v198_v62 = vld [vmem:[#allocation2] sm:$0xf]  ;;  %v3950_v63 = vld.sshfl [vmem:[#allocation3] sm:$0x33 pattern:$0x76325410] }
  0x63   :  { %626 = vrot.lane.b32.xlu1 %v621_v58, %s4163_s27  ;;  %628 = vrot.lane.b32.xlu0 %v625_v59, %s4163_s27  ;;  %v199_v0 = vmul.f32 0.25, %v198_v62  ;;  %v229_v1 = vcombine.high %v3950_v63, %v3950_v63  ;;  %s4193_s27 = smov 36  }
  0x65   :  { %v208_v5 = vrot.slane %v199_v0, %v4360_v31 }
  0x67   :  { %663 = vrot.lane.b32.xlu0 %v658_v61, %s4164_s28  ;;  %230 = vrot.lane.b32.xlu1 %v3950_v63, %s4165_s29  ;;  %v209_v7 = vcombine.high %v208_v5, %v208_v5 }
  0x6b   :  { %232 = vrot.lane.b32.xlu1 %v229_v1, %s4165_s29  ;;  %210 = vrot.lane.b32.xlu0 %v208_v5, %s4165_s29 }
  0x6f   :  { %665 = vrot.lane.b32.xlu1 %v662_v6, %s4164_s28  ;;  %212 = vrot.lane.b32.xlu0 %v209_v7, %s4165_s29 }
  0x73   :  { %702 = vrot.lane.b32.xlu1 %v697_v10, %s4164_s28  ;;  %704 = vrot.lane.b32.xlu0 %v701_v11, %s4164_s28  ;;  %s4194_s28 = smov 92  }
  0x77   :  { %741 = vrot.lane.b32.xlu1 %v738_v13, %s4151_s23  ;;  %739 = vrot.lane.b32.xlu0 %v734_v15, %s4151_s23 }
  0x7b   :  { %778 = vrot.lane.b32.xlu1 %v773_v18, %s4151_s23  ;;  %780 = vrot.lane.b32.xlu0 %v777_v19, %s4151_s23  ;;  %s4167_s23 = smov 127  }
  0x7f   :  { %817 = vrot.lane.b32.xlu1 %v814_v21, %s4166_s30  ;;  %815 = vrot.lane.b32.xlu0 %v810_v22, %s4166_s30 }
  0x83   :  { %854 = vrot.lane.b32.xlu1 %v849_v29, %s4166_s30  ;;  %856 = vrot.lane.b32.xlu0 %v853_v30, %s4166_s30  ;;  %s4195_s30 = smov 37  }
  0xb1   :  { %v4403_v31 = vpop.permute.xlu1 %285  ;;  %v4405_v32 = vpop.permute.xlu0 %283 }
  0xb5   :  { %v323_v33 = vpop.permute.xlu1 %322  ;;  %v4407_v34 = vpop.permute.xlu0 %324 }
  0xb6   :  { %v326_v50 = vsel %vm287_vm6, %v323_v33, %v4407_v34 }
  0xb9   :  { %v4409_v35 = vpop.permute.xlu1 %361  ;;  %v4411_v36 = vpop.permute.xlu0 %359 }
  0xbd   :  { %v399_v23 = vpop.permute.xlu1 %398  ;;  %v4413_v37 = vpop.permute.xlu0 %400 }
  0xbe   :  { %v402_v55 = vsel %vm363_vm7, %v399_v23, %v4413_v37 }
  0xc1   :  { %v4415_v14 = vpop.permute.xlu1 %437  ;;  %v4417_v2 = vpop.permute.xlu0 %435 }
  0xc5   :  { %v475_v9 = vpop.permute.xlu1 %474  ;;  %v4419_v20 = vpop.permute.xlu0 %476 }
  0xc6   :  { %v478_v60 = vsel %vm439_vm8, %v475_v9, %v4419_v20 }
  0xc9   :  { %v4421_v24 = vpop.permute.xlu1 %513  ;;  %v4423_v38 = vpop.permute.xlu0 %511 }
  0xcd   :  { %v551_v39 = vpop.permute.xlu1 %550  ;;  %v4425_v40 = vpop.permute.xlu0 %552 }
  0xce   :  { %v554_v1 = vsel %vm515_vm9, %v551_v39, %v4425_v40 }
  0xd1   :  { %v4427_v27 = vpop.permute.xlu1 %589  ;;  %v4429_v17 = vpop.permute.xlu0 %587 }
  0xd5   :  { %v627_v28 = vpop.permute.xlu1 %626  ;;  %v4431_v41 = vpop.permute.xlu0 %628 }
  0xd6   :  { %v630_v10 = vsel %vm591_vm10, %v627_v28, %v4431_v41 }
  0xd9   :  { %v4433_v42 = vpop.permute.xlu0 %663  ;;  %v231_v43 = vpop.permute.xlu1 %230 }
  0xda   :  { %v4436_v44 = vsel %vm214_vm5, 0.0, %v231_v43 }
  0xdb   :  { %v330_v45 = vmul.f32 %v323_v33, %v4436_v44  ;;  %v406_v49 = vmul.f32 %v399_v23, %v4436_v44  ;;  %v482_v54 = vmul.f32 %v475_v9, %v4436_v44  ;;  %v558_v59 = vmul.f32 %v551_v39, %v4436_v44 }
  0xdc   :  { %v634_v0 = vmul.f32 %v627_v28, %v4436_v44 }
  0xdd   :  { %336 = vrot.lane.b32.xlu1 %v330_v45, %s4167_s23  ;;  %v233_v46 = vpop.permute.xlu1 %232  ;;  %v4440_v47 = vpop.permute.xlu0 %210 }
  0xde   :  { %v4443_v48 = vsel %vm214_vm5, %v231_v43, %v233_v46  ;;  %v4498_v26 = vsel %vm214_vm5, %v233_v46, 0.0  ;;  %v4510_v9 = vsel %vm214_vm5, 0.0, %v4440_v47 }
  0xdf   :  { %v331_v52 = vmul.f32 %v326_v50, %v4443_v48  ;;  %v407_v57 = vmul.f32 %v402_v55, %v4443_v48  ;;  %v483_v62 = vmul.f32 %v478_v60, %v4443_v48  ;;  %v559_v6 = vmul.f32 %v554_v1, %v4443_v48  ;;  %6117 = vst [vmem:[#allocation15_spill] sm:$0xff] %v4498_v26 }
  0xe0   :  { %v635_v12 = vmul.f32 %v630_v10, %v4443_v48  ;;  %v332_v33 = vmul.f32 %v4407_v34, %v4498_v26  ;;  %v408_v39 = vmul.f32 %v4413_v37, %v4498_v26  ;;  %v292_v28 = vmul.f32 %v4405_v32, %v4510_v9 }
  0xe1   :  { %412 = vrot.lane.b32.xlu1 %v406_v49, %s4168_s4  ;;  %v4449_v51 = vpop.permute.xlu1 %665  ;;  %v4452_v53 = vpop.permute.xlu0 %212  ;;  %338 = vrot.lane.b32.xlu0 %v331_v52, %s4167_s23  ;;  %v484_v34 = vmul.f32 %v4419_v20, %v4498_v26  ;;  %v368_v43 = vmul.f32 %v4411_v36, %v4510_v9  ;;  %v560_v37 = vmul.f32 %v4425_v40, %v4498_v26 }
  0xe2   :  { %v444_v45 = vmul.f32 %v4417_v2, %v4510_v9  ;;  %v636_v20 = vmul.f32 %v4431_v41, %v4498_v26  ;;  %v520_v46 = vmul.f32 %v4423_v38, %v4510_v9  ;;  %v596_v49 = vmul.f32 %v4429_v17, %v4510_v9 }
  0xe3   :  { %v672_v41 = vmul.f32 %v4433_v42, %v4510_v9  ;;  %v592_v1 = vsel %vm591_vm10, %v4429_v17, %v4427_v27  ;;  %vm1731_vm10 = vcmask 310272  }
  0xe5   :  { %488 = vrot.lane.b32.xlu1 %v482_v54, %s4169_s5  ;;  %v703_v56 = vpop.permute.xlu1 %702  ;;  %v4460_v58 = vpop.permute.xlu0 %704  ;;  %414 = vrot.lane.b32.xlu0 %v407_v57, %s4168_s4  ;;  %v4552_v54 = vsel %vm214_vm5, %v4440_v47, %v4452_v53  ;;  %v364_v47 = vsel %vm363_vm7, %v4411_v36, %v4409_v35  ;;  %vm1503_vm7 = vcmask 285696  }
  0xe6   :  { %v710_v8 = vmul.f32 %v703_v56, %v4436_v44  ;;  %v706_v15 = vsel %vm667_vm11, %v703_v56, %v4460_v58  ;;  %v712_v40 = vmul.f32 %v4460_v58, %v4498_v26  ;;  %v288_v56 = vsel %vm287_vm6, %v4405_v32, %v4403_v31 }
  0xe7   :  { %v711_v19 = vmul.f32 %v706_v15, %v4443_v48  ;;  %v293_v57 = vmul.f32 %v288_v56, %v4552_v54  ;;  %v369_v32 = vmul.f32 %v364_v47, %v4552_v54  ;;  %vm1427_vm6 = vcmask 277504  }
  0xe9   :  { %564 = vrot.lane.b32.xlu1 %v558_v59, %s4170_s6  ;;  %v4467_v61 = vpop.permute.xlu1 %741  ;;  %v4470_v63 = vpop.permute.xlu0 %739  ;;  %490 = vrot.lane.b32.xlu0 %v483_v62, %s4169_s5  ;;  %v4570_v59 = vsel %vm214_vm5, %v4452_v53, 0.0  ;;  %v440_v62 = vsel %vm439_vm8, %v4417_v2, %v4415_v14  ;;  %vm1579_vm8 = vcmask 293888  }
  0xea   :  { %v748_v55 = vmul.f32 %v4470_v63, %v4510_v9  ;;  %6118 = vst [vmem:[#allocation16_spill] sm:$0xff] %v4570_v59  ;;  %v294_v60 = vmul.f32 %v4403_v31, %v4570_v59  ;;  %v445_v36 = vmul.f32 %v440_v62, %v4552_v54  ;;  %v370_v53 = vmul.f32 %v4409_v35, %v4570_v59 }
  0xeb   :  { %v446_v2 = vmul.f32 %v4415_v14, %v4570_v59  ;;  %v597_v35 = vmul.f32 %v592_v1, %v4552_v54  ;;  %v744_v17 = vsel %vm743_vm12, %v4470_v63, %v4467_v61  ;;  %v750_v63 = vmul.f32 %v4467_v61, %v4570_v59 }
  0xed   :  { %640 = vrot.lane.b32.xlu1 %v634_v0, %s4171_s7  ;;  %v779_v5 = vpop.permute.xlu1 %778  ;;  %v781_v7 = vpop.permute.xlu0 %780  ;;  %566 = vrot.lane.b32.xlu0 %v559_v6, %s4170_s6  ;;  %v516_v0 = vsel %vm515_vm9, %v4423_v38, %v4421_v24  ;;  %v668_v38 = vsel %vm667_vm11, %v4433_v42, %v4449_v51  ;;  %v598_v6 = vmul.f32 %v4427_v27, %v4570_v59  ;;  %vm1655_vm9 = vcmask 302080  }
  0xee   :  { %v786_v16 = vmul.f32 %v779_v5, %v4436_v44  ;;  %v782_v25 = vsel %vm743_vm12, %v779_v5, %v781_v7  ;;  %v788_v50 = vmul.f32 %v781_v7, %v4498_v26  ;;  %v521_v31 = vmul.f32 %v516_v0, %v4552_v54 }
  0xef   :  { %v787_v29 = vmul.f32 %v782_v25, %v4443_v48  ;;  %v522_v5 = vmul.f32 %v4421_v24, %v4570_v59  ;;  %v673_v14 = vmul.f32 %v668_v38, %v4552_v54  ;;  %v749_v42 = vmul.f32 %v744_v17, %v4552_v54 }
  0xf0   :  { %v674_v7 = vmul.f32 %v4449_v51, %v4570_v59  ;;  %vm1807_vm11 = vcmask 392192   ;;  %vm1883_vm12 = vcmask 400384  }
  0xf1   :  { %716 = vrot.lane.b32.xlu1 %v710_v8, %s4172_s8  ;;  %v4483_v11 = vpop.permute.xlu1 %817  ;;  %v4486_v13 = vpop.permute.xlu0 %815  ;;  %642 = vrot.lane.b32.xlu0 %v635_v12, %s4171_s7  ;;  %v881_v8 = vld [vmem:[#allocation7 + $0x11] ss:$8 sm:$0x3] }
  0xf2   :  { %v824_v58 = vmul.f32 %v4486_v13, %v4510_v9  ;;  %v820_v24 = vsel %vm819_vm13, %v4486_v13, %v4483_v11  ;;  %v890_v10 = vrot.slane %v881_v8, %v4315_v3  ;;  %v826_v12 = vmul.f32 %v4483_v11, %v4570_v59 }
  0xf3   :  { %v825_v27 = vmul.f32 %v820_v24, %v4552_v54  ;;  %v886_v51 = vrot.slane %v881_v8, %v4318_v4 }
  0xf5   :  { %792 = vrot.lane.b32.xlu1 %v786_v16, %s4173_s1  ;;  %v855_v18 = vpop.permute.xlu1 %854  ;;  %718 = vrot.lane.b32.xlu0 %v711_v19, %s4172_s8  ;;  %v857_v22 = vpop.permute.xlu0 %856 }
  0xf6   :  { %v862_v21 = vmul.f32 %v855_v18, %v4436_v44  ;;  %v858_v30 = vsel %vm819_vm13, %v855_v18, %v857_v22  ;;  %v864_v52 = vmul.f32 %v857_v22, %v4498_v26  ;;  %vm1959_vm13 = vcmask 408576  }
  0xf7   :  { %v863_v23 = vmul.f32 %v858_v30, %v4443_v48 }
  0xf9   :  { %868 = vrot.lane.b32.xlu1 %v862_v21, %s4174_s9  ;;  %794 = vrot.lane.b32.xlu0 %v787_v29, %s4173_s1 }
  0xfd   :  { %340 = vrot.lane.b32.xlu1 %v332_v33, %s4167_s23  ;;  %870 = vrot.lane.b32.xlu0 %v863_v23, %s4174_s9 }
 0x101   :  { %416 = vrot.lane.b32.xlu1 %v408_v39, %s4168_s4  ;;  %298 = vrot.lane.b32.xlu0 %v292_v28, %s4167_s23 }
 0x105   :  { %492 = vrot.lane.b32.xlu1 %v484_v34, %s4169_s5  ;;  %374 = vrot.lane.b32.xlu0 %v368_v43, %s4168_s4 }
 0x109   :  { %568 = vrot.lane.b32.xlu1 %v560_v37, %s4170_s6  ;;  %450 = vrot.lane.b32.xlu0 %v444_v45, %s4169_s5 }
 0x10d   :  { %644 = vrot.lane.b32.xlu1 %v636_v20, %s4171_s7  ;;  %526 = vrot.lane.b32.xlu0 %v520_v46, %s4170_s6 }
 0x111   :  { %720 = vrot.lane.b32.xlu1 %v712_v40, %s4172_s8  ;;  %602 = vrot.lane.b32.xlu0 %v596_v49, %s4171_s7 }
 0x115   :  { %796 = vrot.lane.b32.xlu1 %v788_v50, %s4173_s1  ;;  %678 = vrot.lane.b32.xlu0 %v672_v41, %s4172_s8 }
 0x119   :  { %872 = vrot.lane.b32.xlu1 %v864_v52, %s4174_s9  ;;  %754 = vrot.lane.b32.xlu0 %v748_v55, %s4173_s1 }
 0x11d   :  { %300 = vrot.lane.b32.xlu1 %v293_v57, %s4167_s23  ;;  %830 = vrot.lane.b32.xlu0 %v824_v58, %s4174_s9 }
 0x121   :  { %376 = vrot.lane.b32.xlu1 %v369_v32, %s4168_s4  ;;  %302 = vrot.lane.b32.xlu0 %v294_v60, %s4167_s23  ;;  %s4196_s23 = smov 91  }
 0x125   :  { %452 = vrot.lane.b32.xlu1 %v445_v36, %s4169_s5  ;;  %378 = vrot.lane.b32.xlu0 %v370_v53, %s4168_s4  ;;  %s4197_s4 = smov 38  }
 0x129   :  { %528 = vrot.lane.b32.xlu1 %v521_v31, %s4170_s6  ;;  %454 = vrot.lane.b32.xlu0 %v446_v2, %s4169_s5  ;;  %s4198_s5 = smov 90  }
 0x12d   :  { %604 = vrot.lane.b32.xlu1 %v597_v35, %s4171_s7  ;;  %530 = vrot.lane.b32.xlu0 %v522_v5, %s4170_s6  ;;  %s4199_s6 = smov 48  }
 0x131   :  { %680 = vrot.lane.b32.xlu1 %v673_v14, %s4172_s8  ;;  %606 = vrot.lane.b32.xlu0 %v598_v6, %s4171_s7  ;;  %s4200_s7 = smov 80  }
 0x135   :  { %756 = vrot.lane.b32.xlu1 %v749_v42, %s4173_s1  ;;  %682 = vrot.lane.b32.xlu0 %v674_v7, %s4172_s8  ;;  %s4201_s8 = smov 49  }
 0x139   :  { %832 = vrot.lane.b32.xlu1 %v825_v27, %s4174_s9  ;;  %758 = vrot.lane.b32.xlu0 %v750_v63, %s4173_s1  ;;  %v920_v63 = vld [vmem:[#allocation9 + $0x11] ss:$8 sm:$0x3]  ;;  %s4202_s1 = smov 79  }
 0x13d   :  { %893 = vrot.lane.b32.xlu1 %v890_v10, %s4175_s10  ;;  %834 = vrot.lane.b32.xlu0 %v826_v12, %s4174_s9  ;;  %v925_v12 = vrot.slane %v920_v63, %v4318_v4  ;;  %s4203_s9 = smov 50  }
 0x141   :  { %891 = vrot.lane.b32.xlu0 %v886_v51, %s4175_s10 }
 0x14f   :  { %v4633_v13 = vpop.permute.xlu1 %336 }
 0x153   :  { %v4635_v61 = vpop.permute.xlu1 %412  ;;  %v4637_v15 = vpop.permute.xlu0 %338 }
 0x157   :  { %v4639_v16 = vpop.permute.xlu1 %488  ;;  %v4641_v18 = vpop.permute.xlu0 %414 }
 0x15b   :  { %v4643_v11 = vpop.permute.xlu1 %564  ;;  %v4645_v19 = vpop.permute.xlu0 %490 }
 0x15f   :  { %v4647_v25 = vpop.permute.xlu1 %640  ;;  %v4649_v21 = vpop.permute.xlu0 %566 }
 0x163   :  { %v4651_v22 = vpop.permute.xlu1 %716  ;;  %v4653_v29 = vpop.permute.xlu0 %642 }
 0x167   :  { %v4655_v30 = vpop.permute.xlu1 %792  ;;  %v4657_v33 = vpop.permute.xlu0 %718 }
 0x16b   :  { %v4659_v23 = vpop.permute.xlu1 %868  ;;  %v4661_v39 = vpop.permute.xlu0 %794 }
 0x16c   :  { %6119 = vst [vmem:[#allocation17_spill] sm:$0xff] %v4659_v23 }
 0x16f   :  { %v4663_v28 = vpop.permute.xlu1 %340  ;;  %v4665_v34 = vpop.permute.xlu0 %870 }
 0x170   :  { %6120 = vst [vmem:[#allocation18_spill] sm:$0xff] %v4665_v34 }
 0x173   :  { %v4667_v43 = vpop.permute.xlu1 %416  ;;  %v4669_v37 = vpop.permute.xlu0 %298 }
 0x177   :  { %v4671_v45 = vpop.permute.xlu1 %492  ;;  %v4673_v20 = vpop.permute.xlu0 %374 }
 0x17b   :  { %v4675_v46 = vpop.permute.xlu1 %568  ;;  %v4677_v40 = vpop.permute.xlu0 %450 }
 0x17f   :  { %v4679_v49 = vpop.permute.xlu1 %644  ;;  %v4681_v50 = vpop.permute.xlu0 %526 }
 0x183   :  { %v4683_v41 = vpop.permute.xlu1 %720  ;;  %v4685_v52 = vpop.permute.xlu0 %602 }
 0x187   :  { %v4687_v55 = vpop.permute.xlu1 %796  ;;  %v4689_v56 = vpop.permute.xlu0 %678 }
 0x18b   :  { %v4691_v57 = vpop.permute.xlu1 %872  ;;  %v4693_v58 = vpop.permute.xlu0 %754 }
 0x18c   :  { %6121 = vst [vmem:[#allocation19_spill] sm:$0xff] %v4691_v57  ;;  %v929_v57 = vrot.slane %v920_v63, %v4315_v3  ;;  %v957_v63 = vld [vmem:[#allocation7 + $0x12] ss:$8 sm:$0x3] }
 0x18f   :  { %v4695_v47 = vpop.permute.xlu1 %300  ;;  %v4697_v32 = vpop.permute.xlu0 %830 }
 0x193   :  { %v4699_v60 = vpop.permute.xlu1 %376  ;;  %v4701_v62 = vpop.permute.xlu0 %302 }
 0x197   :  { %v4703_v36 = vpop.permute.xlu1 %452  ;;  %v4705_v53 = vpop.permute.xlu0 %378 }
 0x19b   :  { %v4707_v0 = vpop.permute.xlu1 %528  ;;  %v4709_v31 = vpop.permute.xlu0 %454 }
 0x19f   :  { %v4711_v2 = vpop.permute.xlu1 %604  ;;  %v4713_v1 = vpop.permute.xlu0 %530 }
 0x1a3   :  { %v4715_v35 = vpop.permute.xlu1 %680  ;;  %v4717_v38 = vpop.permute.xlu0 %606 }
 0x1a7   :  { %v4719_v5 = vpop.permute.xlu1 %756  ;;  %v4721_v14 = vpop.permute.xlu0 %682 }
 0x1ab   :  { %v4723_v17 = vpop.permute.xlu0 %758  ;;  %v4725_v6 = vpop.permute.xlu1 %832 }
 0x1af   :  { %v4727_v42 = vpop.permute.xlu0 %834  ;;  %v894_v24 = vpop.permute.xlu1 %893 }
 0x1b0   :  { %6122 = vst [vmem:[#allocation20_spill] sm:$0xff] %v4727_v42  ;;  %v902_v51 = vmul.f32 %v894_v24, %v4570_v59 }
 0x1b3   :  { %v892_v7 = vpop.permute.xlu0 %891 }
 0x1b4   :  { %v896_v8 = vsel %vm895_vm14, %v892_v7, %v894_v24  ;;  %v900_v27 = vmul.f32 %v892_v7, %v4510_v9 }
 0x1b5   :  { %v901_v10 = vmul.f32 %v896_v8, %v4552_v54 }
 0x1b6   :  { %906 = vrot.lane.b32.xlu0 %v900_v27, %s4176_s11 }
 0x1b7   :  { %908 = vrot.lane.b32.xlu1 %v901_v10, %s4176_s11 }
 0x1ba   :  { %910 = vrot.lane.b32.xlu0 %v902_v51, %s4176_s11 }
 0x1bb   :  { %930 = vrot.lane.b32.xlu1 %v925_v12, %s4175_s10 }
 0x1be   :  { %932 = vrot.lane.b32.xlu0 %v929_v57, %s4175_s10  ;;  %v966_v57 = vrot.slane %v957_v63, %v4315_v3  ;;  %s4204_s10 = smov 78  }
 0x228   :  { %v4737_v23 = vpop.permute.xlu0 %906 }
 0x229   :  { %6123 = vst [vmem:[#allocation21_spill] sm:$0xff] %v4737_v23  ;;  %v4739_v7 = vpop.permute.xlu1 %908  ;;  %v962_v23 = vrot.slane %v957_v63, %v4318_v4 }
 0x22a   :  { %6124 = vst [vmem:[#allocation22_spill] sm:$0xff] %v4739_v7 }
 0x22c   :  { %v4741_v34 = vpop.permute.xlu0 %910 }
 0x22d   :  { %6125 = vst [vmem:[#allocation23_spill] sm:$0xff] %v4741_v34  ;;  %v931_v8 = vpop.permute.xlu1 %930 }
 0x22e   :  { %v938_v27 = vmul.f32 %v931_v8, %v4436_v44 }
 0x230   :  { %v933_v10 = vpop.permute.xlu0 %932  ;;  %944 = vrot.lane.b32.xlu1 %v938_v27, %s4176_s11 }
 0x231   :  { %v934_v24 = vsel %vm895_vm14, %v931_v8, %v933_v10  ;;  %v940_v51 = vmul.f32 %v933_v10, %v4498_v26  ;;  %vm2186_vm14 = vcmask 433152  }
 0x232   :  { %v939_v12 = vmul.f32 %v934_v24, %v4443_v48 }
 0x234   :  { %948 = vrot.lane.b32.xlu1 %v940_v51, %s4176_s11  ;;  %946 = vrot.lane.b32.xlu0 %v939_v12, %s4176_s11  ;;  %v996_v12 = vld [vmem:[#allocation9 + $0x12] ss:$8 sm:$0x3]  ;;  %s4205_s11 = smov 77  }
 0x238   :  { %969 = vrot.lane.b32.xlu1 %v966_v57, %s4177_s12  ;;  %967 = vrot.lane.b32.xlu0 %v962_v23, %s4177_s12  ;;  %v1001_v23 = vrot.slane %v996_v12, %v4318_v4  ;;  %v1005_v57 = vrot.slane %v996_v12, %v4315_v3 }
 0x2a2   :  { %v4749_v34 = vpop.permute.xlu1 %944 }
 0x2a3   :  { %6126 = vst [vmem:[#allocation24_spill] sm:$0xff] %v4749_v34 }
 0x2a6   :  { %v4751_v7 = vpop.permute.xlu1 %948  ;;  %v4753_v27 = vpop.permute.xlu0 %946 }
 0x2a7   :  { %6127 = vst [vmem:[#allocation25_spill] sm:$0xff] %v4751_v7  ;;  %6128 = vst [vmem:[#allocation26_spill] sm:$0xff] %v4753_v27 }
 0x2aa   :  { %v970_v8 = vpop.permute.xlu1 %969  ;;  %v968_v10 = vpop.permute.xlu0 %967 }
 0x2ab   :  { %v972_v24 = vsel %vm971_vm15, %v968_v10, %v970_v8  ;;  %v976_v51 = vmul.f32 %v968_v10, %v4510_v9  ;;  %v978_v63 = vmul.f32 %v970_v8, %v4570_v59 }
 0x2ac   :  { %v977_v42 = vmul.f32 %v972_v24, %v4552_v54 }
 0x2ad   :  { %982 = vrot.lane.b32.xlu0 %v976_v51, %s4178_s13 }
 0x2ae   :  { %984 = vrot.lane.b32.xlu1 %v977_v42, %s4178_s13 }
 0x2b1   :  { %986 = vrot.lane.b32.xlu0 %v978_v63, %s4178_s13  ;;  %v1033_v63 = vld [vmem:[#allocation7 + $0x13] ss:$8 sm:$0x3] }
 0x2b2   :  { %1006 = vrot.lane.b32.xlu1 %v1001_v23, %s4177_s12  ;;  %v1042_v23 = vrot.slane %v1033_v63, %v4315_v3 }
 0x2b5   :  { %1008 = vrot.lane.b32.xlu0 %v1005_v57, %s4177_s12  ;;  %v1038_v57 = vrot.slane %v1033_v63, %v4318_v4  ;;  %s4207_s12 = smov 76  }
 0x31f   :  { %v4761_v7 = vpop.permute.xlu0 %982 }
 0x320   :  { %6129 = vst [vmem:[#allocation27_spill] sm:$0xff] %v4761_v7  ;;  %v4763_v34 = vpop.permute.xlu1 %984 }
 0x321   :  { %6130 = vst [vmem:[#allocation28_spill] sm:$0xff] %v4763_v34 }
 0x323   :  { %v4765_v10 = vpop.permute.xlu0 %986 }
 0x324   :  { %6131 = vst [vmem:[#allocation29_spill] sm:$0xff] %v4765_v10  ;;  %v1007_v27 = vpop.permute.xlu1 %1006 }
 0x325   :  { %v1014_v24 = vmul.f32 %v1007_v27, %v4436_v44 }
 0x327   :  { %v1009_v51 = vpop.permute.xlu0 %1008  ;;  %1020 = vrot.lane.b32.xlu1 %v1014_v24, %s4178_s13 }
 0x328   :  { %v1010_v42 = vsel %vm971_vm15, %v1007_v27, %v1009_v51  ;;  %v1016_v8 = vmul.f32 %v1009_v51, %v4498_v26  ;;  %vm2262_vm15 = vcmask 441344  }
 0x329   :  { %v1015_v12 = vmul.f32 %v1010_v42, %v4443_v48 }
 0x32b   :  { %1024 = vrot.lane.b32.xlu1 %v1016_v8, %s4178_s13  ;;  %1022 = vrot.lane.b32.xlu0 %v1015_v12, %s4178_s13  ;;  %v1072_v12 = vld [vmem:[#allocation9 + $0x13] ss:$8 sm:$0x3]  ;;  %s4208_s13 = smov 53  }
 0x32c   :  { %v1077_v63 = vrot.slane %v1072_v12, %v4318_v4 }
 0x32f   :  { %1045 = vrot.lane.b32.xlu1 %v1042_v23, %s4179_s14  ;;  %1043 = vrot.lane.b32.xlu0 %v1038_v57, %s4179_s14  ;;  %v1081_v57 = vrot.slane %v1072_v12, %v4315_v3 }
 0x399   :  { %v4773_v10 = vpop.permute.xlu1 %1020 }
 0x39a   :  { %6132 = vst [vmem:[#allocation30_spill] sm:$0xff] %v4773_v10 }
 0x39d   :  { %v4775_v7 = vpop.permute.xlu1 %1024  ;;  %v4777_v24 = vpop.permute.xlu0 %1022 }
 0x39e   :  { %6133 = vst [vmem:[#allocation31_spill] sm:$0xff] %v4775_v7  ;;  %6134 = vst [vmem:[#allocation32_spill] sm:$0xff] %v4777_v24 }
 0x3a1   :  { %v1046_v27 = vpop.permute.xlu1 %1045  ;;  %v1044_v51 = vpop.permute.xlu0 %1043 }
 0x3a2   :  { %v1048_v42 = vsel %vm1047_vm0, %v1044_v51, %v1046_v27  ;;  %v1052_v8 = vmul.f32 %v1044_v51, %v4510_v9  ;;  %v1054_v23 = vmul.f32 %v1046_v27, %v4570_v59 }
 0x3a3   :  { %v1053_v34 = vmul.f32 %v1048_v42, %v4552_v54 }
 0x3a4   :  { %1058 = vrot.lane.b32.xlu0 %v1052_v8, %s4180_s15 }
 0x3a5   :  { %1060 = vrot.lane.b32.xlu1 %v1053_v34, %s4180_s15 }
 0x3a8   :  { %1062 = vrot.lane.b32.xlu0 %v1054_v23, %s4180_s15  ;;  %v1109_v23 = vld [vmem:[#allocation7 + $0x14] ss:$8 sm:$0x3] }
 0x3a9   :  { %1082 = vrot.lane.b32.xlu1 %v1077_v63, %s4179_s14  ;;  %v1118_v63 = vrot.slane %v1109_v23, %v4315_v3 }
 0x3ac   :  { %1084 = vrot.lane.b32.xlu0 %v1081_v57, %s4179_s14  ;;  %v1114_v57 = vrot.slane %v1109_v23, %v4318_v4  ;;  %s4209_s14 = smov 75  }
 0x416   :  { %v4785_v7 = vpop.permute.xlu0 %1058 }
 0x417   :  { %6135 = vst [vmem:[#allocation33_spill] sm:$0xff] %v4785_v7  ;;  %v4787_v10 = vpop.permute.xlu1 %1060 }
 0x418   :  { %6136 = vst [vmem:[#allocation34_spill] sm:$0xff] %v4787_v10 }
 0x41a   :  { %v4789_v51 = vpop.permute.xlu0 %1062 }
 0x41b   :  { %6137 = vst [vmem:[#allocation35_spill] sm:$0xff] %v4789_v51  ;;  %v1083_v24 = vpop.permute.xlu1 %1082 }
 0x41c   :  { %v1090_v42 = vmul.f32 %v1083_v24, %v4436_v44 }
 0x41e   :  { %v1085_v8 = vpop.permute.xlu0 %1084  ;;  %1096 = vrot.lane.b32.xlu1 %v1090_v42, %s4180_s15 }
 0x41f   :  { %v1086_v34 = vsel %vm1047_vm0, %v1083_v24, %v1085_v8  ;;  %v1092_v27 = vmul.f32 %v1085_v8, %v4498_v26  ;;  %vm2338_vm0 = vcmask 523264  }
 0x420   :  { %v1091_v12 = vmul.f32 %v1086_v34, %v4443_v48 }
 0x422   :  { %1100 = vrot.lane.b32.xlu1 %v1092_v27, %s4180_s15  ;;  %1098 = vrot.lane.b32.xlu0 %v1091_v12, %s4180_s15  ;;  %v1148_v12 = vld [vmem:[#allocation9 + $0x14] ss:$8 sm:$0x3]  ;;  %s4210_s15 = smov 54  }
 0x423   :  { %v1153_v23 = vrot.slane %v1148_v12, %v4318_v4 }
 0x426   :  { %1121 = vrot.lane.b32.xlu1 %v1118_v63, %s4181_s16  ;;  %1119 = vrot.lane.b32.xlu0 %v1114_v57, %s4181_s16  ;;  %v1157_v57 = vrot.slane %v1148_v12, %v4315_v3 }
 0x490   :  { %v4797_v51 = vpop.permute.xlu1 %1096 }
 0x491   :  { %6138 = vst [vmem:[#allocation36_spill] sm:$0xff] %v4797_v51 }
 0x494   :  { %v4799_v7 = vpop.permute.xlu1 %1100  ;;  %v4801_v42 = vpop.permute.xlu0 %1098 }
 0x495   :  { %6139 = vst [vmem:[#allocation37_spill] sm:$0xff] %v4799_v7  ;;  %6140 = vst [vmem:[#allocation38_spill] sm:$0xff] %v4801_v42 }
 0x498   :  { %v1122_v24 = vpop.permute.xlu1 %1121  ;;  %v1120_v8 = vpop.permute.xlu0 %1119 }
 0x499   :  { %v1124_v34 = vsel %vm1123_vm1, %v1120_v8, %v1122_v24  ;;  %v1128_v27 = vmul.f32 %v1120_v8, %v4510_v9  ;;  %v1130_v63 = vmul.f32 %v1122_v24, %v4570_v59 }
 0x49a   :  { %v1129_v10 = vmul.f32 %v1124_v34, %v4552_v54 }
 0x49b   :  { %1134 = vrot.lane.b32.xlu0 %v1128_v27, %s4182_s17 }
 0x49c   :  { %1136 = vrot.lane.b32.xlu1 %v1129_v10, %s4182_s17 }
 0x49f   :  { %1138 = vrot.lane.b32.xlu0 %v1130_v63, %s4182_s17  ;;  %v1185_v63 = vld [vmem:[#allocation7 + $0x15] ss:$8 sm:$0x3] }
 0x4a0   :  { %1158 = vrot.lane.b32.xlu1 %v1153_v23, %s4181_s16  ;;  %v1194_v23 = vrot.slane %v1185_v63, %v4315_v3 }
 0x4a3   :  { %1160 = vrot.lane.b32.xlu0 %v1157_v57, %s4181_s16  ;;  %v1190_v57 = vrot.slane %v1185_v63, %v4318_v4  ;;  %s4211_s16 = smov 74  }
 0x50d   :  { %v4809_v7 = vpop.permute.xlu0 %1134 }
 0x50e   :  { %6141 = vst [vmem:[#allocation39_spill] sm:$0xff] %v4809_v7  ;;  %v4811_v51 = vpop.permute.xlu1 %1136 }
 0x50f   :  { %6142 = vst [vmem:[#allocation40_spill] sm:$0xff] %v4811_v51 }
 0x511   :  { %v4813_v8 = vpop.permute.xlu0 %1138 }
 0x512   :  { %6143 = vst [vmem:[#allocation41_spill] sm:$0xff] %v4813_v8  ;;  %v1159_v42 = vpop.permute.xlu1 %1158 }
 0x513   :  { %v1166_v34 = vmul.f32 %v1159_v42, %v4436_v44 }
 0x515   :  { %v1161_v27 = vpop.permute.xlu0 %1160  ;;  %1172 = vrot.lane.b32.xlu1 %v1166_v34, %s4182_s17 }
 0x516   :  { %v1162_v10 = vsel %vm1123_vm1, %v1159_v42, %v1161_v27  ;;  %v1168_v24 = vmul.f32 %v1161_v27, %v4498_v26  ;;  %vm2413_vm1 = vcmask 531456  }
 0x517   :  { %v1167_v12 = vmul.f32 %v1162_v10, %v4443_v48 }
 0x519   :  { %1176 = vrot.lane.b32.xlu1 %v1168_v24, %s4182_s17  ;;  %1174 = vrot.lane.b32.xlu0 %v1167_v12, %s4182_s17  ;;  %v1224_v12 = vld [vmem:[#allocation9 + $0x15] ss:$8 sm:$0x3]  ;;  %s4212_s17 = smov 64  }
 0x51a   :  { %v1229_v63 = vrot.slane %v1224_v12, %v4318_v4 }
 0x51d   :  { %1197 = vrot.lane.b32.xlu1 %v1194_v23, %s4183_s18  ;;  %1195 = vrot.lane.b32.xlu0 %v1190_v57, %s4183_s18  ;;  %v1233_v57 = vrot.slane %v1224_v12, %v4315_v3 }
 0x587   :  { %v4821_v8 = vpop.permute.xlu1 %1172 }
 0x588   :  { %6144 = vst [vmem:[#allocation42_spill] sm:$0xff] %v4821_v8 }
 0x58b   :  { %v4823_v7 = vpop.permute.xlu1 %1176  ;;  %v4825_v34 = vpop.permute.xlu0 %1174 }
 0x58c   :  { %6145 = vst [vmem:[#allocation43_spill] sm:$0xff] %v4823_v7  ;;  %6146 = vst [vmem:[#allocation44_spill] sm:$0xff] %v4825_v34 }
 0x58f   :  { %v1198_v42 = vpop.permute.xlu1 %1197  ;;  %v1196_v27 = vpop.permute.xlu0 %1195 }
 0x590   :  { %v1200_v10 = vsel %vm1199_vm2, %v1196_v27, %v1198_v42  ;;  %v1204_v24 = vmul.f32 %v1196_v27, %v4510_v9  ;;  %v1206_v23 = vmul.f32 %v1198_v42, %v4570_v59 }
 0x591   :  { %v1205_v51 = vmul.f32 %v1200_v10, %v4552_v54 }
 0x592   :  { %1210 = vrot.lane.b32.xlu0 %v1204_v24, %s4184_s19 }
 0x593   :  { %1212 = vrot.lane.b32.xlu1 %v1205_v51, %s4184_s19 }
 0x596   :  { %1214 = vrot.lane.b32.xlu0 %v1206_v23, %s4184_s19  ;;  %v1261_v23 = vld [vmem:[#allocation7 + $0x16] ss:$8 sm:$0x3] }
 0x597   :  { %1234 = vrot.lane.b32.xlu1 %v1229_v63, %s4183_s18  ;;  %v1270_v63 = vrot.slane %v1261_v23, %v4315_v3 }
 0x59a   :  { %1236 = vrot.lane.b32.xlu0 %v1233_v57, %s4183_s18  ;;  %v1266_v57 = vrot.slane %v1261_v23, %v4318_v4  ;;  %s4213_s18 = smov 65  }
 0x604   :  { %v4833_v7 = vpop.permute.xlu0 %1210 }
 0x605   :  { %6147 = vst [vmem:[#allocation45_spill] sm:$0xff] %v4833_v7  ;;  %v4835_v8 = vpop.permute.xlu1 %1212  ;;  %v1300_v7 = vld [vmem:[#allocation9 + $0x16] ss:$8 sm:$0x3] }
 0x606   :  { %6148 = vst [vmem:[#allocation46_spill] sm:$0xff] %v4835_v8 }
 0x608   :  { %v4837_v27 = vpop.permute.xlu0 %1214 }
 0x609   :  { %6149 = vst [vmem:[#allocation47_spill] sm:$0xff] %v4837_v27  ;;  %v1235_v34 = vpop.permute.xlu1 %1234 }
 0x60a   :  { %v1242_v10 = vmul.f32 %v1235_v34, %v4436_v44 }
 0x60c   :  { %v1237_v24 = vpop.permute.xlu0 %1236  ;;  %1248 = vrot.lane.b32.xlu1 %v1242_v10, %s4184_s19 }
 0x60d   :  { %v1238_v51 = vsel %vm1199_vm2, %v1235_v34, %v1237_v24  ;;  %v1244_v42 = vmul.f32 %v1237_v24, %v4498_v26  ;;  %vm2489_vm2 = vcmask 539648  }
 0x60e   :  { %v1243_v12 = vmul.f32 %v1238_v51, %v4443_v48 }
 0x610   :  { %1252 = vrot.lane.b32.xlu1 %v1244_v42, %s4184_s19  ;;  %1250 = vrot.lane.b32.xlu0 %v1243_v12, %s4184_s19  ;;  %s4214_s19 = smov 63  }
 0x614   :  { %1273 = vrot.lane.b32.xlu1 %v1270_v63, %s4185_s20  ;;  %1271 = vrot.lane.b32.xlu0 %v1266_v57, %s4185_s20  ;;  %v1305_v63 = vrot.slane %v1300_v7, %v4318_v4 }
 0x67e   :  { %v4847_v27 = vpop.permute.xlu1 %1248 }
 0x67f   :  { %6150 = vst [vmem:[#allocation48_spill] sm:$0xff] %v4847_v27 }
 0x682   :  { %v4849_v10 = vpop.permute.xlu1 %1252  ;;  %v4851_v34 = vpop.permute.xlu0 %1250 }
 0x683   :  { %6151 = vst [vmem:[#allocation49_spill] sm:$0xff] %v4849_v10  ;;  %6152 = vst [vmem:[#allocation50_spill] sm:$0xff] %v4851_v34  ;;  %v1309_v10 = vrot.slane %v1300_v7, %v4315_v3 }
 0x686   :  { %v1274_v24 = vpop.permute.xlu1 %1273  ;;  %v1272_v51 = vpop.permute.xlu0 %1271 }
 0x687   :  { %v1276_v42 = vsel %vm1275_vm3, %v1272_v51, %v1274_v24  ;;  %v1280_v12 = vmul.f32 %v1272_v51, %v4510_v9  ;;  %v1282_v57 = vmul.f32 %v1274_v24, %v4570_v59 }
 0x688   :  { %v1281_v23 = vmul.f32 %v1276_v42, %v4552_v54 }
 0x689   :  { %1286 = vrot.lane.b32.xlu0 %v1280_v12, %s4186_s21 }
 0x68a   :  { %1288 = vrot.lane.b32.xlu1 %v1281_v23, %s4186_s21 }
 0x68d   :  { %1290 = vrot.lane.b32.xlu0 %v1282_v57, %s4186_s21  ;;  %v1337_v57 = vld [vmem:[#allocation7 + $0x17] ss:$8 sm:$0x3] }
 0x68e   :  { %1310 = vrot.lane.b32.xlu1 %v1305_v63, %s4185_s20 }
 0x691   :  { %1312 = vrot.lane.b32.xlu0 %v1309_v10, %s4185_s20  ;;  %v1346_v10 = vrot.slane %v1337_v57, %v4315_v3 }
 0x6fb   :  { %v4864_v51 = vpop.permute.xlu0 %1286 }
 0x6fc   :  { %6153 = vst [vmem:[#allocation51_spill] sm:$0xff] %v4864_v51  ;;  %v4866_v42 = vpop.permute.xlu1 %1288 }
 0x6fd   :  { %6154 = vst [vmem:[#allocation52_spill] sm:$0xff] %v4866_v42  ;;  %v1376_v42 = vld [vmem:[#allocation9 + $0x17] ss:$8 sm:$0x3] }
 0x6ff   :  { %v4868_v27 = vpop.permute.xlu0 %1290 }
 0x700   :  { %6155 = vst [vmem:[#allocation53_spill] sm:$0xff] %v4868_v27  ;;  %v1311_v12 = vpop.permute.xlu1 %1310  ;;  %v1342_v27 = vrot.slane %v1337_v57, %v4318_v4 }
 0x701   :  { %v1318_v23 = vmul.f32 %v1311_v12, %v4436_v44 }
 0x703   :  { %v1313_v34 = vpop.permute.xlu0 %1312  ;;  %1324 = vrot.lane.b32.xlu1 %v1318_v23, %s4186_s21 }
 0x704   :  { %v1314_v24 = vsel %vm1275_vm3, %v1311_v12, %v1313_v34  ;;  %v1320_v7 = vmul.f32 %v1313_v34, %v4498_v26 }
 0x705   :  { %v1319_v63 = vmul.f32 %v1314_v24, %v4443_v48 }
 0x707   :  { %1328 = vrot.lane.b32.xlu1 %v1320_v7, %s4186_s21  ;;  %1326 = vrot.lane.b32.xlu0 %v1319_v63, %s4186_s21 }
 0x70b   :  { %1349 = vrot.lane.b32.xlu1 %v1346_v10, %s4187_s0  ;;  %1347 = vrot.lane.b32.xlu0 %v1342_v27, %s4187_s0  ;;  %v1381_v27 = vrot.slane %v1376_v42, %v4318_v4  ;;  %v1385_v10 = vrot.slane %v1376_v42, %v4315_v3 }
 0x775   :  { %v4879_v51 = vpop.permute.xlu1 %1324 }
 0x776   :  { %6156 = vst [vmem:[#allocation54_spill] sm:$0xff] %v4879_v51 }
 0x779   :  { %v4881_v23 = vpop.permute.xlu1 %1328  ;;  %v4883_v12 = vpop.permute.xlu0 %1326 }
 0x77a   :  { %6157 = vst [vmem:[#allocation55_spill] sm:$0xff] %v4881_v23  ;;  %6158 = vst [vmem:[#allocation56_spill] sm:$0xff] %v4883_v12 }
 0x77d   :  { %v1350_v34 = vpop.permute.xlu1 %1349  ;;  %v1348_v24 = vpop.permute.xlu0 %1347 }
 0x77e   :  { %v1352_v7 = vsel %vm1351_vm4, %v1348_v24, %v1350_v34  ;;  %v1356_v63 = vmul.f32 %v1348_v24, %v4510_v9  ;;  %v1358_v57 = vmul.f32 %v1350_v34, %v4570_v59 }
 0x77f   :  { %v1357_v8 = vmul.f32 %v1352_v7, %v4552_v54 }
 0x780   :  { %1362 = vrot.lane.b32.xlu0 %v1356_v63, %s4188_s24 }
 0x781   :  { %1364 = vrot.lane.b32.xlu1 %v1357_v8, %s4188_s24 }
 0x784   :  { %1366 = vrot.lane.b32.xlu0 %v1358_v57, %s4188_s24  ;;  %v1413_v57 = vld [vmem:[#allocation7 + $0x20] ss:$8 sm:$0x3] }
 0x785   :  { %1386 = vrot.lane.b32.xlu1 %v1381_v27, %s4187_s0  ;;  %v1422_v27 = vrot.slane %v1413_v57, %v4315_v3 }
 0x788   :  { %1388 = vrot.lane.b32.xlu0 %v1385_v10, %s4187_s0  ;;  %v1418_v10 = vrot.slane %v1413_v57, %v4318_v4  ;;  %s4215_s0 = smov 66  }
 0x7f2   :  { %v4891_v23 = vpop.permute.xlu0 %1362 }
 0x7f3   :  { %6159 = vst [vmem:[#allocation57_spill] sm:$0xff] %v4891_v23  ;;  %v4893_v51 = vpop.permute.xlu1 %1364 }
 0x7f4   :  { %6160 = vst [vmem:[#allocation58_spill] sm:$0xff] %v4893_v51 }
 0x7f6   :  { %v4895_v24 = vpop.permute.xlu0 %1366 }
 0x7f7   :  { %6161 = vst [vmem:[#allocation59_spill] sm:$0xff] %v4895_v24  ;;  %v1387_v12 = vpop.permute.xlu1 %1386 }
 0x7f8   :  { %v1394_v7 = vmul.f32 %v1387_v12, %v4436_v44 }
 0x7fa   :  { %v1389_v63 = vpop.permute.xlu0 %1388  ;;  %1400 = vrot.lane.b32.xlu1 %v1394_v7, %s4188_s24 }
 0x7fb   :  { %v1390_v8 = vsel %vm1351_vm4, %v1387_v12, %v1389_v63  ;;  %v1396_v34 = vmul.f32 %v1389_v63, %v4498_v26  ;;  %vm2565_vm4 = vcmask 547840  }
 0x7fc   :  { %v1395_v42 = vmul.f32 %v1390_v8, %v4443_v48 }
 0x7fe   :  { %1404 = vrot.lane.b32.xlu1 %v1396_v34, %s4188_s24  ;;  %1402 = vrot.lane.b32.xlu0 %v1395_v42, %s4188_s24  ;;  %v1452_v42 = vld [vmem:[#allocation9 + $0x20] ss:$8 sm:$0x3]  ;;  %s4216_s24 = smov 62  }
 0x7ff   :  { %v1457_v57 = vrot.slane %v1452_v42, %v4318_v4 }
 0x802   :  { %1425 = vrot.lane.b32.xlu1 %v1422_v27, %s4189_s2  ;;  %1423 = vrot.lane.b32.xlu0 %v1418_v10, %s4189_s2  ;;  %v1461_v10 = vrot.slane %v1452_v42, %v4315_v3 }
 0x86c   :  { %v4903_v24 = vpop.permute.xlu1 %1400 }
 0x86d   :  { %6162 = vst [vmem:[#allocation60_spill] sm:$0xff] %v4903_v24 }
 0x870   :  { %v4905_v23 = vpop.permute.xlu1 %1404  ;;  %v4907_v7 = vpop.permute.xlu0 %1402 }
 0x871   :  { %6163 = vst [vmem:[#allocation61_spill] sm:$0xff] %v4905_v23  ;;  %6164 = vst [vmem:[#allocation62_spill] sm:$0xff] %v4907_v7 }
 0x874   :  { %v1426_v12 = vpop.permute.xlu1 %1425  ;;  %v1424_v63 = vpop.permute.xlu0 %1423 }
 0x875   :  { %v1428_v8 = vsel %vm1427_vm6, %v1424_v63, %v1426_v12  ;;  %v1432_v34 = vmul.f32 %v1424_v63, %v4510_v9  ;;  %v1434_v27 = vmul.f32 %v1426_v12, %v4570_v59 }
 0x876   :  { %v1433_v51 = vmul.f32 %v1428_v8, %v4552_v54 }
 0x877   :  { %1438 = vrot.lane.b32.xlu0 %v1432_v34, %s4190_s22 }
 0x878   :  { %1440 = vrot.lane.b32.xlu1 %v1433_v51, %s4190_s22 }
 0x87b   :  { %1442 = vrot.lane.b32.xlu0 %v1434_v27, %s4190_s22  ;;  %v1489_v27 = vld [vmem:[#allocation7 + $0x21] ss:$8 sm:$0x3] }
 0x87c   :  { %1462 = vrot.lane.b32.xlu1 %v1457_v57, %s4189_s2  ;;  %v1498_v57 = vrot.slane %v1489_v27, %v4315_v3 }
 0x87f   :  { %1464 = vrot.lane.b32.xlu0 %v1461_v10, %s4189_s2  ;;  %v1494_v10 = vrot.slane %v1489_v27, %v4318_v4  ;;  %s4217_s2 = smov 67  }
 0x8e9   :  { %v4915_v23 = vpop.permute.xlu0 %1438 }
 0x8ea   :  { %6165 = vst [vmem:[#allocation63_spill] sm:$0xff] %v4915_v23  ;;  %v4917_v24 = vpop.permute.xlu1 %1440 }
 0x8eb   :  { %6166 = vst [vmem:[#allocation64_spill] sm:$0xff] %v4917_v24 }
 0x8ed   :  { %v4919_v63 = vpop.permute.xlu0 %1442 }
 0x8ee   :  { %6167 = vst [vmem:[#allocation65_spill] sm:$0xff] %v4919_v63  ;;  %v1463_v7 = vpop.permute.xlu1 %1462 }
 0x8ef   :  { %v1470_v8 = vmul.f32 %v1463_v7, %v4436_v44 }
 0x8f1   :  { %v1465_v34 = vpop.permute.xlu0 %1464  ;;  %1476 = vrot.lane.b32.xlu1 %v1470_v8, %s4190_s22 }
 0x8f2   :  { %v1466_v51 = vsel %vm1427_vm6, %v1463_v7, %v1465_v34  ;;  %v1472_v12 = vmul.f32 %v1465_v34, %v4498_v26  ;;  %vm2641_vm6 = vcmask 556032  }
 0x8f3   :  { %v1471_v42 = vmul.f32 %v1466_v51, %v4443_v48 }
 0x8f5   :  { %1480 = vrot.lane.b32.xlu1 %v1472_v12, %s4190_s22  ;;  %1478 = vrot.lane.b32.xlu0 %v1471_v42, %s4190_s22  ;;  %v1528_v42 = vld [vmem:[#allocation9 + $0x21] ss:$8 sm:$0x3]  ;;  %s4218_s22 = smov 61  }
 0x8f6   :  { %v1533_v27 = vrot.slane %v1528_v42, %v4318_v4 }
 0x8f9   :  { %1501 = vrot.lane.b32.xlu1 %v1498_v57, %s4191_s25  ;;  %1499 = vrot.lane.b32.xlu0 %v1494_v10, %s4191_s25  ;;  %v1537_v10 = vrot.slane %v1528_v42, %v4315_v3 }
 0x963   :  { %v4927_v63 = vpop.permute.xlu1 %1476 }
 0x964   :  { %6168 = vst [vmem:[#allocation66_spill] sm:$0xff] %v4927_v63 }
 0x967   :  { %v4929_v23 = vpop.permute.xlu1 %1480  ;;  %v4931_v8 = vpop.permute.xlu0 %1478 }
 0x968   :  { %6169 = vst [vmem:[#allocation67_spill] sm:$0xff] %v4929_v23  ;;  %6170 = vst [vmem:[#allocation68_spill] sm:$0xff] %v4931_v8 }
 0x96b   :  { %v1502_v7 = vpop.permute.xlu1 %1501  ;;  %v1500_v34 = vpop.permute.xlu0 %1499 }
 0x96c   :  { %v1504_v51 = vsel %vm1503_vm7, %v1500_v34, %v1502_v7  ;;  %v1508_v12 = vmul.f32 %v1500_v34, %v4510_v9  ;;  %v1510_v57 = vmul.f32 %v1502_v7, %v4570_v59 }
 0x96d   :  { %v1509_v24 = vmul.f32 %v1504_v51, %v4552_v54 }
 0x96e   :  { %1514 = vrot.lane.b32.xlu0 %v1508_v12, %s4192_s26 }
 0x96f   :  { %1516 = vrot.lane.b32.xlu1 %v1509_v24, %s4192_s26 }
 0x972   :  { %1518 = vrot.lane.b32.xlu0 %v1510_v57, %s4192_s26  ;;  %v1565_v57 = vld [vmem:[#allocation7 + $0x22] ss:$8 sm:$0x3] }
 0x973   :  { %1538 = vrot.lane.b32.xlu1 %v1533_v27, %s4191_s25  ;;  %v1574_v27 = vrot.slane %v1565_v57, %v4315_v3 }
 0x976   :  { %1540 = vrot.lane.b32.xlu0 %v1537_v10, %s4191_s25  ;;  %v1570_v10 = vrot.slane %v1565_v57, %v4318_v4  ;;  %s4219_s25 = smov 68  }
 0x9e0   :  { %v4939_v23 = vpop.permute.xlu0 %1514 }
 0x9e1   :  { %6171 = vst [vmem:[#allocation69_spill] sm:$0xff] %v4939_v23  ;;  %v4941_v63 = vpop.permute.xlu1 %1516 }
 0x9e2   :  { %6172 = vst [vmem:[#allocation70_spill] sm:$0xff] %v4941_v63 }
 0x9e4   :  { %v4943_v34 = vpop.permute.xlu0 %1518 }
 0x9e5   :  { %6173 = vst [vmem:[#allocation71_spill] sm:$0xff] %v4943_v34  ;;  %v1539_v8 = vpop.permute.xlu1 %1538 }
 0x9e6   :  { %v1546_v51 = vmul.f32 %v1539_v8, %v4436_v44 }
 0x9e8   :  { %v1541_v12 = vpop.permute.xlu0 %1540  ;;  %1552 = vrot.lane.b32.xlu1 %v1546_v51, %s4192_s26 }
 0x9e9   :  { %v1542_v24 = vsel %vm1503_vm7, %v1539_v8, %v1541_v12  ;;  %v1548_v7 = vmul.f32 %v1541_v12, %v4498_v26  ;;  %vm2717_vm7 = vcmask 564224  }
 0x9ea   :  { %v1547_v42 = vmul.f32 %v1542_v24, %v4443_v48 }
 0x9ec   :  { %1556 = vrot.lane.b32.xlu1 %v1548_v7, %s4192_s26  ;;  %1554 = vrot.lane.b32.xlu0 %v1547_v42, %s4192_s26  ;;  %v1604_v42 = vld [vmem:[#allocation9 + $0x22] ss:$8 sm:$0x3]  ;;  %s4220_s26 = smov 60  }
 0x9ed   :  { %v1609_v57 = vrot.slane %v1604_v42, %v4318_v4 }
 0x9f0   :  { %1577 = vrot.lane.b32.xlu1 %v1574_v27, %s4193_s27  ;;  %1575 = vrot.lane.b32.xlu0 %v1570_v10, %s4193_s27  ;;  %v1613_v10 = vrot.slane %v1604_v42, %v4315_v3 }
 0xa5a   :  { %v4951_v34 = vpop.permute.xlu1 %1552 }
 0xa5b   :  { %6174 = vst [vmem:[#allocation72_spill] sm:$0xff] %v4951_v34 }
 0xa5e   :  { %v4953_v23 = vpop.permute.xlu1 %1556  ;;  %v4955_v51 = vpop.permute.xlu0 %1554 }
 0xa5f   :  { %6175 = vst [vmem:[#allocation73_spill] sm:$0xff] %v4953_v23  ;;  %6176 = vst [vmem:[#allocation74_spill] sm:$0xff] %v4955_v51 }
 0xa62   :  { %v1578_v8 = vpop.permute.xlu1 %1577  ;;  %v1576_v12 = vpop.permute.xlu0 %1575 }
 0xa63   :  { %v1580_v24 = vsel %vm1579_vm8, %v1576_v12, %v1578_v8  ;;  %v1584_v7 = vmul.f32 %v1576_v12, %v4510_v9  ;;  %v1586_v27 = vmul.f32 %v1578_v8, %v4570_v59 }
 0xa64   :  { %v1585_v63 = vmul.f32 %v1580_v24, %v4552_v54 }
 0xa65   :  { %1590 = vrot.lane.b32.xlu0 %v1584_v7, %s4194_s28 }
 0xa66   :  { %1592 = vrot.lane.b32.xlu1 %v1585_v63, %s4194_s28 }
 0xa69   :  { %1594 = vrot.lane.b32.xlu0 %v1586_v27, %s4194_s28  ;;  %v1641_v27 = vld [vmem:[#allocation7 + $0x23] ss:$8 sm:$0x3] }
 0xa6a   :  { %1614 = vrot.lane.b32.xlu1 %v1609_v57, %s4193_s27  ;;  %v1650_v57 = vrot.slane %v1641_v27, %v4315_v3 }
 0xa6d   :  { %1616 = vrot.lane.b32.xlu0 %v1613_v10, %s4193_s27  ;;  %v1646_v10 = vrot.slane %v1641_v27, %v4318_v4  ;;  %s4221_s27 = smov 69  }
 0xad7   :  { %v4963_v23 = vpop.permute.xlu0 %1590 }
 0xad8   :  { %6177 = vst [vmem:[#allocation75_spill] sm:$0xff] %v4963_v23  ;;  %v4965_v34 = vpop.permute.xlu1 %1592 }
 0xad9   :  { %6178 = vst [vmem:[#allocation76_spill] sm:$0xff] %v4965_v34 }
 0xadb   :  { %v4967_v12 = vpop.permute.xlu0 %1594 }
 0xadc   :  { %6179 = vst [vmem:[#allocation77_spill] sm:$0xff] %v4967_v12  ;;  %v1615_v51 = vpop.permute.xlu1 %1614 }
 0xadd   :  { %v1622_v24 = vmul.f32 %v1615_v51, %v4436_v44 }
 0xadf   :  { %v1617_v7 = vpop.permute.xlu0 %1616  ;;  %1628 = vrot.lane.b32.xlu1 %v1622_v24, %s4194_s28 }
 0xae0   :  { %v1618_v63 = vsel %vm1579_vm8, %v1615_v51, %v1617_v7  ;;  %v1624_v8 = vmul.f32 %v1617_v7, %v4498_v26  ;;  %vm2793_vm8 = vcmask 572416  }
 0xae1   :  { %v1623_v42 = vmul.f32 %v1618_v63, %v4443_v48 }
 0xae3   :  { %1632 = vrot.lane.b32.xlu1 %v1624_v8, %s4194_s28  ;;  %1630 = vrot.lane.b32.xlu0 %v1623_v42, %s4194_s28  ;;  %v1680_v42 = vld [vmem:[#allocation9 + $0x23] ss:$8 sm:$0x3]  ;;  %s4222_s28 = smov 59  }
 0xae4   :  { %v1685_v27 = vrot.slane %v1680_v42, %v4318_v4 }
 0xae7   :  { %1653 = vrot.lane.b32.xlu1 %v1650_v57, %s4195_s30  ;;  %1651 = vrot.lane.b32.xlu0 %v1646_v10, %s4195_s30  ;;  %v1689_v10 = vrot.slane %v1680_v42, %v4315_v3 }
 0xb51   :  { %v4975_v12 = vpop.permute.xlu1 %1628 }
 0xb52   :  { %6180 = vst [vmem:[#allocation78_spill] sm:$0xff] %v4975_v12 }
 0xb55   :  { %v4977_v23 = vpop.permute.xlu1 %1632  ;;  %v4979_v24 = vpop.permute.xlu0 %1630 }
 0xb56   :  { %6181 = vst [vmem:[#allocation79_spill] sm:$0xff] %v4977_v23  ;;  %6182 = vst [vmem:[#allocation80_spill] sm:$0xff] %v4979_v24 }
 0xb59   :  { %v1654_v51 = vpop.permute.xlu1 %1653  ;;  %v1652_v7 = vpop.permute.xlu0 %1651 }
 0xb5a   :  { %v1656_v63 = vsel %vm1655_vm9, %v1652_v7, %v1654_v51  ;;  %v1660_v8 = vmul.f32 %v1652_v7, %v4510_v9  ;;  %v1662_v57 = vmul.f32 %v1654_v51, %v4570_v59 }
 0xb5b   :  { %v1661_v34 = vmul.f32 %v1656_v63, %v4552_v54 }
 0xb5c   :  { %1666 = vrot.lane.b32.xlu0 %v1660_v8, %s4196_s23 }
 0xb5d   :  { %1668 = vrot.lane.b32.xlu1 %v1661_v34, %s4196_s23 }
 0xb60   :  { %1670 = vrot.lane.b32.xlu0 %v1662_v57, %s4196_s23  ;;  %v1717_v57 = vld [vmem:[#allocation7 + $0x24] ss:$8 sm:$0x3] }
 0xb61   :  { %1690 = vrot.lane.b32.xlu1 %v1685_v27, %s4195_s30  ;;  %v1726_v27 = vrot.slane %v1717_v57, %v4315_v3 }
 0xb64   :  { %1692 = vrot.lane.b32.xlu0 %v1689_v10, %s4195_s30  ;;  %v1722_v10 = vrot.slane %v1717_v57, %v4318_v4  ;;  %s4223_s30 = smov 70  }
 0xbce   :  { %v4987_v23 = vpop.permute.xlu0 %1666 }
 0xbcf   :  { %6183 = vst [vmem:[#allocation81_spill] sm:$0xff] %v4987_v23  ;;  %v4989_v12 = vpop.permute.xlu1 %1668 }
 0xbd0   :  { %6184 = vst [vmem:[#allocation82_spill] sm:$0xff] %v4989_v12 }
 0xbd2   :  { %v4991_v7 = vpop.permute.xlu0 %1670 }
 0xbd3   :  { %6185 = vst [vmem:[#allocation83_spill] sm:$0xff] %v4991_v7  ;;  %v1691_v24 = vpop.permute.xlu1 %1690 }
 0xbd4   :  { %v1698_v63 = vmul.f32 %v1691_v24, %v4436_v44 }
 0xbd6   :  { %v1693_v8 = vpop.permute.xlu0 %1692  ;;  %1704 = vrot.lane.b32.xlu1 %v1698_v63, %s4196_s23 }
 0xbd7   :  { %v1694_v34 = vsel %vm1655_vm9, %v1691_v24, %v1693_v8  ;;  %v1700_v51 = vmul.f32 %v1693_v8, %v4498_v26  ;;  %vm1824_vm9 = vcmask 654336  }
 0xbd8   :  { %v1699_v42 = vmul.f32 %v1694_v34, %v4443_v48 }
 0xbda   :  { %1708 = vrot.lane.b32.xlu1 %v1700_v51, %s4196_s23  ;;  %1706 = vrot.lane.b32.xlu0 %v1699_v42, %s4196_s23  ;;  %v1756_v42 = vld [vmem:[#allocation9 + $0x24] ss:$8 sm:$0x3]  ;;  %s4224_s23 = smov 58  }
 0xbdb   :  { %v1761_v57 = vrot.slane %v1756_v42, %v4318_v4 }
 0xbde   :  { %1729 = vrot.lane.b32.xlu1 %v1726_v27, %s4197_s4  ;;  %1727 = vrot.lane.b32.xlu0 %v1722_v10, %s4197_s4  ;;  %v1765_v10 = vrot.slane %v1756_v42, %v4315_v3 }
 0xc48   :  { %v4999_v7 = vpop.permute.xlu1 %1704 }
 0xc49   :  { %6186 = vst [vmem:[#allocation84_spill] sm:$0xff] %v4999_v7 }
 0xc4c   :  { %v5001_v23 = vpop.permute.xlu1 %1708  ;;  %v5003_v63 = vpop.permute.xlu0 %1706 }
 0xc4d   :  { %6187 = vst [vmem:[#allocation85_spill] sm:$0xff] %v5001_v23  ;;  %6188 = vst [vmem:[#allocation86_spill] sm:$0xff] %v5003_v63 }
 0xc50   :  { %v1730_v24 = vpop.permute.xlu1 %1729  ;;  %v1728_v8 = vpop.permute.xlu0 %1727 }
 0xc51   :  { %v1732_v34 = vsel %vm1731_vm10, %v1728_v8, %v1730_v24  ;;  %v1736_v51 = vmul.f32 %v1728_v8, %v4510_v9  ;;  %v1738_v27 = vmul.f32 %v1730_v24, %v4570_v59 }
 0xc52   :  { %v1737_v12 = vmul.f32 %v1732_v34, %v4552_v54 }
 0xc53   :  { %1742 = vrot.lane.b32.xlu0 %v1736_v51, %s4198_s5 }
 0xc54   :  { %1744 = vrot.lane.b32.xlu1 %v1737_v12, %s4198_s5 }
 0xc57   :  { %1746 = vrot.lane.b32.xlu0 %v1738_v27, %s4198_s5  ;;  %v1793_v27 = vld [vmem:[#allocation7 + $0x25] ss:$8 sm:$0x3] }
 0xc58   :  { %1766 = vrot.lane.b32.xlu1 %v1761_v57, %s4197_s4  ;;  %v1802_v57 = vrot.slane %v1793_v27, %v4315_v3 }
 0xc5b   :  { %1768 = vrot.lane.b32.xlu0 %v1765_v10, %s4197_s4  ;;  %v1798_v10 = vrot.slane %v1793_v27, %v4318_v4  ;;  %s4225_s4 = smov 81  }
 0xcc5   :  { %v5011_v23 = vpop.permute.xlu0 %1742 }
 0xcc6   :  { %6189 = vst [vmem:[#allocation87_spill] sm:$0xff] %v5011_v23  ;;  %v5013_v7 = vpop.permute.xlu1 %1744  ;;  %v1832_v23 = vld [vmem:[#allocation9 + $0x25] ss:$8 sm:$0x3] }
 0xcc7   :  { %6190 = vst [vmem:[#allocation88_spill] sm:$0xff] %v5013_v7 }
 0xcc9   :  { %v5015_v8 = vpop.permute.xlu0 %1746 }
 0xcca   :  { %6191 = vst [vmem:[#allocation89_spill] sm:$0xff] %v5015_v8  ;;  %v1767_v63 = vpop.permute.xlu1 %1766 }
 0xccb   :  { %v1774_v34 = vmul.f32 %v1767_v63, %v4436_v44 }
 0xccd   :  { %v1769_v51 = vpop.permute.xlu0 %1768  ;;  %1780 = vrot.lane.b32.xlu1 %v1774_v34, %s4198_s5 }
 0xcce   :  { %v1770_v12 = vsel %vm1731_vm10, %v1767_v63, %v1769_v51  ;;  %v1776_v24 = vmul.f32 %v1769_v51, %v4498_v26  ;;  %vm2943_vm10 = vcmask 662528  }
 0xccf   :  { %v1775_v42 = vmul.f32 %v1770_v12, %v4443_v48 }
 0xcd1   :  { %1784 = vrot.lane.b32.xlu1 %v1776_v24, %s4198_s5  ;;  %1782 = vrot.lane.b32.xlu0 %v1775_v42, %s4198_s5  ;;  %s4226_s5 = smov 47  }
 0xcd5   :  { %1805 = vrot.lane.b32.xlu1 %v1802_v57, %s4199_s6  ;;  %1803 = vrot.lane.b32.xlu0 %v1798_v10, %s4199_s6  ;;  %v1837_v57 = vrot.slane %v1832_v23, %v4318_v4 }
 0xd3f   :  { %v5025_v8 = vpop.permute.xlu1 %1780 }
 0xd40   :  { %6192 = vst [vmem:[#allocation90_spill] sm:$0xff] %v5025_v8 }
 0xd43   :  { %v5027_v34 = vpop.permute.xlu1 %1784  ;;  %v5029_v63 = vpop.permute.xlu0 %1782 }
 0xd44   :  { %6193 = vst [vmem:[#allocation91_spill] sm:$0xff] %v5027_v34  ;;  %6194 = vst [vmem:[#allocation92_spill] sm:$0xff] %v5029_v63  ;;  %v1841_v34 = vrot.slane %v1832_v23, %v4315_v3 }
 0xd47   :  { %v1806_v51 = vpop.permute.xlu1 %1805  ;;  %v1804_v12 = vpop.permute.xlu0 %1803 }
 0xd48   :  { %v1808_v24 = vsel %vm1807_vm11, %v1804_v12, %v1806_v51  ;;  %v1812_v42 = vmul.f32 %v1804_v12, %v4510_v9  ;;  %v1814_v10 = vmul.f32 %v1806_v51, %v4570_v59 }
 0xd49   :  { %v1813_v27 = vmul.f32 %v1808_v24, %v4552_v54 }
 0xd4a   :  { %1818 = vrot.lane.b32.xlu0 %v1812_v42, %s4200_s7 }
 0xd4b   :  { %1820 = vrot.lane.b32.xlu1 %v1813_v27, %s4200_s7 }
 0xd4e   :  { %1822 = vrot.lane.b32.xlu0 %v1814_v10, %s4200_s7  ;;  %v1869_v10 = vld [vmem:[#allocation7 + $0x26] ss:$8 sm:$0x3] }
 0xd4f   :  { %1842 = vrot.lane.b32.xlu1 %v1837_v57, %s4199_s6 }
 0xd52   :  { %1844 = vrot.lane.b32.xlu0 %v1841_v34, %s4199_s6  ;;  %v1878_v34 = vrot.slane %v1869_v10, %v4315_v3 }
 0xdbc   :  { %v5042_v12 = vpop.permute.xlu0 %1818 }
 0xdbd   :  { %6195 = vst [vmem:[#allocation93_spill] sm:$0xff] %v5042_v12  ;;  %v5044_v24 = vpop.permute.xlu1 %1820 }
 0xdbe   :  { %6196 = vst [vmem:[#allocation94_spill] sm:$0xff] %v5044_v24  ;;  %v1908_v24 = vld [vmem:[#allocation9 + $0x26] ss:$8 sm:$0x3] }
 0xdc0   :  { %v5046_v8 = vpop.permute.xlu0 %1822 }
 0xdc1   :  { %6197 = vst [vmem:[#allocation95_spill] sm:$0xff] %v5046_v8  ;;  %v1843_v42 = vpop.permute.xlu1 %1842  ;;  %v1874_v8 = vrot.slane %v1869_v10, %v4318_v4 }
 0xdc2   :  { %v1850_v27 = vmul.f32 %v1843_v42, %v4436_v44 }
 0xdc4   :  { %v1845_v63 = vpop.permute.xlu0 %1844  ;;  %1856 = vrot.lane.b32.xlu1 %v1850_v27, %s4200_s7 }
 0xdc5   :  { %v1846_v51 = vsel %vm1807_vm11, %v1843_v42, %v1845_v63  ;;  %v1852_v23 = vmul.f32 %v1845_v63, %v4498_v26 }
 0xdc6   :  { %v1851_v57 = vmul.f32 %v1846_v51, %v4443_v48 }
 0xdc8   :  { %1860 = vrot.lane.b32.xlu1 %v1852_v23, %s4200_s7  ;;  %1858 = vrot.lane.b32.xlu0 %v1851_v57, %s4200_s7 }
 0xdcc   :  { %1881 = vrot.lane.b32.xlu1 %v1878_v34, %s4201_s8  ;;  %1879 = vrot.lane.b32.xlu0 %v1874_v8, %s4201_s8  ;;  %v1913_v8 = vrot.slane %v1908_v24, %v4318_v4  ;;  %v1917_v34 = vrot.slane %v1908_v24, %v4315_v3 }
 0xe36   :  { %v5057_v12 = vpop.permute.xlu1 %1856 }
 0xe37   :  { %6198 = vst [vmem:[#allocation96_spill] sm:$0xff] %v5057_v12 }
 0xe3a   :  { %v5059_v27 = vpop.permute.xlu1 %1860  ;;  %v5061_v42 = vpop.permute.xlu0 %1858 }
 0xe3b   :  { %6199 = vst [vmem:[#allocation97_spill] sm:$0xff] %v5059_v27  ;;  %6200 = vst [vmem:[#allocation98_spill] sm:$0xff] %v5061_v42 }
 0xe3e   :  { %v1882_v63 = vpop.permute.xlu1 %1881  ;;  %v1880_v51 = vpop.permute.xlu0 %1879 }
 0xe3f   :  { %v1884_v23 = vsel %vm1883_vm12, %v1880_v51, %v1882_v63  ;;  %v1888_v57 = vmul.f32 %v1880_v51, %v4510_v9  ;;  %v1890_v10 = vmul.f32 %v1882_v63, %v4570_v59 }
 0xe40   :  { %v1889_v7 = vmul.f32 %v1884_v23, %v4552_v54 }
 0xe41   :  { %1894 = vrot.lane.b32.xlu0 %v1888_v57, %s4202_s1 }
 0xe42   :  { %1896 = vrot.lane.b32.xlu1 %v1889_v7, %s4202_s1 }
 0xe45   :  { %1898 = vrot.lane.b32.xlu0 %v1890_v10, %s4202_s1  ;;  %v1945_v10 = vld [vmem:[#allocation7 + $0x27] ss:$8 sm:$0x3] }
 0xe46   :  { %1918 = vrot.lane.b32.xlu1 %v1913_v8, %s4201_s8  ;;  %v1954_v8 = vrot.slane %v1945_v10, %v4315_v3 }
 0xe49   :  { %1920 = vrot.lane.b32.xlu0 %v1917_v34, %s4201_s8  ;;  %v1950_v34 = vrot.slane %v1945_v10, %v4318_v4  ;;  %s4229_s8 = smov 83  }
 0xeb3   :  { %v5069_v27 = vpop.permute.xlu0 %1894 }
 0xeb4   :  { %6201 = vst [vmem:[#allocation99_spill] sm:$0xff] %v5069_v27  ;;  %v5071_v12 = vpop.permute.xlu1 %1896 }
 0xeb5   :  { %6202 = vst [vmem:[#allocation100_spill] sm:$0xff] %v5071_v12 }
 0xeb7   :  { %v5073_v51 = vpop.permute.xlu0 %1898 }
 0xeb8   :  { %6203 = vst [vmem:[#allocation101_spill] sm:$0xff] %v5073_v51  ;;  %v1919_v42 = vpop.permute.xlu1 %1918 }
 0xeb9   :  { %v1926_v23 = vmul.f32 %v1919_v42, %v4436_v44 }
 0xebb   :  { %v1921_v57 = vpop.permute.xlu0 %1920  ;;  %1932 = vrot.lane.b32.xlu1 %v1926_v23, %s4202_s1 }
 0xebc   :  { %v1922_v7 = vsel %vm1883_vm12, %v1919_v42, %v1921_v57  ;;  %v1928_v63 = vmul.f32 %v1921_v57, %v4498_v26  ;;  %vm3019_vm12 = vcmask 670720  }
 0xebd   :  { %v1927_v24 = vmul.f32 %v1922_v7, %v4443_v48 }
 0xebf   :  { %1936 = vrot.lane.b32.xlu1 %v1928_v63, %s4202_s1  ;;  %1934 = vrot.lane.b32.xlu0 %v1927_v24, %s4202_s1  ;;  %v1984_v24 = vld [vmem:[#allocation9 + $0x27] ss:$8 sm:$0x3]  ;;  %s4230_s1 = smov 45  }
 0xec0   :  { %v1989_v10 = vrot.slane %v1984_v24, %v4318_v4 }
 0xec3   :  { %1957 = vrot.lane.b32.xlu1 %v1954_v8, %s4203_s9  ;;  %1955 = vrot.lane.b32.xlu0 %v1950_v34, %s4203_s9  ;;  %v1993_v34 = vrot.slane %v1984_v24, %v4315_v3 }
 0xf2d   :  { %v5081_v51 = vpop.permute.xlu1 %1932 }
 0xf2e   :  { %6204 = vst [vmem:[#allocation102_spill] sm:$0xff] %v5081_v51 }
 0xf31   :  { %v5083_v27 = vpop.permute.xlu1 %1936  ;;  %v5085_v23 = vpop.permute.xlu0 %1934 }
 0xf32   :  { %6205 = vst [vmem:[#allocation103_spill] sm:$0xff] %v5083_v27  ;;  %6206 = vst [vmem:[#allocation104_spill] sm:$0xff] %v5085_v23 }
 0xf35   :  { %v1958_v42 = vpop.permute.xlu1 %1957  ;;  %v1956_v57 = vpop.permute.xlu0 %1955 }
 0xf36   :  { %v1960_v7 = vsel %vm1959_vm13, %v1956_v57, %v1958_v42  ;;  %v1964_v63 = vmul.f32 %v1956_v57, %v4510_v9  ;;  %v1966_v8 = vmul.f32 %v1958_v42, %v4570_v59 }
 0xf37   :  { %v1965_v12 = vmul.f32 %v1960_v7, %v4552_v54 }
 0xf38   :  { %1970 = vrot.lane.b32.xlu0 %v1964_v63, %s4204_s10 }
 0xf39   :  { %1972 = vrot.lane.b32.xlu1 %v1965_v12, %s4204_s10 }
 0xf3c   :  { %1974 = vrot.lane.b32.xlu0 %v1966_v8, %s4204_s10  ;;  %v2021_v8 = vld [vmem:[#allocation7 + $0x30] ss:$8 sm:$0x3] }
 0xf3d   :  { %1994 = vrot.lane.b32.xlu1 %v1989_v10, %s4203_s9  ;;  %v2030_v10 = vrot.slane %v2021_v8, %v4315_v3 }
 0xf40   :  { %1996 = vrot.lane.b32.xlu0 %v1993_v34, %s4203_s9  ;;  %v2026_v34 = vrot.slane %v2021_v8, %v4318_v4  ;;  %s4231_s9 = smov 84  }
 0xfaa   :  { %v5093_v27 = vpop.permute.xlu0 %1970 }
 0xfab   :  { %6207 = vst [vmem:[#allocation105_spill] sm:$0xff] %v5093_v27  ;;  %v5095_v51 = vpop.permute.xlu1 %1972 }
 0xfac   :  { %6208 = vst [vmem:[#allocation106_spill] sm:$0xff] %v5095_v51 }
 0xfae   :  { %v5097_v57 = vpop.permute.xlu0 %1974 }
 0xfaf   :  { %6209 = vst [vmem:[#allocation107_spill] sm:$0xff] %v5097_v57  ;;  %v1995_v23 = vpop.permute.xlu1 %1994 }
 0xfb0   :  { %v2002_v7 = vmul.f32 %v1995_v23, %v4436_v44 }
 0xfb2   :  { %v1997_v63 = vpop.permute.xlu0 %1996  ;;  %2008 = vrot.lane.b32.xlu1 %v2002_v7, %s4204_s10 }
 0xfb3   :  { %v1998_v12 = vsel %vm1959_vm13, %v1995_v23, %v1997_v63  ;;  %v2004_v42 = vmul.f32 %v1997_v63, %v4498_v26  ;;  %vm3095_vm13 = vcmask 678912  }
 0xfb4   :  { %v2003_v24 = vmul.f32 %v1998_v12, %v4443_v48 }
 0xfb6   :  { %2012 = vrot.lane.b32.xlu1 %v2004_v42, %s4204_s10  ;;  %2010 = vrot.lane.b32.xlu0 %v2003_v24, %s4204_s10  ;;  %v2059_v24 = vld [vmem:[#allocation9 + $0x30] ss:$8 sm:$0x3]  ;;  %s4232_s10 = smov 44  }
 0xfb7   :  { %v2064_v8 = vrot.slane %v2059_v24, %v4318_v4 }
 0xfba   :  { %2033 = vrot.lane.b32.xlu1 %v2030_v10, %s4165_s29  ;;  %2031 = vrot.lane.b32.xlu0 %v2026_v34, %s4165_s29  ;;  %v2068_v34 = vrot.slane %v2059_v24, %v4315_v3  ;;  %v2096_v24 = vld [vmem:[#allocation7 + $0x31] ss:$8 sm:$0x3] }
0x1024   :  { %v5107_v57 = vpop.permute.xlu1 %2008 }
0x1025   :  { %6210 = vst [vmem:[#allocation108_spill] sm:$0xff] %v5107_v57 }
0x1028   :  { %v5109_v7 = vpop.permute.xlu1 %2012  ;;  %v5111_v23 = vpop.permute.xlu0 %2010 }
0x1029   :  { %6211 = vst [vmem:[#allocation109_spill] sm:$0xff] %v5109_v7  ;;  %6212 = vst [vmem:[#allocation110_spill] sm:$0xff] %v5111_v23 }
0x102c   :  { %v2034_v63 = vpop.permute.xlu1 %2033  ;;  %v2032_v27 = vpop.permute.xlu0 %2031 }
0x102d   :  { %v2035_v12 = vsel %vm214_vm5, %v2032_v27, %v2034_v63  ;;  %v2039_v42 = vmul.f32 %v2032_v27, %v4510_v9  ;;  %v2041_v10 = vmul.f32 %v2034_v63, %v4570_v59 }
0x102e   :  { %v2040_v51 = vmul.f32 %v2035_v12, %v4552_v54 }
0x102f   :  { %2045 = vrot.lane.b32.xlu0 %v2039_v42, %s4205_s11 }
0x1030   :  { %2047 = vrot.lane.b32.xlu1 %v2040_v51, %s4205_s11 }
0x1033   :  { %2049 = vrot.lane.b32.xlu0 %v2041_v10, %s4205_s11 }
0x1034   :  { %2069 = vrot.lane.b32.xlu1 %v2064_v8, %s4165_s29 }
0x1037   :  { %2071 = vrot.lane.b32.xlu0 %v2068_v34, %s4165_s29  ;;  %v2105_v34 = vrot.slane %v2096_v24, %v4315_v3  ;;  %s4206_s29 = smov 52  }
0x10a1   :  { %v5121_v7 = vpop.permute.xlu0 %2045 }
0x10a2   :  { %6213 = vst [vmem:[#allocation111_spill] sm:$0xff] %v5121_v7  ;;  %v5123_v27 = vpop.permute.xlu1 %2047  ;;  %v2101_v7 = vrot.slane %v2096_v24, %v4318_v4 }
0x10a3   :  { %6214 = vst [vmem:[#allocation112_spill] sm:$0xff] %v5123_v27 }
0x10a5   :  { %v5125_v57 = vpop.permute.xlu0 %2049 }
0x10a6   :  { %6215 = vst [vmem:[#allocation113_spill] sm:$0xff] %v5125_v57  ;;  %v2070_v12 = vpop.permute.xlu1 %2069 }
0x10a7   :  { %v2077_v51 = vmul.f32 %v2070_v12, %v4436_v44 }
0x10a9   :  { %v2072_v42 = vpop.permute.xlu0 %2071  ;;  %2083 = vrot.lane.b32.xlu1 %v2077_v51, %s4205_s11 }
0x10aa   :  { %v2073_v63 = vsel %vm214_vm5, %v2070_v12, %v2072_v42  ;;  %v2079_v10 = vmul.f32 %v2072_v42, %v4498_v26  ;;  %vm2110_vm5 = vcmask 424960  }
0x10ab   :  { %v2078_v8 = vmul.f32 %v2073_v63, %v4443_v48 }
0x10ad   :  { %2087 = vrot.lane.b32.xlu1 %v2079_v10, %s4205_s11  ;;  %2085 = vrot.lane.b32.xlu0 %v2078_v8, %s4205_s11  ;;  %v2135_v8 = vld [vmem:[#allocation9 + $0x31] ss:$8 sm:$0x3]  ;;  %s4233_s11 = smov 85  }
0x10b1   :  { %2108 = vrot.lane.b32.xlu1 %v2105_v34, %s4206_s29  ;;  %2106 = vrot.lane.b32.xlu0 %v2101_v7, %s4206_s29  ;;  %v2140_v7 = vrot.slane %v2135_v8, %v4318_v4  ;;  %v2144_v34 = vrot.slane %v2135_v8, %v4315_v3 }
0x111b   :  { %v5133_v57 = vpop.permute.xlu1 %2083 }
0x111c   :  { %6216 = vst [vmem:[#allocation114_spill] sm:$0xff] %v5133_v57 }
0x111f   :  { %v5135_v27 = vpop.permute.xlu1 %2087  ;;  %v5137_v51 = vpop.permute.xlu0 %2085 }
0x1120   :  { %6217 = vst [vmem:[#allocation115_spill] sm:$0xff] %v5135_v27  ;;  %6218 = vst [vmem:[#allocation116_spill] sm:$0xff] %v5137_v51 }
0x1123   :  { %v2109_v12 = vpop.permute.xlu1 %2108  ;;  %v2107_v42 = vpop.permute.xlu0 %2106 }
0x1124   :  { %v2111_v63 = vsel %vm2110_vm5, %v2107_v42, %v2109_v12  ;;  %v2115_v10 = vmul.f32 %v2107_v42, %v4510_v9  ;;  %v2117_v24 = vmul.f32 %v2109_v12, %v4570_v59 }
0x1125   :  { %v2116_v23 = vmul.f32 %v2111_v63, %v4552_v54 }
0x1126   :  { %2121 = vrot.lane.b32.xlu0 %v2115_v10, %s4207_s12 }
0x1127   :  { %2123 = vrot.lane.b32.xlu1 %v2116_v23, %s4207_s12 }
0x112a   :  { %2125 = vrot.lane.b32.xlu0 %v2117_v24, %s4207_s12  ;;  %v2172_v24 = vld [vmem:[#allocation7 + $0x32] ss:$8 sm:$0x3] }
0x112b   :  { %2145 = vrot.lane.b32.xlu1 %v2140_v7, %s4206_s29  ;;  %v2181_v7 = vrot.slane %v2172_v24, %v4315_v3 }
0x112e   :  { %2147 = vrot.lane.b32.xlu0 %v2144_v34, %s4206_s29  ;;  %v2177_v34 = vrot.slane %v2172_v24, %v4318_v4  ;;  %s4234_s29 = smov 43  }
0x1198   :  { %v5145_v27 = vpop.permute.xlu0 %2121 }
0x1199   :  { %6219 = vst [vmem:[#allocation117_spill] sm:$0xff] %v5145_v27  ;;  %v5147_v57 = vpop.permute.xlu1 %2123 }
0x119a   :  { %6220 = vst [vmem:[#allocation118_spill] sm:$0xff] %v5147_v57 }
0x119c   :  { %v5149_v42 = vpop.permute.xlu0 %2125 }
0x119d   :  { %6221 = vst [vmem:[#allocation119_spill] sm:$0xff] %v5149_v42  ;;  %v2146_v51 = vpop.permute.xlu1 %2145 }
0x119e   :  { %v2153_v63 = vmul.f32 %v2146_v51, %v4436_v44 }
0x11a0   :  { %v2148_v10 = vpop.permute.xlu0 %2147  ;;  %2159 = vrot.lane.b32.xlu1 %v2153_v63, %s4207_s12 }
0x11a1   :  { %v2149_v23 = vsel %vm2110_vm5, %v2146_v51, %v2148_v10  ;;  %v2155_v12 = vmul.f32 %v2148_v10, %v4498_v26  ;;  %vm3171_vm5 = vcmask 687104  }
0x11a2   :  { %v2154_v8 = vmul.f32 %v2149_v23, %v4443_v48 }
0x11a4   :  { %2163 = vrot.lane.b32.xlu1 %v2155_v12, %s4207_s12  ;;  %2161 = vrot.lane.b32.xlu0 %v2154_v8, %s4207_s12  ;;  %v2211_v8 = vld [vmem:[#allocation9 + $0x32] ss:$8 sm:$0x3]  ;;  %s4235_s12 = smov 86  }
0x11a5   :  { %v2216_v24 = vrot.slane %v2211_v8, %v4318_v4 }
0x11a8   :  { %2184 = vrot.lane.b32.xlu1 %v2181_v7, %s4208_s13  ;;  %2182 = vrot.lane.b32.xlu0 %v2177_v34, %s4208_s13  ;;  %v2220_v34 = vrot.slane %v2211_v8, %v4315_v3 }
0x1212   :  { %v5157_v42 = vpop.permute.xlu1 %2159 }
0x1213   :  { %6222 = vst [vmem:[#allocation120_spill] sm:$0xff] %v5157_v42 }
0x1216   :  { %v5159_v27 = vpop.permute.xlu1 %2163  ;;  %v5161_v63 = vpop.permute.xlu0 %2161 }
0x1217   :  { %6223 = vst [vmem:[#allocation121_spill] sm:$0xff] %v5159_v27  ;;  %6224 = vst [vmem:[#allocation122_spill] sm:$0xff] %v5161_v63 }
0x121a   :  { %v2185_v51 = vpop.permute.xlu1 %2184  ;;  %v2183_v10 = vpop.permute.xlu0 %2182 }
0x121b   :  { %v2187_v23 = vsel %vm2186_vm14, %v2183_v10, %v2185_v51  ;;  %v2191_v12 = vmul.f32 %v2183_v10, %v4510_v9  ;;  %v2193_v7 = vmul.f32 %v2185_v51, %v4570_v59 }
0x121c   :  { %v2192_v57 = vmul.f32 %v2187_v23, %v4552_v54 }
0x121d   :  { %2197 = vrot.lane.b32.xlu0 %v2191_v12, %s4209_s14 }
0x121e   :  { %2199 = vrot.lane.b32.xlu1 %v2192_v57, %s4209_s14 }
0x1221   :  { %2201 = vrot.lane.b32.xlu0 %v2193_v7, %s4209_s14  ;;  %v2248_v7 = vld [vmem:[#allocation7 + $0x33] ss:$8 sm:$0x3] }
0x1222   :  { %2221 = vrot.lane.b32.xlu1 %v2216_v24, %s4208_s13  ;;  %v2257_v24 = vrot.slane %v2248_v7, %v4315_v3 }
0x1225   :  { %2223 = vrot.lane.b32.xlu0 %v2220_v34, %s4208_s13  ;;  %v2253_v34 = vrot.slane %v2248_v7, %v4318_v4  ;;  %s4236_s13 = smov 97  }
0x128f   :  { %v5169_v27 = vpop.permute.xlu0 %2197 }
0x1290   :  { %6225 = vst [vmem:[#allocation123_spill] sm:$0xff] %v5169_v27  ;;  %v5171_v42 = vpop.permute.xlu1 %2199 }
0x1291   :  { %6226 = vst [vmem:[#allocation124_spill] sm:$0xff] %v5171_v42 }
0x1293   :  { %v5173_v10 = vpop.permute.xlu0 %2201 }
0x1294   :  { %6227 = vst [vmem:[#allocation125_spill] sm:$0xff] %v5173_v10  ;;  %v2222_v63 = vpop.permute.xlu1 %2221 }
0x1295   :  { %v2229_v23 = vmul.f32 %v2222_v63, %v4436_v44 }
0x1297   :  { %v2224_v12 = vpop.permute.xlu0 %2223  ;;  %2235 = vrot.lane.b32.xlu1 %v2229_v23, %s4209_s14 }
0x1298   :  { %v2225_v57 = vsel %vm2186_vm14, %v2222_v63, %v2224_v12  ;;  %v2231_v51 = vmul.f32 %v2224_v12, %v4498_v26  ;;  %vm304_vm14 = vcmask 1039360  }
0x1299   :  { %v2230_v8 = vmul.f32 %v2225_v57, %v4443_v48 }
0x129b   :  { %2239 = vrot.lane.b32.xlu1 %v2231_v51, %s4209_s14  ;;  %2237 = vrot.lane.b32.xlu0 %v2230_v8, %s4209_s14  ;;  %v2287_v8 = vld [vmem:[#allocation9 + $0x33] ss:$8 sm:$0x3]  ;;  %s4237_s14 = smov 98  }
0x129c   :  { %v2292_v7 = vrot.slane %v2287_v8, %v4318_v4 }
0x129f   :  { %2260 = vrot.lane.b32.xlu1 %v2257_v24, %s4210_s15  ;;  %2258 = vrot.lane.b32.xlu0 %v2253_v34, %s4210_s15  ;;  %v2296_v34 = vrot.slane %v2287_v8, %v4315_v3 }
0x1309   :  { %v5181_v10 = vpop.permute.xlu1 %2235 }
0x130a   :  { %6228 = vst [vmem:[#allocation126_spill] sm:$0xff] %v5181_v10 }
0x130d   :  { %v5183_v27 = vpop.permute.xlu1 %2239  ;;  %v5185_v23 = vpop.permute.xlu0 %2237 }
0x130e   :  { %6229 = vst [vmem:[#allocation127_spill] sm:$0xff] %v5183_v27  ;;  %6230 = vst [vmem:[#allocation128_spill] sm:$0xff] %v5185_v23 }
0x1311   :  { %v2261_v63 = vpop.permute.xlu1 %2260  ;;  %v2259_v12 = vpop.permute.xlu0 %2258 }
0x1312   :  { %v2263_v57 = vsel %vm2262_vm15, %v2259_v12, %v2261_v63  ;;  %v2267_v51 = vmul.f32 %v2259_v12, %v4510_v9  ;;  %v2269_v24 = vmul.f32 %v2261_v63, %v4570_v59 }
0x1313   :  { %v2268_v42 = vmul.f32 %v2263_v57, %v4552_v54 }
0x1314   :  { %2273 = vrot.lane.b32.xlu0 %v2267_v51, %s4211_s16 }
0x1315   :  { %2275 = vrot.lane.b32.xlu1 %v2268_v42, %s4211_s16 }
0x1318   :  { %2277 = vrot.lane.b32.xlu0 %v2269_v24, %s4211_s16  ;;  %v2324_v24 = vld [vmem:[#allocation7 + $0x34] ss:$8 sm:$0x3] }
0x1319   :  { %2297 = vrot.lane.b32.xlu1 %v2292_v7, %s4210_s15  ;;  %v2333_v7 = vrot.slane %v2324_v24, %v4315_v3 }
0x131c   :  { %2299 = vrot.lane.b32.xlu0 %v2296_v34, %s4210_s15  ;;  %v2329_v34 = vrot.slane %v2324_v24, %v4318_v4  ;;  %s4239_s15 = smov 100  }
0x1386   :  { %v5193_v27 = vpop.permute.xlu0 %2273 }
0x1387   :  { %6231 = vst [vmem:[#allocation129_spill] sm:$0xff] %v5193_v27  ;;  %v5195_v10 = vpop.permute.xlu1 %2275  ;;  %v2362_v27 = vld [vmem:[#allocation9 + $0x34] ss:$8 sm:$0x3] }
0x1388   :  { %6232 = vst [vmem:[#allocation130_spill] sm:$0xff] %v5195_v10 }
0x138a   :  { %v5197_v12 = vpop.permute.xlu0 %2277 }
0x138b   :  { %6233 = vst [vmem:[#allocation131_spill] sm:$0xff] %v5197_v12  ;;  %v2298_v23 = vpop.permute.xlu1 %2297 }
0x138c   :  { %v2305_v57 = vmul.f32 %v2298_v23, %v4436_v44 }
0x138e   :  { %v2300_v51 = vpop.permute.xlu0 %2299  ;;  %2311 = vrot.lane.b32.xlu1 %v2305_v57, %s4211_s16 }
0x138f   :  { %v2301_v42 = vsel %vm2262_vm15, %v2298_v23, %v2300_v51  ;;  %v2307_v63 = vmul.f32 %v2300_v51, %v4498_v26  ;;  %vm380_vm15 = vcmask 1031168  }
0x1390   :  { %v2306_v8 = vmul.f32 %v2301_v42, %v4443_v48 }
0x1392   :  { %2315 = vrot.lane.b32.xlu1 %v2307_v63, %s4211_s16  ;;  %2313 = vrot.lane.b32.xlu0 %v2306_v8, %s4211_s16  ;;  %s4240_s16 = smov 101  }
0x1396   :  { %2336 = vrot.lane.b32.xlu1 %v2333_v7, %s4212_s17  ;;  %2334 = vrot.lane.b32.xlu0 %v2329_v34, %s4212_s17  ;;  %v2367_v7 = vrot.slane %v2362_v27, %v4318_v4 }
0x1400   :  { %v5207_v12 = vpop.permute.xlu1 %2311 }
0x1401   :  { %6234 = vst [vmem:[#allocation132_spill] sm:$0xff] %v5207_v12 }
0x1404   :  { %v5209_v57 = vpop.permute.xlu1 %2315  ;;  %v5211_v23 = vpop.permute.xlu0 %2313 }
0x1405   :  { %6235 = vst [vmem:[#allocation133_spill] sm:$0xff] %v5209_v57  ;;  %6236 = vst [vmem:[#allocation134_spill] sm:$0xff] %v5211_v23  ;;  %v2371_v57 = vrot.slane %v2362_v27, %v4315_v3 }
0x1408   :  { %v2337_v51 = vpop.permute.xlu1 %2336  ;;  %v2335_v42 = vpop.permute.xlu0 %2334 }
0x1409   :  { %v2339_v63 = vsel %vm2338_vm0, %v2335_v42, %v2337_v51  ;;  %v2343_v8 = vmul.f32 %v2335_v42, %v4510_v9  ;;  %v2345_v34 = vmul.f32 %v2337_v51, %v4570_v59 }
0x140a   :  { %v2344_v24 = vmul.f32 %v2339_v63, %v4552_v54 }
0x140b   :  { %2349 = vrot.lane.b32.xlu0 %v2343_v8, %s4212_s17 }
0x140c   :  { %2351 = vrot.lane.b32.xlu1 %v2344_v24, %s4212_s17 }
0x140f   :  { %2353 = vrot.lane.b32.xlu0 %v2345_v34, %s4212_s17  ;;  %v2399_v34 = vld [vmem:[#allocation7 + $0x35] ss:$8 sm:$0x3] }
0x1410   :  { %2372 = vrot.lane.b32.xlu1 %v2367_v7, %s4212_s17 }
0x1413   :  { %2374 = vrot.lane.b32.xlu0 %v2371_v57, %s4212_s17  ;;  %v2408_v57 = vrot.slane %v2399_v34, %v4315_v3 }
0x147d   :  { %v5224_v42 = vpop.permute.xlu0 %2349 }
0x147e   :  { %6237 = vst [vmem:[#allocation135_spill] sm:$0xff] %v5224_v42  ;;  %v5226_v12 = vpop.permute.xlu1 %2351 }
0x147f   :  { %6238 = vst [vmem:[#allocation136_spill] sm:$0xff] %v5226_v12  ;;  %v2438_v12 = vld [vmem:[#allocation9 + $0x35] ss:$8 sm:$0x3] }
0x1481   :  { %v5228_v63 = vpop.permute.xlu0 %2353 }
0x1482   :  { %6239 = vst [vmem:[#allocation137_spill] sm:$0xff] %v5228_v63  ;;  %v2373_v8 = vpop.permute.xlu1 %2372  ;;  %v2404_v63 = vrot.slane %v2399_v34, %v4318_v4 }
0x1483   :  { %v2380_v24 = vmul.f32 %v2373_v8, %v4436_v44 }
0x1485   :  { %v2375_v23 = vpop.permute.xlu0 %2374  ;;  %2386 = vrot.lane.b32.xlu1 %v2380_v24, %s4212_s17 }
0x1486   :  { %v2376_v51 = vsel %vm2338_vm0, %v2373_v8, %v2375_v23  ;;  %v2382_v27 = vmul.f32 %v2375_v23, %v4498_v26 }
0x1487   :  { %v2381_v7 = vmul.f32 %v2376_v51, %v4443_v48 }
0x1489   :  { %2390 = vrot.lane.b32.xlu1 %v2382_v27, %s4212_s17  ;;  %2388 = vrot.lane.b32.xlu0 %v2381_v7, %s4212_s17  ;;  %s4241_s17 = smov 102  }
0x148d   :  { %2411 = vrot.lane.b32.xlu1 %v2408_v57, %s4213_s18  ;;  %2409 = vrot.lane.b32.xlu0 %v2404_v63, %s4213_s18  ;;  %v2443_v63 = vrot.slane %v2438_v12, %v4318_v4  ;;  %v2447_v57 = vrot.slane %v2438_v12, %v4315_v3 }
0x14f7   :  { %v5239_v42 = vpop.permute.xlu1 %2386 }
0x14f8   :  { %6240 = vst [vmem:[#allocation138_spill] sm:$0xff] %v5239_v42 }
0x14fb   :  { %v5241_v24 = vpop.permute.xlu1 %2390  ;;  %v5243_v8 = vpop.permute.xlu0 %2388 }
0x14fc   :  { %6241 = vst [vmem:[#allocation139_spill] sm:$0xff] %v5241_v24  ;;  %6242 = vst [vmem:[#allocation140_spill] sm:$0xff] %v5243_v8 }
0x14ff   :  { %v2412_v23 = vpop.permute.xlu1 %2411  ;;  %v2410_v51 = vpop.permute.xlu0 %2409 }
0x1500   :  { %v2414_v27 = vsel %vm2413_vm1, %v2410_v51, %v2412_v23  ;;  %v2418_v7 = vmul.f32 %v2410_v51, %v4510_v9  ;;  %v2420_v34 = vmul.f32 %v2412_v23, %v4570_v59 }
0x1501   :  { %v2419_v10 = vmul.f32 %v2414_v27, %v4552_v54 }
0x1502   :  { %2424 = vrot.lane.b32.xlu0 %v2418_v7, %s4214_s19 }
0x1503   :  { %2426 = vrot.lane.b32.xlu1 %v2419_v10, %s4214_s19 }
0x1506   :  { %2428 = vrot.lane.b32.xlu0 %v2420_v34, %s4214_s19  ;;  %v2475_v34 = vld [vmem:[#allocation7 + $0x36] ss:$8 sm:$0x3] }
0x1507   :  { %2448 = vrot.lane.b32.xlu1 %v2443_v63, %s4213_s18  ;;  %v2484_v63 = vrot.slane %v2475_v34, %v4315_v3 }
0x150a   :  { %2450 = vrot.lane.b32.xlu0 %v2447_v57, %s4213_s18  ;;  %v2480_v57 = vrot.slane %v2475_v34, %v4318_v4  ;;  %s4242_s18 = smov 42  }
0x1574   :  { %v5251_v24 = vpop.permute.xlu0 %2424 }
0x1575   :  { %6243 = vst [vmem:[#allocation141_spill] sm:$0xff] %v5251_v24  ;;  %v5253_v42 = vpop.permute.xlu1 %2426 }
0x1576   :  { %6244 = vst [vmem:[#allocation142_spill] sm:$0xff] %v5253_v42 }
0x1578   :  { %v5255_v51 = vpop.permute.xlu0 %2428 }
0x1579   :  { %6245 = vst [vmem:[#allocation143_spill] sm:$0xff] %v5255_v51  ;;  %v2449_v8 = vpop.permute.xlu1 %2448 }
0x157a   :  { %v2456_v27 = vmul.f32 %v2449_v8, %v4436_v44 }
0x157c   :  { %v2451_v7 = vpop.permute.xlu0 %2450  ;;  %2462 = vrot.lane.b32.xlu1 %v2456_v27, %s4214_s19 }
0x157d   :  { %v2452_v10 = vsel %vm2413_vm1, %v2449_v8, %v2451_v7  ;;  %v2458_v23 = vmul.f32 %v2451_v7, %v4498_v26  ;;  %vm456_vm1 = vcmask 1022976  }
0x157e   :  { %v2457_v12 = vmul.f32 %v2452_v10, %v4443_v48 }
0x1580   :  { %2466 = vrot.lane.b32.xlu1 %v2458_v23, %s4214_s19  ;;  %2464 = vrot.lane.b32.xlu0 %v2457_v12, %s4214_s19  ;;  %v2514_v12 = vld [vmem:[#allocation9 + $0x36] ss:$8 sm:$0x3]  ;;  %s4243_s19 = smov 31  }
0x1581   :  { %v2519_v34 = vrot.slane %v2514_v12, %v4318_v4 }
0x1584   :  { %2487 = vrot.lane.b32.xlu1 %v2484_v63, %s4215_s0  ;;  %2485 = vrot.lane.b32.xlu0 %v2480_v57, %s4215_s0  ;;  %v2523_v57 = vrot.slane %v2514_v12, %v4315_v3 }
0x15ee   :  { %v5263_v51 = vpop.permute.xlu1 %2462 }
0x15ef   :  { %6246 = vst [vmem:[#allocation144_spill] sm:$0xff] %v5263_v51 }
0x15f2   :  { %v5265_v24 = vpop.permute.xlu1 %2466  ;;  %v5267_v27 = vpop.permute.xlu0 %2464 }
0x15f3   :  { %6247 = vst [vmem:[#allocation145_spill] sm:$0xff] %v5265_v24  ;;  %6248 = vst [vmem:[#allocation146_spill] sm:$0xff] %v5267_v27 }
0x15f6   :  { %v2488_v8 = vpop.permute.xlu1 %2487  ;;  %v2486_v7 = vpop.permute.xlu0 %2485 }
0x15f7   :  { %v2490_v10 = vsel %vm2489_vm2, %v2486_v7, %v2488_v8  ;;  %v2494_v23 = vmul.f32 %v2486_v7, %v4510_v9  ;;  %v2496_v63 = vmul.f32 %v2488_v8, %v4570_v59 }
0x15f8   :  { %v2495_v42 = vmul.f32 %v2490_v10, %v4552_v54 }
0x15f9   :  { %2500 = vrot.lane.b32.xlu0 %v2494_v23, %s4216_s24 }
0x15fa   :  { %2502 = vrot.lane.b32.xlu1 %v2495_v42, %s4216_s24 }
0x15fd   :  { %2504 = vrot.lane.b32.xlu0 %v2496_v63, %s4216_s24  ;;  %v2551_v63 = vld [vmem:[#allocation7 + $0x37] ss:$8 sm:$0x3] }
0x15fe   :  { %2524 = vrot.lane.b32.xlu1 %v2519_v34, %s4215_s0  ;;  %v2560_v34 = vrot.slane %v2551_v63, %v4315_v3 }
0x1601   :  { %2526 = vrot.lane.b32.xlu0 %v2523_v57, %s4215_s0  ;;  %v2556_v57 = vrot.slane %v2551_v63, %v4318_v4  ;;  %s4245_s0 = smov 29  }
0x166b   :  { %v5275_v24 = vpop.permute.xlu0 %2500 }
0x166c   :  { %6249 = vst [vmem:[#allocation147_spill] sm:$0xff] %v5275_v24  ;;  %v5277_v51 = vpop.permute.xlu1 %2502 }
0x166d   :  { %6250 = vst [vmem:[#allocation148_spill] sm:$0xff] %v5277_v51 }
0x166f   :  { %v5279_v7 = vpop.permute.xlu0 %2504 }
0x1670   :  { %6251 = vst [vmem:[#allocation149_spill] sm:$0xff] %v5279_v7  ;;  %v2525_v27 = vpop.permute.xlu1 %2524 }
0x1671   :  { %v2532_v10 = vmul.f32 %v2525_v27, %v4436_v44 }
0x1673   :  { %v2527_v23 = vpop.permute.xlu0 %2526  ;;  %2538 = vrot.lane.b32.xlu1 %v2532_v10, %s4216_s24 }
0x1674   :  { %v2528_v42 = vsel %vm2489_vm2, %v2525_v27, %v2527_v23  ;;  %v2534_v8 = vmul.f32 %v2527_v23, %v4498_v26  ;;  %vm532_vm2 = vcmask 1014784  }
0x1675   :  { %v2533_v12 = vmul.f32 %v2528_v42, %v4443_v48 }
0x1677   :  { %2542 = vrot.lane.b32.xlu1 %v2534_v8, %s4216_s24  ;;  %2540 = vrot.lane.b32.xlu0 %v2533_v12, %s4216_s24  ;;  %v2590_v12 = vld [vmem:[#allocation9 + $0x37] ss:$8 sm:$0x3]  ;;  %s4246_s24 = smov 28  }
0x1678   :  { %v2595_v63 = vrot.slane %v2590_v12, %v4318_v4 }
0x167b   :  { %2563 = vrot.lane.b32.xlu1 %v2560_v34, %s4217_s2  ;;  %2561 = vrot.lane.b32.xlu0 %v2556_v57, %s4217_s2  ;;  %v2599_v57 = vrot.slane %v2590_v12, %v4315_v3 }
0x16e5   :  { %v5287_v7 = vpop.permute.xlu1 %2538 }
0x16e6   :  { %6252 = vst [vmem:[#allocation150_spill] sm:$0xff] %v5287_v7 }
0x16e9   :  { %v5289_v24 = vpop.permute.xlu1 %2542  ;;  %v5291_v10 = vpop.permute.xlu0 %2540 }
0x16ea   :  { %6253 = vst [vmem:[#allocation151_spill] sm:$0xff] %v5289_v24  ;;  %6254 = vst [vmem:[#allocation152_spill] sm:$0xff] %v5291_v10 }
0x16ed   :  { %v2564_v27 = vpop.permute.xlu1 %2563  ;;  %v2562_v23 = vpop.permute.xlu0 %2561 }
0x16ee   :  { %v2566_v42 = vsel %vm2565_vm4, %v2562_v23, %v2564_v27  ;;  %v2570_v8 = vmul.f32 %v2562_v23, %v4510_v9  ;;  %v2572_v34 = vmul.f32 %v2564_v27, %v4570_v59 }
0x16ef   :  { %v2571_v51 = vmul.f32 %v2566_v42, %v4552_v54 }
0x16f0   :  { %2576 = vrot.lane.b32.xlu0 %v2570_v8, %s4218_s22 }
0x16f1   :  { %2578 = vrot.lane.b32.xlu1 %v2571_v51, %s4218_s22 }
0x16f4   :  { %2580 = vrot.lane.b32.xlu0 %v2572_v34, %s4218_s22  ;;  %v2627_v34 = vld [vmem:[#allocation7 + $0x40] ss:$8 sm:$0x3] }
0x16f5   :  { %2600 = vrot.lane.b32.xlu1 %v2595_v63, %s4217_s2  ;;  %v2636_v63 = vrot.slane %v2627_v34, %v4315_v3 }
0x16f8   :  { %2602 = vrot.lane.b32.xlu0 %v2599_v57, %s4217_s2  ;;  %v2632_v57 = vrot.slane %v2627_v34, %v4318_v4  ;;  %s4247_s2 = smov 27  }
0x1762   :  { %v5299_v24 = vpop.permute.xlu0 %2576 }
0x1763   :  { %6255 = vst [vmem:[#allocation153_spill] sm:$0xff] %v5299_v24  ;;  %v5301_v7 = vpop.permute.xlu1 %2578 }
0x1764   :  { %6256 = vst [vmem:[#allocation154_spill] sm:$0xff] %v5301_v7 }
0x1766   :  { %v5303_v23 = vpop.permute.xlu0 %2580 }
0x1767   :  { %6257 = vst [vmem:[#allocation155_spill] sm:$0xff] %v5303_v23  ;;  %v2601_v10 = vpop.permute.xlu1 %2600 }
0x1768   :  { %v2608_v42 = vmul.f32 %v2601_v10, %v4436_v44 }
0x176a   :  { %v2603_v8 = vpop.permute.xlu0 %2602  ;;  %2614 = vrot.lane.b32.xlu1 %v2608_v42, %s4218_s22 }
0x176b   :  { %v2604_v51 = vsel %vm2565_vm4, %v2601_v10, %v2603_v8  ;;  %v2610_v27 = vmul.f32 %v2603_v8, %v4498_v26  ;;  %vm608_vm4 = vcmask 1006592  }
0x176c   :  { %v2609_v12 = vmul.f32 %v2604_v51, %v4443_v48 }
0x176e   :  { %2618 = vrot.lane.b32.xlu1 %v2610_v27, %s4218_s22  ;;  %2616 = vrot.lane.b32.xlu0 %v2609_v12, %s4218_s22  ;;  %v2666_v12 = vld [vmem:[#allocation9 + $0x40] ss:$8 sm:$0x3]  ;;  %s4248_s22 = smov 26  }
0x176f   :  { %v2671_v34 = vrot.slane %v2666_v12, %v4318_v4 }
0x1772   :  { %2639 = vrot.lane.b32.xlu1 %v2636_v63, %s4219_s25  ;;  %2637 = vrot.lane.b32.xlu0 %v2632_v57, %s4219_s25  ;;  %v2675_v57 = vrot.slane %v2666_v12, %v4315_v3 }
0x17dc   :  { %v5311_v23 = vpop.permute.xlu1 %2614 }
0x17dd   :  { %6258 = vst [vmem:[#allocation156_spill] sm:$0xff] %v5311_v23 }
0x17e0   :  { %v5313_v24 = vpop.permute.xlu1 %2618  ;;  %v5315_v42 = vpop.permute.xlu0 %2616 }
0x17e1   :  { %6259 = vst [vmem:[#allocation157_spill] sm:$0xff] %v5313_v24  ;;  %6260 = vst [vmem:[#allocation158_spill] sm:$0xff] %v5315_v42 }
0x17e4   :  { %v2640_v10 = vpop.permute.xlu1 %2639  ;;  %v2638_v8 = vpop.permute.xlu0 %2637 }
0x17e5   :  { %v2642_v51 = vsel %vm2641_vm6, %v2638_v8, %v2640_v10  ;;  %v2646_v27 = vmul.f32 %v2638_v8, %v4510_v9  ;;  %v2648_v63 = vmul.f32 %v2640_v10, %v4570_v59 }
0x17e6   :  { %v2647_v7 = vmul.f32 %v2642_v51, %v4552_v54 }
0x17e7   :  { %2652 = vrot.lane.b32.xlu0 %v2646_v27, %s4220_s26 }
0x17e8   :  { %2654 = vrot.lane.b32.xlu1 %v2647_v7, %s4220_s26 }
0x17eb   :  { %2656 = vrot.lane.b32.xlu0 %v2648_v63, %s4220_s26  ;;  %v2703_v63 = vld [vmem:[#allocation7 + $0x41] ss:$8 sm:$0x3] }
0x17ec   :  { %2676 = vrot.lane.b32.xlu1 %v2671_v34, %s4219_s25  ;;  %v2712_v34 = vrot.slane %v2703_v63, %v4315_v3 }
0x17ef   :  { %2678 = vrot.lane.b32.xlu0 %v2675_v57, %s4219_s25  ;;  %v2708_v57 = vrot.slane %v2703_v63, %v4318_v4  ;;  %s4249_s25 = smov [#allocation10]  }
0x1859   :  { %v5323_v24 = vpop.permute.xlu0 %2652 }
0x185a   :  { %6261 = vst [vmem:[#allocation159_spill] sm:$0xff] %v5323_v24  ;;  %v5325_v23 = vpop.permute.xlu1 %2654 }
0x185b   :  { %6262 = vst [vmem:[#allocation160_spill] sm:$0xff] %v5325_v23 }
0x185d   :  { %v5327_v8 = vpop.permute.xlu0 %2656 }
0x185e   :  { %6263 = vst [vmem:[#allocation161_spill] sm:$0xff] %v5327_v8  ;;  %v2677_v42 = vpop.permute.xlu1 %2676 }
0x185f   :  { %v2684_v51 = vmul.f32 %v2677_v42, %v4436_v44 }
0x1861   :  { %v2679_v27 = vpop.permute.xlu0 %2678  ;;  %2690 = vrot.lane.b32.xlu1 %v2684_v51, %s4220_s26 }
0x1862   :  { %v2680_v7 = vsel %vm2641_vm6, %v2677_v42, %v2679_v27  ;;  %v2686_v10 = vmul.f32 %v2679_v27, %v4498_v26  ;;  %vm684_vm6 = vcmask 998400  }
0x1863   :  { %v2685_v12 = vmul.f32 %v2680_v7, %v4443_v48 }
0x1865   :  { %2694 = vrot.lane.b32.xlu1 %v2686_v10, %s4220_s26  ;;  %2692 = vrot.lane.b32.xlu0 %v2685_v12, %s4220_s26  ;;  %v2742_v12 = vld [vmem:[#allocation9 + $0x41] ss:$8 sm:$0x3]  ;;  %s3940_s26 = sshll.u32 %s4249_s25, 4  ;;  %s3941_s26 = int_to_ptr.vmem [resolvable:$true] %s3940_s26 }
0x1866   :  { %v2747_v63 = vrot.slane %v2742_v12, %v4318_v4  ;;  %p4126_p11 = scmp.lt.s32.totalorder %s3941_s26, %s3941_s26 }
0x1869   :  { %2715 = vrot.lane.b32.xlu1 %v2712_v34, %s4221_s27  ;;  %2713 = vrot.lane.b32.xlu0 %v2708_v57, %s4221_s27  ;;  %v2751_v57 = vrot.slane %v2742_v12, %v4315_v3 }
0x18d3   :  { %v5335_v8 = vpop.permute.xlu1 %2690 }
0x18d4   :  { %6264 = vst [vmem:[#allocation162_spill] sm:$0xff] %v5335_v8 }
0x18d7   :  { %v5337_v24 = vpop.permute.xlu1 %2694  ;;  %v5339_v51 = vpop.permute.xlu0 %2692 }
0x18d8   :  { %6265 = vst [vmem:[#allocation163_spill] sm:$0xff] %v5337_v24  ;;  %6266 = vst [vmem:[#allocation164_spill] sm:$0xff] %v5339_v51 }
0x18db   :  { %v2716_v42 = vpop.permute.xlu1 %2715  ;;  %v2714_v27 = vpop.permute.xlu0 %2713 }
0x18dc   :  { %v2718_v7 = vsel %vm2717_vm7, %v2714_v27, %v2716_v42  ;;  %v2722_v10 = vmul.f32 %v2714_v27, %v4510_v9  ;;  %v2724_v34 = vmul.f32 %v2716_v42, %v4570_v59 }
0x18dd   :  { %v2723_v23 = vmul.f32 %v2718_v7, %v4552_v54 }
0x18de   :  { %2728 = vrot.lane.b32.xlu0 %v2722_v10, %s4222_s28 }
0x18df   :  { %2730 = vrot.lane.b32.xlu1 %v2723_v23, %s4222_s28 }
0x18e2   :  { %2732 = vrot.lane.b32.xlu0 %v2724_v34, %s4222_s28  ;;  %v2779_v34 = vld [vmem:[#allocation7 + $0x42] ss:$8 sm:$0x3] }
0x18e3   :  { %2752 = vrot.lane.b32.xlu1 %v2747_v63, %s4221_s27  ;;  %v2788_v63 = vrot.slane %v2779_v34, %v4315_v3 }
0x18e6   :  { %2754 = vrot.lane.b32.xlu0 %v2751_v57, %s4221_s27  ;;  %v2784_v57 = vrot.slane %v2779_v34, %v4318_v4  ;;  %s4121_s27 = scalar_lea.vmem %s3941_s26, 64 }
0x18e7   :  { %p4122_p10 = scmp.ne.s32.totalorder %s3941_s26, %s4121_s27  ;;  %p4127_p12 = scmp.lt.s32.totalorder %s4121_s27, %s4121_s27 }
0x18e9   :  { %p4128_p13 = por %p4127_p12, %p4126_p11 }
0x18eb   :  { %p4129_p0 = pnand %p4128_p13, %p4122_p10 }
0x1950   :  { %v5347_v24 = vpop.permute.xlu0 %2728 }
0x1951   :  { %6267 = vst [vmem:[#allocation165_spill] sm:$0xff] %v5347_v24  ;;  %v5349_v8 = vpop.permute.xlu1 %2730 }
0x1952   :  { %6268 = vst [vmem:[#allocation166_spill] sm:$0xff] %v5349_v8 }
0x1954   :  { %v5351_v27 = vpop.permute.xlu0 %2732 }
0x1955   :  { %6269 = vst [vmem:[#allocation167_spill] sm:$0xff] %v5351_v27  ;;  %v2753_v51 = vpop.permute.xlu1 %2752 }
0x1956   :  { %v2760_v7 = vmul.f32 %v2753_v51, %v4436_v44 }
0x1958   :  { %v2755_v10 = vpop.permute.xlu0 %2754  ;;  %2766 = vrot.lane.b32.xlu1 %v2760_v7, %s4222_s28 }
0x1959   :  { %v2756_v23 = vsel %vm2717_vm7, %v2753_v51, %v2755_v10  ;;  %v2762_v42 = vmul.f32 %v2755_v10, %v4498_v26  ;;  %vm760_vm7 = vcmask 916480  }
0x195a   :  { %v2761_v12 = vmul.f32 %v2756_v23, %v4443_v48 }
0x195c   :  { %2770 = vrot.lane.b32.xlu1 %v2762_v42, %s4222_s28  ;;  %2768 = vrot.lane.b32.xlu0 %v2761_v12, %s4222_s28  ;;  %v2818_v12 = vld [vmem:[#allocation9 + $0x42] ss:$8 sm:$0x3] }
0x195d   :  { %v2823_v34 = vrot.slane %v2818_v12, %v4318_v4 }
0x1960   :  { %2791 = vrot.lane.b32.xlu1 %v2788_v63, %s4223_s30  ;;  %2789 = vrot.lane.b32.xlu0 %v2784_v57, %s4223_s30  ;;  %v2827_v57 = vrot.slane %v2818_v12, %v4315_v3 }
0x19ca   :  { %v5359_v27 = vpop.permute.xlu1 %2766 }
0x19cb   :  { %6270 = vst [vmem:[#allocation168_spill] sm:$0xff] %v5359_v27 }
0x19ce   :  { %v5361_v24 = vpop.permute.xlu1 %2770  ;;  %v5363_v7 = vpop.permute.xlu0 %2768 }
0x19cf   :  { %6271 = vst [vmem:[#allocation169_spill] sm:$0xff] %v5361_v24  ;;  %6272 = vst [vmem:[#allocation170_spill] sm:$0xff] %v5363_v7 }
0x19d2   :  { %v2792_v51 = vpop.permute.xlu1 %2791  ;;  %v2790_v10 = vpop.permute.xlu0 %2789 }
0x19d3   :  { %v2794_v23 = vsel %vm2793_vm8, %v2790_v10, %v2792_v51  ;;  %v2798_v42 = vmul.f32 %v2790_v10, %v4510_v9  ;;  %v2800_v63 = vmul.f32 %v2792_v51, %v4570_v59 }
0x19d4   :  { %v2799_v8 = vmul.f32 %v2794_v23, %v4552_v54 }
0x19d5   :  { %2804 = vrot.lane.b32.xlu0 %v2798_v42, %s4224_s23 }
0x19d6   :  { %2806 = vrot.lane.b32.xlu1 %v2799_v8, %s4224_s23 }
0x19d9   :  { %2808 = vrot.lane.b32.xlu0 %v2800_v63, %s4224_s23  ;;  %v2855_v63 = vld [vmem:[#allocation7 + $0x43] ss:$8 sm:$0x3] }
0x19da   :  { %2828 = vrot.lane.b32.xlu1 %v2823_v34, %s4223_s30  ;;  %v2864_v34 = vrot.slane %v2855_v63, %v4315_v3 }
0x19dd   :  { %2830 = vrot.lane.b32.xlu0 %v2827_v57, %s4223_s30  ;;  %v2860_v57 = vrot.slane %v2855_v63, %v4318_v4 }
0x1a47   :  { %v5371_v24 = vpop.permute.xlu0 %2804 }
0x1a48   :  { %6273 = vst [vmem:[#allocation171_spill] sm:$0xff] %v5371_v24  ;;  %v5373_v27 = vpop.permute.xlu1 %2806 }
0x1a49   :  { %6274 = vst [vmem:[#allocation172_spill] sm:$0xff] %v5373_v27 }
0x1a4b   :  { %v5375_v10 = vpop.permute.xlu0 %2808 }
0x1a4c   :  { %6275 = vst [vmem:[#allocation173_spill] sm:$0xff] %v5375_v10  ;;  %v2829_v7 = vpop.permute.xlu1 %2828 }
0x1a4d   :  { %v2836_v23 = vmul.f32 %v2829_v7, %v4436_v44 }
0x1a4f   :  { %v2831_v42 = vpop.permute.xlu0 %2830  ;;  %2842 = vrot.lane.b32.xlu1 %v2836_v23, %s4224_s23 }
0x1a50   :  { %v2832_v8 = vsel %vm2793_vm8, %v2829_v7, %v2831_v42  ;;  %v2838_v51 = vmul.f32 %v2831_v42, %v4498_v26  ;;  %vm836_vm8 = vcmask 908288  }
0x1a51   :  { %v2837_v12 = vmul.f32 %v2832_v8, %v4443_v48 }
0x1a53   :  { %2846 = vrot.lane.b32.xlu1 %v2838_v51, %s4224_s23  ;;  %2844 = vrot.lane.b32.xlu0 %v2837_v12, %s4224_s23  ;;  %v2892_v12 = vld [vmem:[#allocation9 + $0x43] ss:$8 sm:$0x3] }
0x1a57   :  { %2867 = vrot.lane.b32.xlu1 %v2864_v34, %s4200_s7  ;;  %2865 = vrot.lane.b32.xlu0 %v2860_v57, %s4200_s7  ;;  %v2897_v34 = vrot.slane %v2892_v12, %v4318_v4 }
0x1ac1   :  { %v5385_v10 = vpop.permute.xlu1 %2842 }
0x1ac2   :  { %6276 = vst [vmem:[#allocation174_spill] sm:$0xff] %v5385_v10 }
0x1ac5   :  { %v5387_v23 = vpop.permute.xlu1 %2846  ;;  %v5389_v7 = vpop.permute.xlu0 %2844 }
0x1ac6   :  { %6277 = vst [vmem:[#allocation175_spill] sm:$0xff] %v5387_v23  ;;  %6278 = vst [vmem:[#allocation176_spill] sm:$0xff] %v5389_v7  ;;  %v2901_v23 = vrot.slane %v2892_v12, %v4315_v3 }
0x1ac9   :  { %v2868_v42 = vpop.permute.xlu1 %2867  ;;  %v2866_v24 = vpop.permute.xlu0 %2865 }
0x1aca   :  { %v2869_v8 = vsel %vm1824_vm9, %v2866_v24, %v2868_v42  ;;  %v2873_v51 = vmul.f32 %v2866_v24, %v4510_v9  ;;  %v2875_v57 = vmul.f32 %v2868_v42, %v4570_v59 }
0x1acb   :  { %v2874_v63 = vmul.f32 %v2869_v8, %v4552_v54 }
0x1acc   :  { %2879 = vrot.lane.b32.xlu0 %v2873_v51, %s4199_s6 }
0x1acd   :  { %2881 = vrot.lane.b32.xlu1 %v2874_v63, %s4199_s6 }
0x1ad0   :  { %2883 = vrot.lane.b32.xlu0 %v2875_v57, %s4199_s6  ;;  %v2929_v57 = vld [vmem:[#allocation7 + $0x44] ss:$8 sm:$0x3] }
0x1ad1   :  { %2902 = vrot.lane.b32.xlu1 %v2897_v34, %s4200_s7 }
0x1ad4   :  { %2904 = vrot.lane.b32.xlu0 %v2901_v23, %s4200_s7  ;;  %v2938_v23 = vrot.slane %v2929_v57, %v4315_v3  ;;  %s4228_s7 = smov 46  }
0x1b3e   :  { %v5402_v24 = vpop.permute.xlu0 %2879 }
0x1b3f   :  { %6279 = vst [vmem:[#allocation177_spill] sm:$0xff] %v5402_v24  ;;  %v5404_v10 = vpop.permute.xlu1 %2881 }
0x1b40   :  { %6280 = vst [vmem:[#allocation178_spill] sm:$0xff] %v5404_v10  ;;  %v2968_v10 = vld [vmem:[#allocation9 + $0x44] ss:$8 sm:$0x3] }
0x1b42   :  { %v5406_v8 = vpop.permute.xlu0 %2883 }
0x1b43   :  { %6281 = vst [vmem:[#allocation179_spill] sm:$0xff] %v5406_v8  ;;  %v2903_v51 = vpop.permute.xlu1 %2902  ;;  %v2934_v8 = vrot.slane %v2929_v57, %v4318_v4 }
0x1b44   :  { %v2910_v63 = vmul.f32 %v2903_v51, %v4436_v44 }
0x1b46   :  { %v2905_v7 = vpop.permute.xlu0 %2904  ;;  %2916 = vrot.lane.b32.xlu1 %v2910_v63, %s4199_s6 }
0x1b47   :  { %v2906_v42 = vsel %vm1824_vm9, %v2903_v51, %v2905_v7  ;;  %v2912_v12 = vmul.f32 %v2905_v7, %v4498_v26 }
0x1b48   :  { %v2911_v34 = vmul.f32 %v2906_v42, %v4443_v48 }
0x1b4a   :  { %2920 = vrot.lane.b32.xlu1 %v2912_v12, %s4199_s6  ;;  %2918 = vrot.lane.b32.xlu0 %v2911_v34, %s4199_s6  ;;  %s4227_s6 = smov 82  }
0x1b4e   :  { %2941 = vrot.lane.b32.xlu1 %v2938_v23, %s4225_s4  ;;  %2939 = vrot.lane.b32.xlu0 %v2934_v8, %s4225_s4  ;;  %v2973_v8 = vrot.slane %v2968_v10, %v4318_v4  ;;  %v2977_v23 = vrot.slane %v2968_v10, %v4315_v3 }
0x1bb8   :  { %v5417_v24 = vpop.permute.xlu1 %2916 }
0x1bb9   :  { %6282 = vst [vmem:[#allocation180_spill] sm:$0xff] %v5417_v24 }
0x1bbc   :  { %v5419_v63 = vpop.permute.xlu1 %2920  ;;  %v5421_v51 = vpop.permute.xlu0 %2918 }
0x1bbd   :  { %6283 = vst [vmem:[#allocation181_spill] sm:$0xff] %v5419_v63  ;;  %6284 = vst [vmem:[#allocation182_spill] sm:$0xff] %v5421_v51 }
0x1bc0   :  { %v2942_v7 = vpop.permute.xlu1 %2941  ;;  %v2940_v42 = vpop.permute.xlu0 %2939 }
0x1bc1   :  { %v2944_v12 = vsel %vm2943_vm10, %v2940_v42, %v2942_v7  ;;  %v2948_v34 = vmul.f32 %v2940_v42, %v4510_v9  ;;  %v2950_v57 = vmul.f32 %v2942_v7, %v4570_v59 }
0x1bc2   :  { %v2949_v27 = vmul.f32 %v2944_v12, %v4552_v54 }
0x1bc3   :  { %2954 = vrot.lane.b32.xlu0 %v2948_v34, %s4226_s5 }
0x1bc4   :  { %2956 = vrot.lane.b32.xlu1 %v2949_v27, %s4226_s5 }
0x1bc7   :  { %2958 = vrot.lane.b32.xlu0 %v2950_v57, %s4226_s5  ;;  %v3005_v57 = vld [vmem:[#allocation7 + $0x45] ss:$8 sm:$0x3] }
0x1bc8   :  { %2978 = vrot.lane.b32.xlu1 %v2973_v8, %s4225_s4  ;;  %v3014_v8 = vrot.slane %v3005_v57, %v4315_v3 }
0x1bcb   :  { %2980 = vrot.lane.b32.xlu0 %v2977_v23, %s4225_s4  ;;  %v3010_v23 = vrot.slane %v3005_v57, %v4318_v4 }
0x1c35   :  { %v5429_v63 = vpop.permute.xlu0 %2954 }
0x1c36   :  { %6285 = vst [vmem:[#allocation183_spill] sm:$0xff] %v5429_v63  ;;  %v5431_v24 = vpop.permute.xlu1 %2956 }
0x1c37   :  { %6286 = vst [vmem:[#allocation184_spill] sm:$0xff] %v5431_v24 }
0x1c39   :  { %v5433_v42 = vpop.permute.xlu0 %2958 }
0x1c3a   :  { %6287 = vst [vmem:[#allocation185_spill] sm:$0xff] %v5433_v42  ;;  %v2979_v51 = vpop.permute.xlu1 %2978 }
0x1c3b   :  { %v2986_v12 = vmul.f32 %v2979_v51, %v4436_v44 }
0x1c3d   :  { %v2981_v34 = vpop.permute.xlu0 %2980  ;;  %2992 = vrot.lane.b32.xlu1 %v2986_v12, %s4226_s5 }
0x1c3e   :  { %v2982_v27 = vsel %vm2943_vm10, %v2979_v51, %v2981_v34  ;;  %v2988_v7 = vmul.f32 %v2981_v34, %v4498_v26  ;;  %vm912_vm10 = vcmask 900096  }
0x1c3f   :  { %v2987_v10 = vmul.f32 %v2982_v27, %v4443_v48 }
0x1c41   :  { %2996 = vrot.lane.b32.xlu1 %v2988_v7, %s4226_s5  ;;  %2994 = vrot.lane.b32.xlu0 %v2987_v10, %s4226_s5  ;;  %v3044_v10 = vld [vmem:[#allocation9 + $0x45] ss:$8 sm:$0x3] }
0x1c42   :  { %v3049_v57 = vrot.slane %v3044_v10, %v4318_v4 }
0x1c45   :  { %3017 = vrot.lane.b32.xlu1 %v3014_v8, %s4227_s6  ;;  %3015 = vrot.lane.b32.xlu0 %v3010_v23, %s4227_s6  ;;  %v3053_v23 = vrot.slane %v3044_v10, %v4315_v3 }
0x1caf   :  { %v5441_v42 = vpop.permute.xlu1 %2992 }
0x1cb0   :  { %6288 = vst [vmem:[#allocation186_spill] sm:$0xff] %v5441_v42 }
0x1cb3   :  { %v5443_v63 = vpop.permute.xlu1 %2996  ;;  %v5445_v12 = vpop.permute.xlu0 %2994 }
0x1cb4   :  { %6289 = vst [vmem:[#allocation187_spill] sm:$0xff] %v5443_v63  ;;  %6290 = vst [vmem:[#allocation188_spill] sm:$0xff] %v5445_v12 }
0x1cb7   :  { %v3018_v51 = vpop.permute.xlu1 %3017  ;;  %v3016_v34 = vpop.permute.xlu0 %3015 }
0x1cb8   :  { %v3020_v27 = vsel %vm3019_vm12, %v3016_v34, %v3018_v51  ;;  %v3024_v7 = vmul.f32 %v3016_v34, %v4510_v9  ;;  %v3026_v8 = vmul.f32 %v3018_v51, %v4570_v59 }
0x1cb9   :  { %v3025_v24 = vmul.f32 %v3020_v27, %v4552_v54 }
0x1cba   :  { %3030 = vrot.lane.b32.xlu0 %v3024_v7, %s4228_s7 }
0x1cbb   :  { %3032 = vrot.lane.b32.xlu1 %v3025_v24, %s4228_s7 }
0x1cbe   :  { %3034 = vrot.lane.b32.xlu0 %v3026_v8, %s4228_s7  ;;  %v3081_v8 = vld [vmem:[#allocation7 + $0x46] ss:$8 sm:$0x3] }
0x1cbf   :  { %3054 = vrot.lane.b32.xlu1 %v3049_v57, %s4227_s6  ;;  %v3090_v57 = vrot.slane %v3081_v8, %v4315_v3 }
0x1cc2   :  { %3056 = vrot.lane.b32.xlu0 %v3053_v23, %s4227_s6  ;;  %v3086_v23 = vrot.slane %v3081_v8, %v4318_v4 }
0x1d2c   :  { %v5453_v63 = vpop.permute.xlu0 %3030 }
0x1d2d   :  { %6291 = vst [vmem:[#allocation189_spill] sm:$0xff] %v5453_v63  ;;  %v5455_v42 = vpop.permute.xlu1 %3032 }
0x1d2e   :  { %6292 = vst [vmem:[#allocation190_spill] sm:$0xff] %v5455_v42 }
0x1d30   :  { %v5457_v34 = vpop.permute.xlu0 %3034 }
0x1d31   :  { %6293 = vst [vmem:[#allocation191_spill] sm:$0xff] %v5457_v34  ;;  %v3055_v12 = vpop.permute.xlu1 %3054 }
0x1d32   :  { %v3062_v27 = vmul.f32 %v3055_v12, %v4436_v44 }
0x1d34   :  { %v3057_v7 = vpop.permute.xlu0 %3056  ;;  %3068 = vrot.lane.b32.xlu1 %v3062_v27, %s4228_s7 }
0x1d35   :  { %v3058_v24 = vsel %vm3019_vm12, %v3055_v12, %v3057_v7  ;;  %v3064_v51 = vmul.f32 %v3057_v7, %v4498_v26  ;;  %vm3188_vm12 = vcmask 359424  }
0x1d36   :  { %v3063_v10 = vmul.f32 %v3058_v24, %v4443_v48 }
0x1d38   :  { %3072 = vrot.lane.b32.xlu1 %v3064_v51, %s4228_s7  ;;  %3070 = vrot.lane.b32.xlu0 %v3063_v10, %s4228_s7  ;;  %v3120_v10 = vld [vmem:[#allocation9 + $0x46] ss:$8 sm:$0x3] }
0x1d39   :  { %v3125_v8 = vrot.slane %v3120_v10, %v4318_v4 }
0x1d3c   :  { %3093 = vrot.lane.b32.xlu1 %v3090_v57, %s4229_s8  ;;  %3091 = vrot.lane.b32.xlu0 %v3086_v23, %s4229_s8  ;;  %v3129_v23 = vrot.slane %v3120_v10, %v4315_v3 }
0x1da6   :  { %v5465_v34 = vpop.permute.xlu1 %3068 }
0x1da7   :  { %6294 = vst [vmem:[#allocation192_spill] sm:$0xff] %v5465_v34 }
0x1daa   :  { %v5467_v63 = vpop.permute.xlu1 %3072  ;;  %v5469_v27 = vpop.permute.xlu0 %3070 }
0x1dab   :  { %6295 = vst [vmem:[#allocation193_spill] sm:$0xff] %v5467_v63  ;;  %6296 = vst [vmem:[#allocation194_spill] sm:$0xff] %v5469_v27 }
0x1dae   :  { %v3094_v12 = vpop.permute.xlu1 %3093  ;;  %v3092_v7 = vpop.permute.xlu0 %3091 }
0x1daf   :  { %v3096_v24 = vsel %vm3095_vm13, %v3092_v7, %v3094_v12  ;;  %v3100_v51 = vmul.f32 %v3092_v7, %v4510_v9  ;;  %v3102_v57 = vmul.f32 %v3094_v12, %v4570_v59 }
0x1db0   :  { %v3101_v42 = vmul.f32 %v3096_v24, %v4552_v54 }
0x1db1   :  { %3106 = vrot.lane.b32.xlu0 %v3100_v51, %s4230_s1 }
0x1db2   :  { %3108 = vrot.lane.b32.xlu1 %v3101_v42, %s4230_s1 }
0x1db5   :  { %3110 = vrot.lane.b32.xlu0 %v3102_v57, %s4230_s1  ;;  %v3157_v57 = vld [vmem:[#allocation7 + $0x47] ss:$8 sm:$0x3] }
0x1db6   :  { %3130 = vrot.lane.b32.xlu1 %v3125_v8, %s4229_s8  ;;  %v3166_v8 = vrot.slane %v3157_v57, %v4315_v3 }
0x1db9   :  { %3132 = vrot.lane.b32.xlu0 %v3129_v23, %s4229_s8  ;;  %v3162_v23 = vrot.slane %v3157_v57, %v4318_v4 }
0x1e23   :  { %v5477_v63 = vpop.permute.xlu0 %3106 }
0x1e24   :  { %6297 = vst [vmem:[#allocation195_spill] sm:$0xff] %v5477_v63  ;;  %v5479_v34 = vpop.permute.xlu1 %3108 }
0x1e25   :  { %6298 = vst [vmem:[#allocation196_spill] sm:$0xff] %v5479_v34 }
0x1e27   :  { %v5481_v7 = vpop.permute.xlu0 %3110 }
0x1e28   :  { %6299 = vst [vmem:[#allocation197_spill] sm:$0xff] %v5481_v7  ;;  %v3131_v27 = vpop.permute.xlu1 %3130 }
0x1e29   :  { %v3138_v24 = vmul.f32 %v3131_v27, %v4436_v44 }
0x1e2b   :  { %v3133_v51 = vpop.permute.xlu0 %3132  ;;  %3144 = vrot.lane.b32.xlu1 %v3138_v24, %s4230_s1 }
0x1e2c   :  { %v3134_v42 = vsel %vm3095_vm13, %v3131_v27, %v3133_v51  ;;  %v3140_v12 = vmul.f32 %v3133_v51, %v4498_v26  ;;  %vm988_vm13 = vcmask 891904  }
0x1e2d   :  { %v3139_v10 = vmul.f32 %v3134_v42, %v4443_v48 }
0x1e2f   :  { %3148 = vrot.lane.b32.xlu1 %v3140_v12, %s4230_s1  ;;  %3146 = vrot.lane.b32.xlu0 %v3139_v10, %s4230_s1  ;;  %v3196_v10 = vld [vmem:[#allocation9 + $0x47] ss:$8 sm:$0x3] }
0x1e30   :  { %v3201_v57 = vrot.slane %v3196_v10, %v4318_v4 }
0x1e33   :  { %3169 = vrot.lane.b32.xlu1 %v3166_v8, %s4231_s9  ;;  %3167 = vrot.lane.b32.xlu0 %v3162_v23, %s4231_s9  ;;  %v3205_v23 = vrot.slane %v3196_v10, %v4315_v3  ;;  %v305_v10 = vsel %vm304_vm14, %v4669_v37, %v4695_v47  ;;  %v381_v37 = vsel %vm380_vm15, %v4673_v20, %v4699_v60 }
0x1e9d   :  { %v5489_v7 = vpop.permute.xlu1 %3144 }
0x1e9e   :  { %6300 = vst [vmem:[#allocation198_spill] sm:$0xff] %v5489_v7 }
0x1ea1   :  { %v5491_v63 = vpop.permute.xlu1 %3148  ;;  %v5493_v24 = vpop.permute.xlu0 %3146 }
0x1ea2   :  { %6301 = vst [vmem:[#allocation199_spill] sm:$0xff] %v5491_v63  ;;  %6302 = vst [vmem:[#allocation200_spill] sm:$0xff] %v5493_v24  ;;  %v240_v63 = vld [vmem:[#allocation7] ss:$8 sm:$0x3] }
0x1ea3   :  { %v245_v7 = vrot.slane %v240_v63, %v4318_v4 }
0x1ea5   :  { %v3170_v27 = vpop.permute.xlu1 %3169  ;;  %v3168_v51 = vpop.permute.xlu0 %3167  ;;  %v252_v24 = vmul.f32 %v245_v7, %v4510_v9  ;;  %v342_v7 = vsel %vm304_vm14, %v4633_v13, %v4637_v15  ;;  %v419_v13 = vsel %vm380_vm15, %v4641_v18, %v4667_v43 }
0x1ea6   :  { %v3172_v42 = vsel %vm3171_vm5, %v3168_v51, %v3170_v27  ;;  %v3176_v12 = vmul.f32 %v3168_v51, %v4510_v9  ;;  %v3178_v8 = vmul.f32 %v3170_v27, %v4570_v59  ;;  %v256_v51 = vld [vmem:[#allocation9] ss:$8 sm:$0x3] }
0x1ea7   :  { %v3177_v34 = vmul.f32 %v3172_v42, %v4552_v54  ;;  %v249_v42 = vrot.slane %v240_v63, %v4315_v3  ;;  %v306_v63 = vsel %vm304_vm14, %v4695_v47, %v4701_v62 }
0x1ea8   :  { %3182 = vrot.lane.b32.xlu0 %v3176_v12, %s4232_s10  ;;  %v261_v12 = vrot.slane %v256_v51, %v4318_v4 }
0x1ea9   :  { %3184 = vrot.lane.b32.xlu1 %v3177_v34, %s4232_s10  ;;  %v265_v34 = vrot.slane %v256_v51, %v4315_v3  ;;  %v253_v27 = vmul.f32 %v249_v42, %v4552_v54  ;;  %v343_v51 = vsel %vm304_vm14, %v4637_v15, %v4663_v28  ;;  %vm1064_vm14 = vcmask 883712  }
0x1eac   :  { %3186 = vrot.lane.b32.xlu0 %v3178_v8, %s4232_s10  ;;  %v268_v8 = vmul.f32 %v261_v12, %v4436_v44 }
0x1ead   :  { %3206 = vrot.lane.b32.xlu1 %v3201_v57, %s4231_s9  ;;  %v269_v57 = vmul.f32 %v265_v34, %v4443_v48 }
0x1eaf   :  { %v271_v59 = vadd.f32 %v269_v57, %v253_v27 }
0x1eb0   :  { %3208 = vrot.lane.b32.xlu0 %v3205_v23, %s4231_s9  ;;  %v270_v23 = vadd.f32 %v268_v8, %v252_v24  ;;  %v382_v24 = vsel %vm380_vm15, %v4699_v60, %v4705_v53  ;;  %v494_v60 = vsel %vm456_vm1, %v4639_v16, %v4645_v19  ;;  %v571_v16 = vsel %vm532_vm2, %v4649_v21, %v4675_v46 }
0x1eb1   :  { %v310_v26 = vadd.f32 %v306_v63, %v271_v59  ;;  %v418_v59 = vsel %vm380_vm15, %v4635_v61, %v4641_v18  ;;  %v495_v61 = vsel %vm456_vm1, %v4645_v19, %v4671_v45  ;;  %v533_v18 = vsel %vm532_vm2, %v4681_v50, %v4707_v0 }
0x1eb2   :  { %v309_v4 = vadd.f32 %v305_v10, %v270_v23  ;;  %v609_v19 = vsel %vm608_vm4, %v4685_v52, %v4711_v2  ;;  %v610_v50 = vsel %vm608_vm4, %v4711_v2, %v4717_v38  ;;  %v686_v52 = vsel %vm684_vm6, %v4715_v35, %v4721_v14 }
0x1eb3   :  { %v347_v12 = vadd.f32 %v343_v51, %v310_v26  ;;  %v458_v26 = vsel %vm456_vm1, %v4703_v36, %v4709_v31  ;;  %v722_v2 = vsel %vm684_vm6, %v4651_v22, %v4657_v33  ;;  %v799_v22 = vsel %vm760_vm7, %v4661_v39, %v4687_v55 }
0x1eb4   :  { %v346_v42 = vadd.f32 %v342_v7, %v309_v4  ;;  %v457_v4 = vsel %vm456_vm1, %v4677_v40, %v4703_v36  ;;  %v534_v40 = vsel %vm532_vm2, %v4707_v0, %v4713_v1  ;;  %v570_v36 = vsel %vm532_vm2, %v4643_v11, %v4649_v21 }
0x1eb5   :  { %v386_v47 = vadd.f32 %v382_v24, %v347_v12  ;;  %v646_v0 = vsel %vm608_vm4, %v4647_v25, %v4653_v29  ;;  %v647_v11 = vsel %vm608_vm4, %v4653_v29, %v4679_v49  ;;  %v685_v21 = vsel %vm684_vm6, %v4689_v56, %v4715_v35  ;;  %v6304_v24 = vld [vmem:[#allocation18_spill] sm:$0xff] }
0x1eb6   :  { %v385_v34 = vadd.f32 %v381_v37, %v346_v42  ;;  %v723_v25 = vsel %vm684_vm6, %v4657_v33, %v4683_v41  ;;  %v761_v29 = vsel %vm760_vm7, %v4693_v58, %v4719_v5  ;;  %v762_v56 = vsel %vm760_vm7, %v4719_v5, %v4723_v17  ;;  %v6303_v42 = vld [vmem:[#allocation20_spill] sm:$0xff] }
0x1eb7   :  { %v423_v15 = vadd.f32 %v419_v13, %v386_v47  ;;  %v798_v35 = vsel %vm760_vm7, %v4655_v30, %v4661_v39  ;;  %v837_v33 = vsel %vm836_vm8, %v4697_v32, %v4725_v6  ;;  %v838_v58 = vsel %vm836_vm8, %v4725_v6, %v6303_v42  ;;  %v6305_v30 = vld [vmem:[#allocation17_spill] sm:$0xff]  ;;  %v6306_v47 = vld [vmem:[#allocation22_spill] sm:$0xff]  ;;  %v6308_v32 = vld [vmem:[#allocation19_spill] sm:$0xff] }
0x1eb8   :  { %v422_v62 = vadd.f32 %v418_v59, %v385_v34  ;;  %v874_v34 = vsel %vm836_vm8, %v6305_v30, %v6304_v24  ;;  %v6307_v59 = vld [vmem:[#allocation21_spill] sm:$0xff]  ;;  %v875_v13 = vsel %vm836_vm8, %v6304_v24, %v6308_v32  ;;  %vm1140_vm15 = vcmask 875520  }
0x1eb9   :  { %v462_v20 = vadd.f32 %v458_v26, %v423_v15  ;;  %v913_v39 = vsel %vm912_vm10, %v6307_v59, %v6306_v47  ;;  %v6310_v26 = vld [vmem:[#allocation26_spill] sm:$0xff]  ;;  %vm1292_vm1 = vcmask 785408   ;;  %vm1368_vm2 = vcmask 777216  }
0x1eba   :  { %v461_v28 = vadd.f32 %v457_v4, %v422_v62  ;;  %v6309_v62 = vld [vmem:[#allocation23_spill] sm:$0xff]  ;;  %vm1444_vm4 = vcmask 769024   ;;  %vm1520_vm6 = vcmask 760832   ;;  %vm1596_vm7 = vcmask 752640  }
0x1ebb   :  { %v499_v43 = vadd.f32 %v495_v61, %v462_v20  ;;  %v914_v4 = vsel %vm912_vm10, %v6306_v47, %v6309_v62  ;;  %v6328_v47 = vld [vmem:[#allocation39_spill] sm:$0xff]  ;;  %v6330_v62 = vld [vmem:[#allocation44_spill] sm:$0xff]  ;;  %vm1672_vm8 = vcmask 744448  }
0x1ebc   :  { %v498_v53 = vadd.f32 %v494_v60, %v461_v28  ;;  %v6311_v28 = vld [vmem:[#allocation24_spill] sm:$0xff] }
0x1ebd   :  { %v538_v8 = vadd.f32 %v534_v40, %v499_v43  ;;  %v950_v20 = vsel %vm912_vm10, %v6311_v28, %v6310_v26 }
0x1ebe   :  { %v537_v27 = vadd.f32 %v533_v18, %v498_v53  ;;  %v6312_v53 = vld [vmem:[#allocation25_spill] sm:$0xff] }
0x1ebf   :  { %v575_v45 = vadd.f32 %v571_v16, %v538_v8  ;;  %v951_v18 = vsel %vm912_vm10, %v6310_v26, %v6312_v53  ;;  %v6313_v8 = vld [vmem:[#allocation28_spill] sm:$0xff]  ;;  %v6332_v26 = vld [vmem:[#allocation43_spill] sm:$0xff]  ;;  %v6334_v53 = vld [vmem:[#allocation45_spill] sm:$0xff]  ;;  %vm1748_vm10 = vcmask 736256  }
0x1ec0   :  { %v574_v31 = vadd.f32 %v570_v36, %v537_v27  ;;  %v6314_v36 = vld [vmem:[#allocation27_spill] sm:$0xff]  ;;  %v1179_v28 = vsel %vm1140_vm15, %v6330_v62, %v6332_v26 }
0x1ec1   :  { %v614_v57 = vadd.f32 %v610_v50, %v575_v45  ;;  %v989_v16 = vsel %vm988_vm13, %v6314_v36, %v6313_v8  ;;  %v6315_v45 = vld [vmem:[#allocation29_spill] sm:$0xff] }
0x1ec2   :  { %v613_v10 = vadd.f32 %v609_v19, %v574_v31  ;;  %v990_v50 = vsel %vm988_vm13, %v6313_v8, %v6315_v45  ;;  %v6338_v45 = vld [vmem:[#allocation49_spill] sm:$0xff] }
0x1ec3   :  { %v651_v46 = vadd.f32 %v647_v11, %v614_v57  ;;  %v6316_v57 = vld [vmem:[#allocation32_spill] sm:$0xff] }
0x1ec4   :  { %v650_v1 = vadd.f32 %v646_v0, %v613_v10  ;;  %v6317_v0 = vld [vmem:[#allocation30_spill] sm:$0xff] }
0x1ec5   :  { %v690_v63 = vadd.f32 %v686_v52, %v651_v46  ;;  %v1026_v11 = vsel %vm988_vm13, %v6317_v0, %v6316_v57  ;;  %v6318_v46 = vld [vmem:[#allocation31_spill] sm:$0xff]  ;;  %v6339_v0 = vld [vmem:[#allocation52_spill] sm:$0xff] }
0x1ec6   :  { %v689_v23 = vadd.f32 %v685_v21, %v650_v1  ;;  %v1027_v52 = vsel %vm988_vm13, %v6316_v57, %v6318_v46  ;;  %vm1900_vm13 = vcmask 646144  }
0x1ec7   :  { %v727_v49 = vadd.f32 %v723_v25, %v690_v63  ;;  %v6319_v63 = vld [vmem:[#allocation15_spill] sm:$0xff] }
0x1ec8   :  { %v726_v38 = vadd.f32 %v722_v2, %v689_v23  ;;  %v3233_v25 = vld [vmem:[#allocation7 + $0x50] ss:$8 sm:$0x3] }
0x1ec9   :  { %v766_v51 = vadd.f32 %v762_v56, %v727_v49  ;;  %v6320_v56 = vld [vmem:[#allocation34_spill] sm:$0xff] }
0x1eca   :  { %v765_v7 = vadd.f32 %v761_v29, %v726_v38 }
0x1ecb   :  { %v803_v41 = vadd.f32 %v799_v22, %v766_v51 }
0x1ecc   :  { %v802_v14 = vadd.f32 %v798_v35, %v765_v7  ;;  %v6321_v7 = vld [vmem:[#allocation33_spill] sm:$0xff]  ;;  %v6322_v35 = vld [vmem:[#allocation35_spill] sm:$0xff] }
0x1ecd   :  { %v842_v5 = vadd.f32 %v838_v58, %v803_v41  ;;  %v1065_v51 = vsel %vm1064_vm14, %v6321_v7, %v6320_v56  ;;  %v1066_v22 = vsel %vm1064_vm14, %v6320_v56, %v6322_v35  ;;  %v6323_v41 = vld [vmem:[#allocation14_spill] sm:$0xff]  ;;  %v6346_v35 = vld [vmem:[#allocation57_spill] sm:$0xff] }
0x1ece   :  { %v841_v37 = vadd.f32 %v837_v33, %v802_v14  ;;  %v3242_v33 = vrot.slane %v3233_v25, %v4315_v3  ;;  %v3238_v42 = vrot.slane %v3233_v25, %v6323_v41  ;;  %v6324_v58 = vld [vmem:[#allocation38_spill] sm:$0xff] }
0x1ecf   :  { %v879_v15 = vadd.f32 %v875_v13, %v842_v5  ;;  %v6343_v25 = vld [vmem:[#allocation54_spill] sm:$0xff] }
0x1ed0   :  { %v878_v6 = vadd.f32 %v874_v34, %v841_v37  ;;  %v6325_v37 = vld [vmem:[#allocation36_spill] sm:$0xff] }
0x1ed1   :  { %v918_v27 = vadd.f32 %v914_v4, %v879_v15  ;;  %v1102_v5 = vsel %vm1064_vm14, %v6325_v37, %v6324_v58  ;;  %v6327_v34 = vld [vmem:[#allocation40_spill] sm:$0xff]  ;;  %v6331_v4 = vld [vmem:[#allocation42_spill] sm:$0xff] }
0x1ed2   :  { %v917_v61 = vadd.f32 %v913_v39, %v878_v6  ;;  %v1141_v59 = vsel %vm1140_vm15, %v6328_v47, %v6327_v34  ;;  %v6329_v39 = vld [vmem:[#allocation41_spill] sm:$0xff]  ;;  %v1178_v15 = vsel %vm1140_vm15, %v6331_v4, %v6330_v62  ;;  %v6348_v37 = vld [vmem:[#allocation62_spill] sm:$0xff]  ;;  %v6351_v47 = vld [vmem:[#allocation64_spill] sm:$0xff] }
0x1ed3   :  { %v955_v10 = vadd.f32 %v951_v18, %v918_v27  ;;  %v1142_v32 = vsel %vm1140_vm15, %v6327_v34, %v6329_v39  ;;  %v6354_v4 = vld [vmem:[#allocation68_spill] sm:$0xff]  ;;  %vm2127_vm15 = vcmask 621568  }
0x1ed4   :  { %v954_v19 = vadd.f32 %v950_v20, %v917_v61  ;;  %v6333_v61 = vld [vmem:[#allocation46_spill] sm:$0xff] }
0x1ed5   :  { %v994_v38 = vadd.f32 %v990_v50, %v955_v10 }
0x1ed6   :  { %v993_v21 = vadd.f32 %v989_v16, %v954_v19  ;;  %v6336_v16 = vld [vmem:[#allocation50_spill] sm:$0xff] }
0x1ed7   :  { %v1031_v14 = vadd.f32 %v1027_v52, %v994_v38 }
0x1ed8   :  { %v1030_v49 = vadd.f32 %v1026_v11, %v993_v21  ;;  %v6340_v11 = vld [vmem:[#allocation51_spill] sm:$0xff]  ;;  %v6341_v21 = vld [vmem:[#allocation53_spill] sm:$0xff] }
0x1ed9   :  { %v1070_v30 = vadd.f32 %v1066_v22, %v1031_v14  ;;  %v1294_v46 = vsel %vm1292_vm1, %v6339_v0, %v6341_v21  ;;  %v6347_v14 = vld [vmem:[#allocation59_spill] sm:$0xff] }
0x1eda   :  { %v1069_v24 = vadd.f32 %v1065_v51, %v1030_v49  ;;  %v6345_v51 = vld [vmem:[#allocation58_spill] sm:$0xff] }
0x1edb   :  { %v1369_v22 = vsel %vm1368_vm2, %v6346_v35, %v6345_v51  ;;  %v6369_v35 = vld [vmem:[#allocation82_spill] sm:$0xff] }
0x1edc   :  { %v1106_v13 = vadd.f32 %v1102_v5, %v1069_v24  ;;  %v6349_v5 = vld [vmem:[#allocation60_spill] sm:$0xff] }
0x1ede   :  { %v1145_v20 = vadd.f32 %v1141_v59, %v1106_v13  ;;  %v6352_v59 = vld [vmem:[#allocation63_spill] sm:$0xff] }
0x1edf   :  { %v1445_v39 = vsel %vm1444_vm4, %v6352_v59, %v6351_v47  ;;  %v6375_v59 = vld [vmem:[#allocation88_spill] sm:$0xff] }
0x1ee0   :  { %v1182_v8 = vadd.f32 %v1178_v15, %v1145_v20  ;;  %v6355_v15 = vld [vmem:[#allocation66_spill] sm:$0xff] }
0x1ee1   :  { %v1482_v26 = vsel %vm1444_vm4, %v6355_v15, %v6354_v4  ;;  %v6378_v15 = vld [vmem:[#allocation92_spill] sm:$0xff] }
0x1f1a   :  { %v3183_v17 = vpop.permute.xlu0 %3182 }
0x1f1b   :  { %v3185_v12 = vpop.permute.xlu1 %3184 }
0x1f1c   :  { %v5578_v55 = vsel %vm3188_vm12, %v3183_v17, %v3185_v12  ;;  %v6326_v17 = vld [vmem:[#allocation37_spill] sm:$0xff] }
0x1f1e   :  { %v3187_v60 = vpop.permute.xlu0 %3186 }
0x1f1f   :  { %v5592_v43 = vsel %vm3188_vm12, %v3185_v12, %v3187_v60  ;;  %v3207_v40 = vpop.permute.xlu1 %3206  ;;  %v1103_v12 = vsel %vm1064_vm14, %v6324_v58, %v6326_v17  ;;  %v1406_v17 = vsel %vm1368_vm2, %v6349_v5, %v6348_v37  ;;  %v6372_v5 = vld [vmem:[#allocation86_spill] sm:$0xff]  ;;  %vm1976_vm14 = vcmask 637952  }
0x1f20   :  { %v3214_v31 = vmul.f32 %v3207_v40, %v4436_v44  ;;  %v1107_v6 = vadd.f32 %v1103_v12, %v1070_v30  ;;  %v6350_v12 = vld [vmem:[#allocation61_spill] sm:$0xff] }
0x1f21   :  { %v1407_v24 = vsel %vm1368_vm2, %v6348_v37, %v6350_v12 }
0x1f22   :  { %v3209_v1 = vpop.permute.xlu0 %3208  ;;  %3220 = vrot.lane.b32.xlu1 %v3214_v31, %s4232_s10  ;;  %v1146_v60 = vadd.f32 %v1142_v32, %v1107_v6  ;;  %v6337_v31 = vld [vmem:[#allocation48_spill] sm:$0xff]  ;;  %v6353_v32 = vld [vmem:[#allocation65_spill] sm:$0xff] }
0x1f23   :  { %v3210_v23 = vsel %vm3171_vm5, %v3207_v40, %v3209_v1  ;;  %v3216_v2 = vmul.f32 %v3209_v1, %v6319_v63  ;;  %vm1216_vm5 = vcmask 867328   ;;  %v6335_v40 = vld [vmem:[#allocation47_spill] sm:$0xff]  ;;  %v1293_v1 = vsel %vm1292_vm1, %v6340_v11, %v6339_v0  ;;  %v6363_v11 = vld [vmem:[#allocation76_spill] sm:$0xff] }
0x1f24   :  { %v3215_v29 = vmul.f32 %v3210_v23, %v4443_v48  ;;  %v1217_v18 = vsel %vm1216_vm5, %v6334_v53, %v6333_v61  ;;  %v1218_v27 = vsel %vm1216_vm5, %v6333_v61, %v6335_v40  ;;  %v1183_v36 = vadd.f32 %v1179_v28, %v1146_v60  ;;  %v6356_v28 = vld [vmem:[#allocation67_spill] sm:$0xff]  ;;  %v6357_v53 = vld [vmem:[#allocation70_spill] sm:$0xff] }
0x1f25   :  { %v1254_v19 = vsel %vm1216_vm5, %v6337_v31, %v6336_v16  ;;  %v1255_v50 = vsel %vm1216_vm5, %v6336_v16, %v6338_v45  ;;  %v1221_v10 = vadd.f32 %v1217_v18, %v1182_v8  ;;  %v1446_v13 = vsel %vm1444_vm4, %v6351_v47, %v6353_v32  ;;  %v6358_v18 = vld [vmem:[#allocation69_spill] sm:$0xff]  ;;  %v6360_v31 = vld [vmem:[#allocation74_spill] sm:$0xff] }
0x1f26   :  { %3224 = vrot.lane.b32.xlu1 %v3216_v2, %s4232_s10  ;;  %3222 = vrot.lane.b32.xlu0 %v3215_v29, %s4232_s10  ;;  %v1222_v57 = vadd.f32 %v1218_v27, %v1183_v36  ;;  %v6342_v2 = vld [vmem:[#allocation56_spill] sm:$0xff]  ;;  %v6344_v29 = vld [vmem:[#allocation55_spill] sm:$0xff]  ;;  %v1483_v20 = vsel %vm1444_vm4, %v6354_v4, %v6356_v28  ;;  %v1521_v40 = vsel %vm1520_vm6, %v6358_v18, %v6357_v53  ;;  %v6381_v18 = vld [vmem:[#allocation94_spill] sm:$0xff]  ;;  %vm2203_vm5 = vcmask 613376  }
0x1f27   :  { %v1258_v52 = vadd.f32 %v1254_v19, %v1221_v10  ;;  %v1330_v38 = vsel %vm1292_vm1, %v6343_v25, %v6342_v2  ;;  %v1331_v49 = vsel %vm1292_vm1, %v6342_v2, %v6344_v29  ;;  %v6359_v27 = vld [vmem:[#allocation71_spill] sm:$0xff]  ;;  %v6361_v19 = vld [vmem:[#allocation72_spill] sm:$0xff]  ;;  %vm2430_vm4 = vcmask 515072  }
0x1f28   :  { %v1259_v23 = vadd.f32 %v1255_v50, %v1222_v57  ;;  %v1522_v8 = vsel %vm1520_vm6, %v6357_v53, %v6359_v27  ;;  %v1558_v45 = vsel %vm1520_vm6, %v6361_v19, %v6360_v31  ;;  %v6362_v50 = vld [vmem:[#allocation73_spill] sm:$0xff]  ;;  %v6366_v25 = vld [vmem:[#allocation80_spill] sm:$0xff]  ;;  %v6384_v19 = vld [vmem:[#allocation98_spill] sm:$0xff] }
0x1f29   :  { %v1297_v56 = vadd.f32 %v1293_v1, %v1258_v52  ;;  %v1559_v10 = vsel %vm1520_vm6, %v6360_v31, %v6362_v50  ;;  %v6364_v1 = vld [vmem:[#allocation75_spill] sm:$0xff]  ;;  %vm2506_vm6 = vcmask 506880  }
0x1f2a   :  { %3245 = vrot.lane.b32.xlu1 %v3242_v33, %s4233_s11  ;;  %3243 = vrot.lane.b32.xlu0 %v3238_v42, %s4233_s11  ;;  %v1298_v7 = vadd.f32 %v1294_v46, %v1259_v23  ;;  %v1370_v33 = vsel %vm1368_vm2, %v6345_v51, %v6347_v14  ;;  %v1597_v21 = vsel %vm1596_vm7, %v6364_v1, %v6363_v11  ;;  %v6365_v46 = vld [vmem:[#allocation77_spill] sm:$0xff]  ;;  %v6387_v1 = vld [vmem:[#allocation100_spill] sm:$0xff]  ;;  %vm2279_vm2 = vcmask 605184  }
0x1f2b   :  { %v1334_v42 = vadd.f32 %v1330_v38, %v1297_v56  ;;  %v1598_v52 = vsel %vm1596_vm7, %v6363_v11, %v6365_v46  ;;  %v6367_v38 = vld [vmem:[#allocation78_spill] sm:$0xff] }
0x1f2c   :  { %v1335_v58 = vadd.f32 %v1331_v49, %v1298_v7  ;;  %v1634_v29 = vsel %vm1596_vm7, %v6367_v38, %v6366_v25  ;;  %v6368_v49 = vld [vmem:[#allocation79_spill] sm:$0xff]  ;;  %v6390_v38 = vld [vmem:[#allocation104_spill] sm:$0xff] }
0x1f2d   :  { %v1373_v30 = vadd.f32 %v1369_v22, %v1334_v42  ;;  %v1635_v56 = vsel %vm1596_vm7, %v6366_v25, %v6368_v49  ;;  %v6370_v22 = vld [vmem:[#allocation81_spill] sm:$0xff]  ;;  %vm2658_vm7 = vcmask 490496  }
0x1f2e   :  { %v1374_v34 = vadd.f32 %v1370_v33, %v1335_v58  ;;  %v1673_v14 = vsel %vm1672_vm8, %v6370_v22, %v6369_v35  ;;  %v6371_v33 = vld [vmem:[#allocation83_spill] sm:$0xff]  ;;  %v6393_v22 = vld [vmem:[#allocation106_spill] sm:$0xff] }
0x1f2f   :  { %v1410_v6 = vadd.f32 %v1406_v17, %v1373_v30  ;;  %v1674_v42 = vsel %vm1672_vm8, %v6369_v35, %v6371_v33  ;;  %v6373_v17 = vld [vmem:[#allocation84_spill] sm:$0xff] }
0x1f30   :  { %v1411_v62 = vadd.f32 %v1407_v24, %v1374_v34  ;;  %v1710_v12 = vsel %vm1672_vm8, %v6373_v17, %v6372_v5  ;;  %v6374_v24 = vld [vmem:[#allocation85_spill] sm:$0xff]  ;;  %v6396_v17 = vld [vmem:[#allocation110_spill] sm:$0xff] }
0x1f31   :  { %v1449_v60 = vadd.f32 %v1445_v39, %v1410_v6  ;;  %v1711_v30 = vsel %vm1672_vm8, %v6372_v5, %v6374_v24  ;;  %v6376_v39 = vld [vmem:[#allocation87_spill] sm:$0xff]  ;;  %vm2734_vm8 = vcmask 482304  }
0x1f32   :  { %v1450_v61 = vadd.f32 %v1446_v13, %v1411_v62  ;;  %v1749_v32 = vsel %vm1748_vm10, %v6376_v39, %v6375_v59  ;;  %v6377_v13 = vld [vmem:[#allocation89_spill] sm:$0xff]  ;;  %v6399_v39 = vld [vmem:[#allocation112_spill] sm:$0xff] }
0x1f33   :  { %v1486_v36 = vadd.f32 %v1482_v26, %v1449_v60  ;;  %v1750_v6 = vsel %vm1748_vm10, %v6375_v59, %v6377_v13  ;;  %v6379_v26 = vld [vmem:[#allocation90_spill] sm:$0xff] }
0x1f34   :  { %v1487_v16 = vadd.f32 %v1483_v20, %v1450_v61  ;;  %v1786_v28 = vsel %vm1748_vm10, %v6379_v26, %v6378_v15  ;;  %v6380_v20 = vld [vmem:[#allocation91_spill] sm:$0xff]  ;;  %v6402_v26 = vld [vmem:[#allocation116_spill] sm:$0xff] }
0x1f35   :  { %v1525_v57 = vadd.f32 %v1521_v40, %v1486_v36  ;;  %v1787_v60 = vsel %vm1748_vm10, %v6378_v15, %v6380_v20  ;;  %v6382_v40 = vld [vmem:[#allocation93_spill] sm:$0xff]  ;;  %vm2810_vm10 = vcmask 474112  }
0x1f36   :  { %v1526_v0 = vadd.f32 %v1522_v8, %v1487_v16  ;;  %v1825_v27 = vsel %vm1824_vm9, %v6382_v40, %v6381_v18  ;;  %v6383_v8 = vld [vmem:[#allocation95_spill] sm:$0xff]  ;;  %v6405_v40 = vld [vmem:[#allocation118_spill] sm:$0xff] }
0x1f37   :  { %v1562_v23 = vadd.f32 %v1558_v45, %v1525_v57  ;;  %v1826_v36 = vsel %vm1824_vm9, %v6381_v18, %v6383_v8  ;;  %v6385_v45 = vld [vmem:[#allocation96_spill] sm:$0xff] }
0x1f38   :  { %v1563_v2 = vadd.f32 %v1559_v10, %v1526_v0  ;;  %v1862_v50 = vsel %vm1824_vm9, %v6385_v45, %v6384_v19  ;;  %v6386_v10 = vld [vmem:[#allocation97_spill] sm:$0xff]  ;;  %v6408_v45 = vld [vmem:[#allocation122_spill] sm:$0xff] }
0x1f39   :  { %v1601_v7 = vadd.f32 %v1597_v21, %v1562_v23  ;;  %v1863_v57 = vsel %vm1824_vm9, %v6384_v19, %v6386_v10  ;;  %v6388_v21 = vld [vmem:[#allocation99_spill] sm:$0xff]  ;;  %vm2051_vm9 = vcmask 629760  }
0x1f3a   :  { %v1602_v51 = vadd.f32 %v1598_v52, %v1563_v2  ;;  %v1901_v46 = vsel %vm1900_vm13, %v6388_v21, %v6387_v1  ;;  %v6389_v52 = vld [vmem:[#allocation101_spill] sm:$0xff]  ;;  %v6411_v21 = vld [vmem:[#allocation124_spill] sm:$0xff] }
0x1f3b   :  { %v1638_v58 = vadd.f32 %v1634_v29, %v1601_v7  ;;  %v1902_v23 = vsel %vm1900_vm13, %v6387_v1, %v6389_v52  ;;  %v6391_v29 = vld [vmem:[#allocation102_spill] sm:$0xff] }
0x1f3c   :  { %v1639_v37 = vadd.f32 %v1635_v56, %v1602_v51  ;;  %v1938_v49 = vsel %vm1900_vm13, %v6391_v29, %v6390_v38  ;;  %v6392_v56 = vld [vmem:[#allocation103_spill] sm:$0xff]  ;;  %v6414_v29 = vld [vmem:[#allocation128_spill] sm:$0xff] }
0x1f3d   :  { %v1677_v34 = vadd.f32 %v1673_v14, %v1638_v58  ;;  %v1939_v7 = vsel %vm1900_vm13, %v6390_v38, %v6392_v56  ;;  %v6394_v14 = vld [vmem:[#allocation105_spill] sm:$0xff]  ;;  %vm2960_vm13 = vcmask 384000  }
0x1f3e   :  { %v1678_v47 = vadd.f32 %v1674_v42, %v1639_v37  ;;  %v1977_v33 = vsel %vm1976_vm14, %v6394_v14, %v6393_v22  ;;  %v6395_v42 = vld [vmem:[#allocation107_spill] sm:$0xff]  ;;  %v6417_v14 = vld [vmem:[#allocation130_spill] sm:$0xff] }
0x1f3f   :  { %v1714_v62 = vadd.f32 %v1710_v12, %v1677_v34  ;;  %v1978_v58 = vsel %vm1976_vm14, %v6393_v22, %v6395_v42  ;;  %v6397_v12 = vld [vmem:[#allocation108_spill] sm:$0xff] }
0x1f40   :  { %v1715_v4 = vadd.f32 %v1711_v30, %v1678_v47  ;;  %v2014_v24 = vsel %vm1976_vm14, %v6397_v12, %v6396_v17  ;;  %v6398_v30 = vld [vmem:[#allocation109_spill] sm:$0xff]  ;;  %v6420_v12 = vld [vmem:[#allocation134_spill] sm:$0xff] }
0x1f41   :  { %v1753_v61 = vadd.f32 %v1749_v32, %v1714_v62  ;;  %v2015_v34 = vsel %vm1976_vm14, %v6396_v17, %v6398_v30  ;;  %v6400_v32 = vld [vmem:[#allocation111_spill] sm:$0xff]  ;;  %vm3036_vm14 = vcmask 375808  }
0x1f42   :  { %v1754_v53 = vadd.f32 %v1750_v6, %v1715_v4  ;;  %v2052_v13 = vsel %vm2051_vm9, %v6400_v32, %v6399_v39  ;;  %v6401_v6 = vld [vmem:[#allocation113_spill] sm:$0xff]  ;;  %v6423_v32 = vld [vmem:[#allocation136_spill] sm:$0xff] }
0x1f43   :  { %v1790_v16 = vadd.f32 %v1786_v28, %v1753_v61  ;;  %v2053_v62 = vsel %vm2051_vm9, %v6399_v39, %v6401_v6  ;;  %v6403_v28 = vld [vmem:[#allocation114_spill] sm:$0xff] }
0x1f44   :  { %v1791_v31 = vadd.f32 %v1787_v60, %v1754_v53  ;;  %v2089_v20 = vsel %vm2051_vm9, %v6403_v28, %v6402_v26  ;;  %v6404_v60 = vld [vmem:[#allocation115_spill] sm:$0xff]  ;;  %v6426_v28 = vld [vmem:[#allocation140_spill] sm:$0xff] }
0x1f45   :  { %v1829_v0 = vadd.f32 %v1825_v27, %v1790_v16  ;;  %v2090_v61 = vsel %vm2051_vm9, %v6402_v26, %v6404_v60  ;;  %v6406_v27 = vld [vmem:[#allocation117_spill] sm:$0xff]  ;;  %vm3247_vm9 = vcmask 695296  }
0x1f46   :  { %v1830_v11 = vadd.f32 %v1826_v36, %v1791_v31  ;;  %v2128_v8 = vsel %vm2127_vm15, %v6406_v27, %v6405_v40  ;;  %v6407_v36 = vld [vmem:[#allocation119_spill] sm:$0xff]  ;;  %v6429_v27 = vld [vmem:[#allocation142_spill] sm:$0xff] }
0x1f47   :  { %v1866_v2 = vadd.f32 %v1862_v50, %v1829_v0  ;;  %v2129_v16 = vsel %vm2127_vm15, %v6405_v40, %v6407_v36  ;;  %v6409_v50 = vld [vmem:[#allocation120_spill] sm:$0xff] }
0x1f48   :  { %v1867_v25 = vadd.f32 %v1863_v57, %v1830_v11  ;;  %v2165_v10 = vsel %vm2127_vm15, %v6409_v50, %v6408_v45  ;;  %v6410_v57 = vld [vmem:[#allocation121_spill] sm:$0xff]  ;;  %v6432_v50 = vld [vmem:[#allocation146_spill] sm:$0xff] }
0x1f49   :  { %v1905_v51 = vadd.f32 %v1901_v46, %v1866_v2  ;;  %v2166_v0 = vsel %vm2127_vm15, %v6408_v45, %v6410_v57  ;;  %v6412_v46 = vld [vmem:[#allocation123_spill] sm:$0xff]  ;;  %vm3323_vm15 = vcmask 703488  }
0x1f4a   :  { %v1906_v35 = vadd.f32 %v1902_v23, %v1867_v25  ;;  %v2204_v52 = vsel %vm2203_vm5, %v6412_v46, %v6411_v21  ;;  %v6413_v23 = vld [vmem:[#allocation125_spill] sm:$0xff]  ;;  %v6435_v46 = vld [vmem:[#allocation148_spill] sm:$0xff] }
0x1f4b   :  { %v1942_v37 = vadd.f32 %v1938_v49, %v1905_v51  ;;  %v2205_v2 = vsel %vm2203_vm5, %v6411_v21, %v6413_v23  ;;  %v6415_v49 = vld [vmem:[#allocation126_spill] sm:$0xff] }
0x1f4c   :  { %v1943_v5 = vadd.f32 %v1939_v7, %v1906_v35  ;;  %v2241_v56 = vsel %vm2203_vm5, %v6415_v49, %v6414_v29  ;;  %v6416_v7 = vld [vmem:[#allocation127_spill] sm:$0xff]  ;;  %v6438_v49 = vld [vmem:[#allocation152_spill] sm:$0xff] }
0x1f4d   :  { %v1981_v47 = vadd.f32 %v1977_v33, %v1942_v37  ;;  %v2242_v51 = vsel %vm2203_vm5, %v6414_v29, %v6416_v7  ;;  %v6418_v33 = vld [vmem:[#allocation129_spill] sm:$0xff]  ;;  %vm3473_vm5 = vcmask 793600  }
0x1f4e   :  { %v1982_v59 = vadd.f32 %v1978_v58, %v1943_v5  ;;  %v2280_v42 = vsel %vm2279_vm2, %v6418_v33, %v6417_v14  ;;  %v6419_v58 = vld [vmem:[#allocation131_spill] sm:$0xff]  ;;  %v6441_v33 = vld [vmem:[#allocation154_spill] sm:$0xff] }
0x1f4f   :  { %v2018_v4 = vadd.f32 %v2014_v24, %v1981_v47  ;;  %v2281_v37 = vsel %vm2279_vm2, %v6417_v14, %v6419_v58  ;;  %v6421_v24 = vld [vmem:[#allocation132_spill] sm:$0xff] }
0x1f50   :  { %v2019_v15 = vadd.f32 %v2015_v34, %v1982_v59  ;;  %v2317_v30 = vsel %vm2279_vm2, %v6421_v24, %v6420_v12  ;;  %v6422_v34 = vld [vmem:[#allocation133_spill] sm:$0xff]  ;;  %v6444_v24 = vld [vmem:[#allocation158_spill] sm:$0xff] }
0x1f51   :  { %v2056_v53 = vadd.f32 %v2052_v13, %v2018_v4  ;;  %v2318_v47 = vsel %vm2279_vm2, %v6420_v12, %v6422_v34  ;;  %v6424_v13 = vld [vmem:[#allocation135_spill] sm:$0xff]  ;;  %vm3625_vm2 = vcmask 809984  }
0x1f52   :  { %v2057_v18 = vadd.f32 %v2053_v62, %v2019_v15  ;;  %v2355_v6 = vsel %vm2338_vm0, %v6424_v13, %v6423_v32  ;;  %v6425_v62 = vld [vmem:[#allocation137_spill] sm:$0xff]  ;;  %v6447_v13 = vld [vmem:[#allocation160_spill] sm:$0xff] }
0x1f53   :  { %v2093_v31 = vadd.f32 %v2089_v20, %v2056_v53  ;;  %v2356_v4 = vsel %vm2338_vm0, %v6423_v32, %v6425_v62  ;;  %v6427_v20 = vld [vmem:[#allocation138_spill] sm:$0xff] }
0x1f54   :  { %v2094_v19 = vadd.f32 %v2090_v61, %v2057_v18  ;;  %v2392_v60 = vsel %vm2338_vm0, %v6427_v20, %v6426_v28  ;;  %v6428_v61 = vld [vmem:[#allocation139_spill] sm:$0xff]  ;;  %v6450_v20 = vld [vmem:[#allocation164_spill] sm:$0xff] }
0x1f55   :  { %v2132_v11 = vadd.f32 %v2128_v8, %v2093_v31  ;;  %v2393_v53 = vsel %vm2338_vm0, %v6426_v28, %v6428_v61  ;;  %v6430_v8 = vld [vmem:[#allocation141_spill] sm:$0xff]  ;;  %vm2582_vm0 = vcmask 498688  }
0x1f56   :  { %v2133_v1 = vadd.f32 %v2129_v16, %v2094_v19  ;;  %v2431_v36 = vsel %vm2430_vm4, %v6430_v8, %v6429_v27  ;;  %v6431_v16 = vld [vmem:[#allocation143_spill] sm:$0xff]  ;;  %v6453_v8 = vld [vmem:[#allocation166_spill] sm:$0xff] }
0x1f57   :  { %v2169_v25 = vadd.f32 %v2165_v10, %v2132_v11  ;;  %v2432_v31 = vsel %vm2430_vm4, %v6429_v27, %v6431_v16  ;;  %v6433_v10 = vld [vmem:[#allocation144_spill] sm:$0xff] }
0x1f58   :  { %v2170_v38 = vadd.f32 %v2166_v0, %v2133_v1  ;;  %v2468_v57 = vsel %vm2430_vm4, %v6433_v10, %v6432_v50  ;;  %v6434_v0 = vld [vmem:[#allocation145_spill] sm:$0xff]  ;;  %v6456_v10 = vld [vmem:[#allocation170_spill] sm:$0xff] }
0x1f59   :  { %v2208_v35 = vadd.f32 %v2204_v52, %v2169_v25  ;;  %v2469_v11 = vsel %vm2430_vm4, %v6432_v50, %v6434_v0  ;;  %v6436_v52 = vld [vmem:[#allocation147_spill] sm:$0xff]  ;;  %vm3701_vm4 = vcmask 818176  }
0x1f5a   :  { %v2209_v22 = vadd.f32 %v2205_v2, %v2170_v38  ;;  %v2507_v23 = vsel %vm2506_vm6, %v6436_v52, %v6435_v46  ;;  %v6437_v2 = vld [vmem:[#allocation149_spill] sm:$0xff]  ;;  %v6459_v52 = vld [vmem:[#allocation172_spill] sm:$0xff] }
0x1f5b   :  { %v2245_v5 = vadd.f32 %v2241_v56, %v2208_v35  ;;  %v2508_v25 = vsel %vm2506_vm6, %v6435_v46, %v6437_v2  ;;  %v6439_v56 = vld [vmem:[#allocation150_spill] sm:$0xff] }
0x1f5c   :  { %v2246_v17 = vadd.f32 %v2242_v51, %v2209_v22  ;;  %v2544_v7 = vsel %vm2506_vm6, %v6439_v56, %v6438_v49  ;;  %v6440_v51 = vld [vmem:[#allocation151_spill] sm:$0xff]  ;;  %v6462_v56 = vld [vmem:[#allocation176_spill] sm:$0xff] }
0x1f5d   :  { %v2284_v59 = vadd.f32 %v2280_v42, %v2245_v5  ;;  %v2545_v35 = vsel %vm2506_vm6, %v6438_v49, %v6440_v51  ;;  %v6442_v42 = vld [vmem:[#allocation153_spill] sm:$0xff]  ;;  %vm3777_vm6 = vcmask 826368  }
0x1f5e   :  { %v2285_v39 = vadd.f32 %v2281_v37, %v2246_v17  ;;  %v2583_v58 = vsel %vm2582_vm0, %v6442_v42, %v6441_v33  ;;  %v6443_v37 = vld [vmem:[#allocation155_spill] sm:$0xff]  ;;  %v6465_v42 = vld [vmem:[#allocation178_spill] sm:$0xff] }
0x1f5f   :  { %v2321_v15 = vadd.f32 %v2317_v30, %v2284_v59  ;;  %v2584_v5 = vsel %vm2582_vm0, %v6441_v33, %v6443_v37  ;;  %v6445_v30 = vld [vmem:[#allocation156_spill] sm:$0xff] }
0x1f60   :  { %v2322_v26 = vadd.f32 %v2318_v47, %v2285_v39  ;;  %v2620_v34 = vsel %vm2582_vm0, %v6445_v30, %v6444_v24  ;;  %v6446_v47 = vld [vmem:[#allocation157_spill] sm:$0xff]  ;;  %v6468_v30 = vld [vmem:[#allocation182_spill] sm:$0xff] }
0x1f61   :  { %v2359_v18 = vadd.f32 %v2355_v6, %v2321_v15  ;;  %v2621_v59 = vsel %vm2582_vm0, %v6444_v24, %v6446_v47  ;;  %v6448_v6 = vld [vmem:[#allocation159_spill] sm:$0xff]  ;;  %vm3853_vm0 = vcmask 834560  }
0x1f62   :  { %v2360_v40 = vadd.f32 %v2356_v4, %v2322_v26  ;;  %v2659_v62 = vsel %vm2658_vm7, %v6448_v6, %v6447_v13  ;;  %v6449_v4 = vld [vmem:[#allocation161_spill] sm:$0xff]  ;;  %v6471_v6 = vld [vmem:[#allocation184_spill] sm:$0xff] }
0x1f63   :  { %v2396_v19 = vadd.f32 %v2392_v60, %v2359_v18  ;;  %v2660_v15 = vsel %vm2658_vm7, %v6447_v13, %v6449_v4  ;;  %v6451_v60 = vld [vmem:[#allocation162_spill] sm:$0xff] }
0x1f64   :  { %v2397_v45 = vadd.f32 %v2393_v53, %v2360_v40  ;;  %v2696_v61 = vsel %vm2658_vm7, %v6451_v60, %v6450_v20  ;;  %v6452_v53 = vld [vmem:[#allocation163_spill] sm:$0xff]  ;;  %v6474_v60 = vld [vmem:[#allocation188_spill] sm:$0xff] }
0x1f65   :  { %v2435_v1 = vadd.f32 %v2431_v36, %v2396_v19  ;;  %v2697_v18 = vsel %vm2658_vm7, %v6450_v20, %v6452_v53  ;;  %v6454_v36 = vld [vmem:[#allocation165_spill] sm:$0xff]  ;;  %vm3340_vm7 = vcmask 343040  }
0x1f66   :  { %v2436_v21 = vadd.f32 %v2432_v31, %v2397_v45  ;;  %v2735_v16 = vsel %vm2734_vm8, %v6454_v36, %v6453_v8  ;;  %v6455_v31 = vld [vmem:[#allocation167_spill] sm:$0xff]  ;;  %v6477_v36 = vld [vmem:[#allocation190_spill] sm:$0xff] }
0x1f67   :  { %v2472_v38 = vadd.f32 %v2468_v57, %v2435_v1  ;;  %v2736_v19 = vsel %vm2734_vm8, %v6453_v8, %v6455_v31  ;;  %v6457_v57 = vld [vmem:[#allocation168_spill] sm:$0xff] }
0x1f68   :  { %v2473_v29 = vadd.f32 %v2469_v11, %v2436_v21  ;;  %v2772_v0 = vsel %vm2734_vm8, %v6457_v57, %v6456_v10  ;;  %v6458_v11 = vld [vmem:[#allocation169_spill] sm:$0xff]  ;;  %v6480_v57 = vld [vmem:[#allocation194_spill] sm:$0xff] }
0x1f69   :  { %v2511_v22 = vadd.f32 %v2507_v23, %v2472_v38  ;;  %v2773_v1 = vsel %vm2734_vm8, %v6456_v10, %v6458_v11  ;;  %v6460_v23 = vld [vmem:[#allocation171_spill] sm:$0xff]  ;;  %vm3490_vm8 = vcmask 252928  }
0x1f6a   :  { %v2512_v14 = vadd.f32 %v2508_v25, %v2473_v29  ;;  %v2811_v2 = vsel %vm2810_vm10, %v6460_v23, %v6459_v52  ;;  %v6461_v25 = vld [vmem:[#allocation173_spill] sm:$0xff]  ;;  %v6483_v23 = vld [vmem:[#allocation196_spill] sm:$0xff] }
0x1f6b   :  { %v2548_v17 = vadd.f32 %v2544_v7, %v2511_v22  ;;  %v2812_v38 = vsel %vm2810_vm10, %v6459_v52, %v6461_v25  ;;  %v6463_v7 = vld [vmem:[#allocation174_spill] sm:$0xff] }
0x1f6c   :  { %v2549_v12 = vadd.f32 %v2545_v35, %v2512_v14  ;;  %v2848_v51 = vsel %vm2810_vm10, %v6463_v7, %v6462_v56  ;;  %v6464_v35 = vld [vmem:[#allocation175_spill] sm:$0xff]  ;;  %v6486_v7 = vld [vmem:[#allocation200_spill] sm:$0xff] }
0x1f6d   :  { %v2587_v39 = vadd.f32 %v2583_v58, %v2548_v17  ;;  %v2849_v22 = vsel %vm2810_vm10, %v6462_v56, %v6464_v35  ;;  %v6466_v58 = vld [vmem:[#allocation177_spill] sm:$0xff]  ;;  %vm3566_vm10 = vcmask 244736  }
0x1f6e   :  { %v2588_v32 = vadd.f32 %v2584_v5, %v2549_v12  ;;  %v2885_v37 = vsel %vm1807_vm11, %v6466_v58, %v6465_v42  ;;  %v6467_v5 = vld [vmem:[#allocation179_spill] sm:$0xff] }
0x1f6f   :  { %v2624_v26 = vadd.f32 %v2620_v34, %v2587_v39  ;;  %v2886_v17 = vsel %vm1807_vm11, %v6465_v42, %v6467_v5  ;;  %v6469_v34 = vld [vmem:[#allocation180_spill] sm:$0xff] }
0x1f70   :  { %v2625_v28 = vadd.f32 %v2621_v59, %v2588_v32  ;;  %v2922_v47 = vsel %vm1807_vm11, %v6469_v34, %v6468_v30  ;;  %v6470_v59 = vld [vmem:[#allocation181_spill] sm:$0xff] }
0x1f71   :  { %v2663_v40 = vadd.f32 %v2659_v62, %v2624_v26  ;;  %v2923_v39 = vsel %vm1807_vm11, %v6468_v30, %v6470_v59  ;;  %v6472_v62 = vld [vmem:[#allocation183_spill] sm:$0xff]  ;;  %vm3112_vm11 = vcmask 367616  }
0x1f72   :  { %v2664_v27 = vadd.f32 %v2660_v15, %v2625_v28  ;;  %v2961_v4 = vsel %vm2960_vm13, %v6472_v62, %v6471_v6  ;;  %v6473_v15 = vld [vmem:[#allocation185_spill] sm:$0xff] }
0x1f73   :  { %v2700_v45 = vadd.f32 %v2696_v61, %v2663_v40  ;;  %v2962_v26 = vsel %vm2960_vm13, %v6471_v6, %v6473_v15  ;;  %v6475_v61 = vld [vmem:[#allocation186_spill] sm:$0xff]  ;;  %v6489_v15 = vld [vmem:[#allocation16_spill] sm:$0xff] }
0x1f74   :  { %v2701_v50 = vadd.f32 %v2697_v18, %v2664_v27  ;;  %v2998_v53 = vsel %vm2960_vm13, %v6475_v61, %v6474_v60  ;;  %v6476_v18 = vld [vmem:[#allocation187_spill] sm:$0xff] }
0x1f75   :  { %v2739_v21 = vadd.f32 %v2735_v16, %v2700_v45  ;;  %v2999_v40 = vsel %vm2960_vm13, %v6474_v60, %v6476_v18  ;;  %v6478_v16 = vld [vmem:[#allocation189_spill] sm:$0xff]  ;;  %vm3642_vm13 = vcmask 236544  }
0x1f76   :  { %v2740_v46 = vadd.f32 %v2736_v19, %v2701_v50  ;;  %v3037_v31 = vsel %vm3036_vm14, %v6478_v16, %v6477_v36  ;;  %v6479_v19 = vld [vmem:[#allocation191_spill] sm:$0xff] }
0x1f77   :  { %v2776_v29 = vadd.f32 %v2772_v0, %v2739_v21  ;;  %v3038_v45 = vsel %vm3036_vm14, %v6477_v36, %v6479_v19  ;;  %v6481_v0 = vld [vmem:[#allocation192_spill] sm:$0xff] }
0x1f78   :  { %v2777_v49 = vadd.f32 %v2773_v1, %v2740_v46  ;;  %v3074_v11 = vsel %vm3036_vm14, %v6481_v0, %v6480_v57  ;;  %v6482_v1 = vld [vmem:[#allocation193_spill] sm:$0xff] }
0x1f79   :  { %v2815_v14 = vadd.f32 %v2811_v2, %v2776_v29  ;;  %v3075_v21 = vsel %vm3036_vm14, %v6480_v57, %v6482_v1  ;;  %v6484_v2 = vld [vmem:[#allocation195_spill] sm:$0xff]  ;;  %vm3794_vm14 = vcmask 220160  }
0x1f7a   :  { %v2816_v33 = vadd.f32 %v2812_v38, %v2777_v49  ;;  %v3113_v25 = vsel %vm3112_vm11, %v6484_v2, %v6483_v23  ;;  %v6485_v38 = vld [vmem:[#allocation197_spill] sm:$0xff]  ;;  %v3459_v2 = vld [vmem:[#allocation7 + $0x53] ss:$8 sm:$0x3] }
0x1f7b   :  { %v2852_v12 = vadd.f32 %v2848_v51, %v2815_v14  ;;  %v3114_v29 = vsel %vm3112_vm11, %v6483_v23, %v6485_v38  ;;  %v6487_v51 = vld [vmem:[#allocation198_spill] sm:$0xff] }
0x1f7c   :  { %v2853_v24 = vadd.f32 %v2849_v22, %v2816_v33  ;;  %v3150_v35 = vsel %vm3112_vm11, %v6487_v51, %v6486_v7  ;;  %v6488_v22 = vld [vmem:[#allocation199_spill] sm:$0xff] }
0x1f7d   :  { %v2889_v32 = vadd.f32 %v2885_v37, %v2852_v12  ;;  %v3151_v14 = vsel %vm3112_vm11, %v6486_v7, %v6488_v22  ;;  %v3535_v7 = vld [vmem:[#allocation7 + $0x54] ss:$8 sm:$0x3]  ;;  %v3574_v22 = vld [vmem:[#allocation9 + $0x54] ss:$8 sm:$0x3] }
0x1f7e   :  { %v2890_v13 = vadd.f32 %v2886_v17, %v2853_v24  ;;  %v3540_v51 = vrot.slane %v3535_v7, %v6323_v41  ;;  %vm3870_vm11 = vcmask 211968  }
0x1f7f   :  { %v2926_v28 = vadd.f32 %v2922_v47, %v2889_v32 }
0x1f80   :  { %v2927_v20 = vadd.f32 %v2923_v39, %v2890_v13 }
0x1f81   :  { %v2965_v27 = vadd.f32 %v2961_v4, %v2926_v28  ;;  %v3272_v4 = vld [vmem:[#allocation9 + $0x50] ss:$8 sm:$0x3] }
0x1f82   :  { %v2966_v8 = vadd.f32 %v2962_v26, %v2927_v20  ;;  %v3281_v28 = vrot.slane %v3272_v4, %v4315_v3 }
0x1f83   :  { %v3002_v50 = vadd.f32 %v2998_v53, %v2965_v27 }
0x1f84   :  { %v3003_v10 = vadd.f32 %v2999_v40, %v2966_v8  ;;  %v3309_v8 = vld [vmem:[#allocation7 + $0x51] ss:$8 sm:$0x3] }
0x1f85   :  { %v3041_v46 = vadd.f32 %v3037_v31, %v3002_v50  ;;  %v3314_v19 = vrot.slane %v3309_v8, %v6323_v41  ;;  %v3348_v50 = vld [vmem:[#allocation9 + $0x51] ss:$8 sm:$0x3]  ;;  %v3318_v0 = vrot.slane %v3309_v8, %v4315_v3 }
0x1f86   :  { %v3042_v52 = vadd.f32 %v3038_v45, %v3003_v10  ;;  %v3353_v57 = vrot.slane %v3348_v50, %v6323_v41 }
0x1f87   :  { %v3078_v49 = vadd.f32 %v3074_v11, %v3041_v46  ;;  %v3385_v11 = vld [vmem:[#allocation7 + $0x52] ss:$8 sm:$0x3]  ;;  %v3422_v46 = vld [vmem:[#allocation9 + $0x52] ss:$8 sm:$0x3] }
0x1f88   :  { %v3079_v56 = vadd.f32 %v3075_v21, %v3042_v52  ;;  %v3390_v1 = vrot.slane %v3385_v11, %v6323_v41  ;;  %v3357_v21 = vrot.slane %v3348_v50, %v4315_v3  ;;  %v3427_v52 = vrot.slane %v3422_v46, %v6323_v41 }
0x1f89   :  { %v3117_v33 = vadd.f32 %v3113_v25, %v3078_v49  ;;  %v3394_v23 = vrot.slane %v3385_v11, %v4315_v3  ;;  %v3464_v25 = vrot.slane %v3459_v2, %v6323_v41  ;;  %v3431_v38 = vrot.slane %v3422_v46, %v4315_v3 }
0x1f8a   :  { %v3118_v42 = vadd.f32 %v3114_v29, %v3079_v56  ;;  %v3498_v29 = vld [vmem:[#allocation9 + $0x53] ss:$8 sm:$0x3]  ;;  %v3468_v56 = vrot.slane %v3459_v2, %v4315_v3 }
0x1f8b   :  { %v3154_v37 = vadd.f32 %v3150_v35, %v3117_v33  ;;  %v3503_v49 = vrot.slane %v3498_v29, %v6323_v41  ;;  %v3507_v35 = vrot.slane %v3498_v29, %v4315_v3  ;;  %v3544_v33 = vrot.slane %v3535_v7, %v4315_v3 }
0x1f8c   :  { %v3155_v5 = vadd.f32 %v3151_v14, %v3118_v42  ;;  %v3579_v14 = vrot.slane %v3574_v22, %v6323_v41  ;;  %v3611_v42 = vld [vmem:[#allocation7 + $0x55] ss:$8 sm:$0x3] }
0x1f8d   :  { %v3193_v17 = vadd.f32 %v5578_v55, %v3154_v37  ;;  %v3583_v37 = vrot.slane %v3574_v22, %v4315_v3 }
0x1f8e   :  { %v3194_v12 = vadd.f32 %v5592_v43, %v3155_v5  ;;  %v3277_v43 = vrot.slane %v3272_v4, %v6323_v41  ;;  %v3650_v5 = vld [vmem:[#allocation9 + $0x55] ss:$8 sm:$0x3] }
0x1f94   :  { %v3221_v58 = vpop.permute.xlu1 %3220 }
0x1f98   :  { %v3225_v24 = vpop.permute.xlu1 %3224  ;;  %v3223_v30 = vpop.permute.xlu0 %3222 }
0x1f99   :  { %v3226_v34 = vsel %vm3188_vm12, %v3221_v58, %v3223_v30  ;;  %v3227_v47 = vsel %vm3188_vm12, %v3223_v30, %v3225_v24  ;;  %vm3264_vm12 = vcmask 351232   ;;  %v3616_v58 = vrot.slane %v3611_v42, %v6323_v41  ;;  %v3687_v24 = vld [vmem:[#allocation7 + $0x56] ss:$8 sm:$0x3] }
0x1f9a   :  { %v3230_v59 = vadd.f32 %v3226_v34, %v3193_v17  ;;  %v3231_v39 = vadd.f32 %v3227_v47, %v3194_v12  ;;  %v3655_v17 = vrot.slane %v3650_v5, %v6323_v41  ;;  %v3620_v12 = vrot.slane %v3611_v42, %v4315_v3  ;;  %v3726_v47 = vld [vmem:[#allocation9 + $0x56] ss:$8 sm:$0x3] }
0x1f9b   :  { %v3692_v30 = vrot.slane %v3687_v24, %v6323_v41  ;;  %v3659_v34 = vrot.slane %v3650_v5, %v4315_v3 }
0x1f9c   :  { %v3246_v32 = vpop.permute.xlu1 %3245  ;;  %v3244_v13 = vpop.permute.xlu0 %3243 }
0x1f9d   :  { %v3248_v6 = vsel %vm3247_vm9, %v3244_v13, %v3246_v32  ;;  %v3252_v62 = vmul.f32 %v3244_v13, %v4510_v9  ;;  %v3254_v26 = vmul.f32 %v3246_v32, %v6489_v15  ;;  %v3763_v32 = vld [vmem:[#allocation7 + $0x57] ss:$8 sm:$0x3] }
0x1f9e   :  { %v3253_v55 = vmul.f32 %v3248_v6, %v4552_v54  ;;  %v3768_v13 = vrot.slane %v3763_v32, %v6323_v41  ;;  %v3735_v6 = vrot.slane %v3726_v47, %v4315_v3 }
0x1f9f   :  { %3258 = vrot.lane.b32.xlu0 %v3252_v62, %s4234_s29  ;;  %v3802_v62 = vld [vmem:[#allocation9 + $0x57] ss:$8 sm:$0x3] }
0x1fa0   :  { %3260 = vrot.lane.b32.xlu1 %v3253_v55, %s4234_s29  ;;  %v3807_v4 = vrot.slane %v3802_v62, %v6323_v41  ;;  %v3772_v55 = vrot.slane %v3763_v32, %v4315_v3 }
0x1fa3   :  { %3262 = vrot.lane.b32.xlu0 %v3254_v26, %s4234_s29 }
0x1fa4   :  { %3282 = vrot.lane.b32.xlu1 %v3277_v43, %s4233_s11  ;;  %v3839_v43 = vld [vmem:[#allocation7 + $0x60] ss:$8 sm:$0x3] }
0x1fa5   :  { %v3844_v26 = vrot.slane %v3839_v43, %v6323_v41 }
0x1fa7   :  { %3284 = vrot.lane.b32.xlu0 %v3281_v28, %s4233_s11  ;;  %v3811_v28 = vrot.slane %v3802_v62, %v4315_v3 }
0x2011   :  { %v3259_v20 = vpop.permute.xlu0 %3258 }
0x2012   :  { %v3261_v60 = vpop.permute.xlu1 %3260 }
0x2013   :  { %v3265_v61 = vsel %vm3264_vm12, %v3259_v20, %v3261_v60  ;;  %v3878_v20 = vld [vmem:[#allocation9 + $0x60] ss:$8 sm:$0x3] }
0x2014   :  { %v5881_v53 = vadd.f32 %v3265_v61, %v3230_v59  ;;  %v3731_v59 = vrot.slane %v3726_v47, %v6323_v41  ;;  %v3848_v61 = vrot.slane %v3839_v43, %v4315_v3 }
0x2015   :  { %v3263_v18 = vpop.permute.xlu0 %3262 }
0x2016   :  { %v3266_v40 = vsel %vm3264_vm12, %v3261_v60, %v3263_v18  ;;  %v3283_v27 = vpop.permute.xlu1 %3282  ;;  %v3883_v60 = vrot.slane %v3878_v20, %v6323_v41  ;;  %v3887_v18 = vrot.slane %v3878_v20, %v4315_v3 }
0x2017   :  { %v5884_v36 = vadd.f32 %v3266_v40, %v3231_v39  ;;  %v3290_v16 = vmul.f32 %v3283_v27, %v4436_v44  ;;  %v3696_v39 = vrot.slane %v3687_v24, %v4315_v3 }
0x2019   :  { %v5887_v31 = vpop.permute.xlu0 %3284  ;;  %3296 = vrot.lane.b32.xlu1 %v3290_v16, %s4234_s29 }
0x201a   :  { %v3286_v45 = vsel %vm3247_vm9, %v3283_v27, %v5887_v31  ;;  %v3292_v40 = vmul.f32 %v5887_v31, %v6319_v63 }
0x201b   :  { %v3291_v10 = vmul.f32 %v3286_v45, %v4443_v48 }
0x201d   :  { %3319 = vrot.lane.b32.xlu1 %v3314_v19, %s4235_s12  ;;  %3298 = vrot.lane.b32.xlu0 %v3291_v10, %s4234_s29 }
0x2021   :  { %3358 = vrot.lane.b32.xlu1 %v3353_v57, %s4235_s12  ;;  %3321 = vrot.lane.b32.xlu0 %v3318_v0, %s4235_s12 }
0x2025   :  { %3395 = vrot.lane.b32.xlu1 %v3390_v1, %s4186_s21  ;;  %3360 = vrot.lane.b32.xlu0 %v3357_v21, %s4235_s12 }
0x2029   :  { %3432 = vrot.lane.b32.xlu1 %v3427_v52, %s4186_s21  ;;  %3397 = vrot.lane.b32.xlu0 %v3394_v23, %s4186_s21 }
0x202d   :  { %3469 = vrot.lane.b32.xlu1 %v3464_v25, %s4236_s13  ;;  %3434 = vrot.lane.b32.xlu0 %v3431_v38, %s4186_s21  ;;  %s4238_s21 = smov 99  }
0x2031   :  { %3508 = vrot.lane.b32.xlu1 %v3503_v49, %s4236_s13  ;;  %3471 = vrot.lane.b32.xlu0 %v3468_v56, %s4236_s13 }
0x2035   :  { %3545 = vrot.lane.b32.xlu1 %v3540_v51, %s4237_s14  ;;  %3510 = vrot.lane.b32.xlu0 %v3507_v35, %s4236_s13 }
0x2039   :  { %3584 = vrot.lane.b32.xlu1 %v3579_v14, %s4237_s14  ;;  %3547 = vrot.lane.b32.xlu0 %v3544_v33, %s4237_s14 }
0x203d   :  { %3621 = vrot.lane.b32.xlu1 %v3616_v58, %s4238_s21  ;;  %3586 = vrot.lane.b32.xlu0 %v3583_v37, %s4237_s14 }
0x2041   :  { %3660 = vrot.lane.b32.xlu1 %v3655_v17, %s4238_s21  ;;  %3623 = vrot.lane.b32.xlu0 %v3620_v12, %s4238_s21 }
0x2045   :  { %3697 = vrot.lane.b32.xlu1 %v3692_v30, %s4239_s15  ;;  %3662 = vrot.lane.b32.xlu0 %v3659_v34, %s4238_s21 }
0x2049   :  { %3736 = vrot.lane.b32.xlu1 %v3731_v59, %s4239_s15  ;;  %3699 = vrot.lane.b32.xlu0 %v3696_v39, %s4239_s15 }
0x204d   :  { %3773 = vrot.lane.b32.xlu1 %v3768_v13, %s4240_s16  ;;  %3738 = vrot.lane.b32.xlu0 %v3735_v6, %s4239_s15 }
0x2051   :  { %3812 = vrot.lane.b32.xlu1 %v3807_v4, %s4240_s16  ;;  %3775 = vrot.lane.b32.xlu0 %v3772_v55, %s4240_s16 }
0x2055   :  { %3849 = vrot.lane.b32.xlu1 %v3844_v26, %s4241_s17  ;;  %3814 = vrot.lane.b32.xlu0 %v3811_v28, %s4240_s16 }
0x2059   :  { %3888 = vrot.lane.b32.xlu1 %v3883_v60, %s4241_s17  ;;  %3851 = vrot.lane.b32.xlu0 %v3848_v61, %s4241_s17 }
0x205d   :  { %3300 = vrot.lane.b32.xlu1 %v3292_v40, %s4234_s29  ;;  %3890 = vrot.lane.b32.xlu0 %v3887_v18, %s4241_s17 }
0x208b   :  { %v3297_v27 = vpop.permute.xlu1 %3296 }
0x208f   :  { %v3320_v8 = vpop.permute.xlu1 %3319  ;;  %v5933_v16 = vpop.permute.xlu0 %3298 }
0x2090   :  { %v3328_v19 = vmul.f32 %v3320_v8, %v4510_v9  ;;  %v3302_v41 = vsel %vm3264_vm12, %v3297_v27, %v5933_v16 }
0x2091   :  { %v5939_v45 = vadd.f32 %v3302_v41, %v5881_v53 }
0x2092   :  { %3334 = vrot.lane.b32.xlu0 %v3328_v19, %s4242_s18 }
0x2093   :  { %v3359_v3 = vpop.permute.xlu1 %3358  ;;  %v3322_v31 = vpop.permute.xlu0 %3321 }
0x2094   :  { %v3324_v50 = vsel %vm3323_vm15, %v3320_v8, %v3322_v31  ;;  %v3330_v10 = vmul.f32 %v3322_v31, %v6489_v15  ;;  %v3366_v21 = vmul.f32 %v3359_v3, %v4436_v44 }
0x2095   :  { %v3329_v57 = vmul.f32 %v3324_v50, %v4552_v54 }
0x2096   :  { %3338 = vrot.lane.b32.xlu0 %v3330_v10, %s4242_s18 }
0x2097   :  { %v3396_v0 = vpop.permute.xlu1 %3395  ;;  %3336 = vrot.lane.b32.xlu1 %v3329_v57, %s4242_s18  ;;  %v3361_v11 = vpop.permute.xlu0 %3360 }
0x2098   :  { %v3362_v1 = vsel %vm3323_vm15, %v3359_v3, %v3361_v11  ;;  %v3403_v23 = vmul.f32 %v3396_v0, %v4510_v9  ;;  %v3368_v2 = vmul.f32 %v3361_v11, %v6319_v63 }
0x2099   :  { %v3367_v53 = vmul.f32 %v3362_v1, %v4443_v48 }
0x209b   :  { %v3433_v46 = vpop.permute.xlu1 %3432  ;;  %3372 = vrot.lane.b32.xlu1 %v3366_v21, %s4242_s18  ;;  %3374 = vrot.lane.b32.xlu0 %v3367_v53, %s4242_s18  ;;  %v3398_v52 = vpop.permute.xlu0 %3397 }
0x209c   :  { %v3399_v25 = vsel %vm1292_vm1, %v3396_v0, %v3398_v52  ;;  %v3405_v56 = vmul.f32 %v3398_v52, %v6489_v15  ;;  %v3440_v35 = vmul.f32 %v3433_v46, %v4436_v44 }
0x209d   :  { %v3404_v49 = vmul.f32 %v3399_v25, %v4552_v54 }
0x209f   :  { %v3470_v38 = vpop.permute.xlu1 %3469  ;;  %3376 = vrot.lane.b32.xlu1 %v3368_v2, %s4242_s18  ;;  %3409 = vrot.lane.b32.xlu0 %v3403_v23, %s4185_s20  ;;  %v3435_v29 = vpop.permute.xlu0 %3434 }
0x20a0   :  { %v3436_v7 = vsel %vm1292_vm1, %v3433_v46, %v3435_v29  ;;  %v3478_v42 = vmul.f32 %v3470_v38, %v4510_v9  ;;  %v3442_v58 = vmul.f32 %v3435_v29, %v6319_v63  ;;  %vm3549_vm1 = vcmask 801792  }
0x20a1   :  { %v3441_v22 = vmul.f32 %v3436_v7, %v4443_v48 }
0x20a3   :  { %v3509_v51 = vpop.permute.xlu1 %3508  ;;  %3413 = vrot.lane.b32.xlu0 %v3405_v56, %s4185_s20  ;;  %3411 = vrot.lane.b32.xlu1 %v3404_v49, %s4185_s20  ;;  %v3472_v14 = vpop.permute.xlu0 %3471 }
0x20a4   :  { %v3474_v37 = vsel %vm3473_vm5, %v3470_v38, %v3472_v14  ;;  %v3480_v24 = vmul.f32 %v3472_v14, %v6489_v15  ;;  %v3516_v47 = vmul.f32 %v3509_v51, %v4436_v44 }
0x20a5   :  { %v3479_v12 = vmul.f32 %v3474_v37, %v4552_v54 }
0x20a7   :  { %v3546_v33 = vpop.permute.xlu1 %3545  ;;  %3446 = vrot.lane.b32.xlu1 %v3440_v35, %s4185_s20  ;;  %3448 = vrot.lane.b32.xlu0 %v3441_v22, %s4185_s20  ;;  %v3511_v5 = vpop.permute.xlu0 %3510 }
0x20a8   :  { %v3512_v30 = vsel %vm3473_vm5, %v3509_v51, %v3511_v5  ;;  %v3554_v13 = vmul.f32 %v3546_v33, %v4510_v9  ;;  %v3518_v6 = vmul.f32 %v3511_v5, %v6319_v63 }
0x20a9   :  { %v3517_v59 = vmul.f32 %v3512_v30, %v4443_v48 }
0x20ab   :  { %v3585_v17 = vpop.permute.xlu1 %3584  ;;  %3450 = vrot.lane.b32.xlu1 %v3442_v58, %s4185_s20  ;;  %3484 = vrot.lane.b32.xlu0 %v3478_v42, %s4243_s19  ;;  %v3548_v39 = vpop.permute.xlu0 %3547  ;;  %s4244_s20 = smov 30  }
0x20ac   :  { %v3550_v62 = vsel %vm3549_vm1, %v3546_v33, %v3548_v39  ;;  %v3556_v26 = vmul.f32 %v3548_v39, %v6489_v15  ;;  %v3592_v60 = vmul.f32 %v3585_v17, %v4436_v44 }
0x20ad   :  { %v3555_v43 = vmul.f32 %v3550_v62, %v4552_v54 }
0x20af   :  { %v3622_v34 = vpop.permute.xlu1 %3621  ;;  %3488 = vrot.lane.b32.xlu0 %v3480_v24, %s4243_s19  ;;  %3486 = vrot.lane.b32.xlu1 %v3479_v12, %s4243_s19  ;;  %v3587_v4 = vpop.permute.xlu0 %3586 }
0x20b0   :  { %v3588_v28 = vsel %vm3549_vm1, %v3585_v17, %v3587_v4  ;;  %v3630_v27 = vmul.f32 %v3622_v34, %v4510_v9  ;;  %v3594_v8 = vmul.f32 %v3587_v4, %v6319_v63 }
0x20b1   :  { %v3593_v61 = vmul.f32 %v3588_v28, %v4443_v48 }
0x20b3   :  { %v3661_v32 = vpop.permute.xlu1 %3660  ;;  %3522 = vrot.lane.b32.xlu1 %v3516_v47, %s4243_s19  ;;  %3524 = vrot.lane.b32.xlu0 %v3517_v59, %s4243_s19  ;;  %v3624_v18 = vpop.permute.xlu0 %3623 }
0x20b4   :  { %v3626_v19 = vsel %vm3625_vm2, %v3622_v34, %v3624_v18  ;;  %v3632_v50 = vmul.f32 %v3624_v18, %v6489_v15  ;;  %v3668_v0 = vmul.f32 %v3661_v32, %v4436_v44 }
0x20b5   :  { %v3631_v31 = vmul.f32 %v3626_v19, %v4552_v54 }
0x20b7   :  { %v3698_v55 = vpop.permute.xlu1 %3697  ;;  %3526 = vrot.lane.b32.xlu1 %v3518_v6, %s4243_s19  ;;  %3560 = vrot.lane.b32.xlu0 %v3554_v13, %s4244_s20  ;;  %v3663_v41 = vpop.permute.xlu0 %3662 }
0x20b8   :  { %v3664_v10 = vsel %vm3625_vm2, %v3661_v32, %v3663_v41  ;;  %v3706_v53 = vmul.f32 %v3698_v55, %v4510_v9  ;;  %v3670_v46 = vmul.f32 %v3663_v41, %v6319_v63 }
0x20b9   :  { %v3669_v11 = vmul.f32 %v3664_v10, %v4443_v48 }
0x20bb   :  { %v3737_v20 = vpop.permute.xlu1 %3736  ;;  %3564 = vrot.lane.b32.xlu0 %v3556_v26, %s4244_s20  ;;  %3562 = vrot.lane.b32.xlu1 %v3555_v43, %s4244_s20  ;;  %v3700_v1 = vpop.permute.xlu0 %3699 }
0x20bc   :  { %v3702_v52 = vsel %vm3701_vm4, %v3698_v55, %v3700_v1  ;;  %v3708_v29 = vmul.f32 %v3700_v1, %v6489_v15  ;;  %v3744_v7 = vmul.f32 %v3737_v20, %v4436_v44 }
0x20bd   :  { %v3707_v38 = vmul.f32 %v3702_v52, %v4552_v54 }
0x20bf   :  { %v3774_v40 = vpop.permute.xlu1 %3773  ;;  %3598 = vrot.lane.b32.xlu1 %v3592_v60, %s4244_s20  ;;  %3600 = vrot.lane.b32.xlu0 %v3593_v61, %s4244_s20  ;;  %v3739_v23 = vpop.permute.xlu0 %3738 }
0x20c0   :  { %v3740_v56 = vsel %vm3701_vm4, %v3737_v20, %v3739_v23  ;;  %v3746_v22 = vmul.f32 %v3739_v23, %v6319_v63 }
0x20c1   :  { %v3745_v51 = vmul.f32 %v3740_v56, %v4443_v48 }
0x20c3   :  { %v3813_v3 = vpop.permute.xlu1 %3812  ;;  %3602 = vrot.lane.b32.xlu1 %v3594_v8, %s4244_s20  ;;  %3636 = vrot.lane.b32.xlu0 %v3630_v27, %s4245_s0  ;;  %v3776_v35 = vpop.permute.xlu0 %3775 }
0x20c4   :  { %v3778_v14 = vsel %vm3777_vm6, %v3774_v40, %v3776_v35  ;;  %v3784_v42 = vmul.f32 %v3776_v35, %v6489_v15  ;;  %v3820_v37 = vmul.f32 %v3813_v3, %v4436_v44 }
0x20c7   :  { %v3850_v57 = vpop.permute.xlu1 %3849  ;;  %3640 = vrot.lane.b32.xlu0 %v3632_v50, %s4245_s0  ;;  %3638 = vrot.lane.b32.xlu1 %v3631_v31, %s4245_s0  ;;  %v3815_v33 = vpop.permute.xlu0 %3814 }
0x20c8   :  { %v3816_v58 = vsel %vm3777_vm6, %v3813_v3, %v3815_v33  ;;  %v3858_v12 = vmul.f32 %v3850_v57, %v4510_v9  ;;  %v3822_v24 = vmul.f32 %v3815_v33, %v6319_v63 }
0x20c9   :  { %v3821_v5 = vmul.f32 %v3816_v58, %v4443_v48 }
0x20cb   :  { %v3889_v21 = vpop.permute.xlu1 %3888  ;;  %3674 = vrot.lane.b32.xlu1 %v3668_v0, %s4245_s0  ;;  %3676 = vrot.lane.b32.xlu0 %v3669_v11, %s4245_s0  ;;  %v3852_v17 = vpop.permute.xlu0 %3851 }
0x20cc   :  { %v3854_v30 = vsel %vm3853_vm0, %v3850_v57, %v3852_v17  ;;  %v3860_v59 = vmul.f32 %v3852_v17, %v6489_v15  ;;  %v3896_v32 = vmul.f32 %v3889_v21, %v4436_v44 }
0x20cd   :  { %v3859_v47 = vmul.f32 %v3854_v30, %v4552_v54 }
0x20cf   :  { %v3301_v2 = vpop.permute.xlu1 %3300  ;;  %3678 = vrot.lane.b32.xlu1 %v3670_v46, %s4245_s0  ;;  %3712 = vrot.lane.b32.xlu0 %v3706_v53, %s4246_s24  ;;  %v3891_v34 = vpop.permute.xlu0 %3890 }
0x20d0   :  { %v3303_v25 = vsel %vm3264_vm12, %v5933_v16, %v3301_v2  ;;  %v3782_v16 = vmul.f32 %v3774_v40, %v4510_v9  ;;  %v3892_v39 = vsel %vm3853_vm0, %v3889_v21, %v3891_v34  ;;  %v3898_v9 = vmul.f32 %v3891_v34, %v6319_v63 }
0x20d1   :  { %v5985_v49 = vadd.f32 %v3303_v25, %v5884_v36  ;;  %v3783_v36 = vmul.f32 %v3778_v14, %v4552_v54  ;;  %v3897_v13 = vmul.f32 %v3892_v39, %v4443_v48 }
0x20d3   :  { %3716 = vrot.lane.b32.xlu0 %v3708_v29, %s4246_s24  ;;  %3714 = vrot.lane.b32.xlu1 %v3707_v38, %s4246_s24 }
0x20d7   :  { %3750 = vrot.lane.b32.xlu1 %v3744_v7, %s4246_s24  ;;  %3752 = vrot.lane.b32.xlu0 %v3745_v51, %s4246_s24 }
0x20db   :  { %3754 = vrot.lane.b32.xlu1 %v3746_v22, %s4246_s24  ;;  %3788 = vrot.lane.b32.xlu0 %v3782_v16, %s4247_s2 }
0x20df   :  { %3792 = vrot.lane.b32.xlu0 %v3784_v42, %s4247_s2  ;;  %3790 = vrot.lane.b32.xlu1 %v3783_v36, %s4247_s2 }
0x20e3   :  { %3826 = vrot.lane.b32.xlu1 %v3820_v37, %s4247_s2  ;;  %3828 = vrot.lane.b32.xlu0 %v3821_v5, %s4247_s2 }
0x20e7   :  { %3830 = vrot.lane.b32.xlu1 %v3822_v24, %s4247_s2  ;;  %3864 = vrot.lane.b32.xlu0 %v3858_v12, %s4248_s22 }
0x20eb   :  { %3868 = vrot.lane.b32.xlu0 %v3860_v59, %s4248_s22  ;;  %3866 = vrot.lane.b32.xlu1 %v3859_v47, %s4248_s22 }
0x20ef   :  { %3902 = vrot.lane.b32.xlu1 %v3896_v32, %s4248_s22  ;;  %3904 = vrot.lane.b32.xlu0 %v3897_v13, %s4248_s22 }
0x20f3   :  { %3906 = vrot.lane.b32.xlu1 %v3898_v9, %s4248_s22 }
0x2104   :  { %v3335_v6 = vpop.permute.xlu0 %3334 }
0x2108   :  { %v3339_v62 = vpop.permute.xlu0 %3338 }
0x2109   :  { %v3337_v4 = vpop.permute.xlu1 %3336 }
0x210a   :  { %v3341_v46 = vsel %vm3340_vm7, %v3335_v6, %v3337_v4  ;;  %v3342_v38 = vsel %vm3340_vm7, %v3337_v4, %v3339_v62 }
0x210b   :  { %v3345_v23 = vadd.f32 %v3341_v46, %v5939_v45  ;;  %v3346_v35 = vadd.f32 %v3342_v38, %v5985_v49 }
0x210d   :  { %v3373_v55 = vpop.permute.xlu1 %3372  ;;  %v3375_v43 = vpop.permute.xlu0 %3374 }
0x210e   :  { %v3378_v52 = vsel %vm3340_vm7, %v3373_v55, %v3375_v43 }
0x210f   :  { %v3382_v56 = vadd.f32 %v3378_v52, %v3345_v23 }
0x2111   :  { %v3377_v54 = vpop.permute.xlu1 %3376  ;;  %v3410_v26 = vpop.permute.xlu0 %3409 }
0x2112   :  { %v3379_v7 = vsel %vm3340_vm7, %v3375_v43, %v3377_v54 }
0x2113   :  { %v3383_v45 = vadd.f32 %v3379_v7, %v3346_v35 }
0x2115   :  { %v3412_v15 = vpop.permute.xlu1 %3411  ;;  %v3414_v28 = vpop.permute.xlu0 %3413 }
0x2116   :  { %v3415_v29 = vsel %vm1275_vm3, %v3410_v26, %v3412_v15  ;;  %v3416_v33 = vsel %vm1275_vm3, %v3412_v15, %v3414_v28 }
0x2117   :  { %v3419_v16 = vadd.f32 %v3415_v29, %v3382_v56  ;;  %v3420_v5 = vadd.f32 %v3416_v33, %v3383_v45 }
0x2119   :  { %v3447_v20 = vpop.permute.xlu1 %3446  ;;  %v3449_v60 = vpop.permute.xlu0 %3448 }
0x211a   :  { %v3452_v51 = vsel %vm1275_vm3, %v3447_v20, %v3449_v60 }
0x211b   :  { %v3456_v42 = vadd.f32 %v3452_v51, %v3419_v16 }
0x211d   :  { %v3451_v61 = vpop.permute.xlu1 %3450  ;;  %v3485_v44 = vpop.permute.xlu0 %3484 }
0x211e   :  { %v3453_v58 = vsel %vm1275_vm3, %v3449_v60, %v3451_v61  ;;  %vm3718_vm3 = vcmask 228352  }
0x211f   :  { %v3457_v34 = vadd.f32 %v3453_v58, %v3420_v5 }
0x2121   :  { %v3487_v18 = vpop.permute.xlu1 %3486  ;;  %v3489_v48 = vpop.permute.xlu0 %3488 }
0x2122   :  { %v3491_v36 = vsel %vm3490_vm8, %v3485_v44, %v3487_v18  ;;  %v3492_v49 = vsel %vm3490_vm8, %v3487_v18, %v3489_v48 }
0x2123   :  { %v3495_v17 = vadd.f32 %v3491_v36, %v3456_v42  ;;  %v3496_v32 = vadd.f32 %v3492_v49, %v3457_v34 }
0x2125   :  { %v3523_v40 = vpop.permute.xlu1 %3522  ;;  %v3525_v27 = vpop.permute.xlu0 %3524 }
0x2126   :  { %v3528_v37 = vsel %vm3490_vm8, %v3523_v40, %v3525_v27 }
0x2127   :  { %v3532_v47 = vadd.f32 %v3528_v37, %v3495_v17 }
0x2129   :  { %v3527_v8 = vpop.permute.xlu1 %3526  ;;  %v3561_v63 = vpop.permute.xlu0 %3560 }
0x212a   :  { %v3529_v59 = vsel %vm3490_vm8, %v3525_v27, %v3527_v8 }
0x212b   :  { %v3533_v55 = vadd.f32 %v3529_v59, %v3496_v32 }
0x212d   :  { %v3563_v19 = vpop.permute.xlu1 %3562  ;;  %v3565_v41 = vpop.permute.xlu0 %3564 }
0x212e   :  { %v3567_v30 = vsel %vm3566_vm10, %v3561_v63, %v3563_v19  ;;  %v3568_v62 = vsel %vm3566_vm10, %v3563_v19, %v3565_v41 }
0x212f   :  { %v3571_v13 = vadd.f32 %v3567_v30, %v3532_v47  ;;  %v3572_v15 = vadd.f32 %v3568_v62, %v3533_v55 }
0x2131   :  { %v3599_v3 = vpop.permute.xlu1 %3598  ;;  %v3601_v31 = vpop.permute.xlu0 %3600 }
0x2132   :  { %v3604_v39 = vsel %vm3566_vm10, %v3599_v3, %v3601_v31 }
0x2133   :  { %v3608_v43 = vadd.f32 %v3604_v39, %v3571_v13 }
0x2135   :  { %v3603_v50 = vpop.permute.xlu1 %3602  ;;  %v3637_v10 = vpop.permute.xlu0 %3636 }
0x2136   :  { %v3605_v54 = vsel %vm3566_vm10, %v3601_v31, %v3603_v50 }
0x2137   :  { %v3609_v18 = vadd.f32 %v3605_v54, %v3572_v15 }
0x2139   :  { %v3639_v57 = vpop.permute.xlu1 %3638  ;;  %v3641_v0 = vpop.permute.xlu0 %3640 }
0x213a   :  { %v3643_v4 = vsel %vm3642_vm13, %v3637_v10, %v3639_v57  ;;  %v3644_v61 = vsel %vm3642_vm13, %v3639_v57, %v3641_v0 }
0x213b   :  { %v3647_v28 = vadd.f32 %v3643_v4, %v3608_v43  ;;  %v3648_v8 = vadd.f32 %v3644_v61, %v3609_v18 }
0x213d   :  { %v3675_v11 = vpop.permute.xlu1 %3674  ;;  %v3677_v1 = vpop.permute.xlu0 %3676 }
0x213e   :  { %v3680_v26 = vsel %vm3642_vm13, %v3675_v11, %v3677_v1 }
0x213f   :  { %v3684_v48 = vadd.f32 %v3680_v26, %v3647_v28 }
0x2141   :  { %v3679_v21 = vpop.permute.xlu1 %3678  ;;  %v3713_v53 = vpop.permute.xlu0 %3712 }
0x2142   :  { %v3681_v40 = vsel %vm3642_vm13, %v3677_v1, %v3679_v21 }
0x2143   :  { %v3685_v50 = vadd.f32 %v3681_v40, %v3648_v8 }
0x2145   :  { %v3715_v2 = vpop.permute.xlu1 %3714  ;;  %v3717_v25 = vpop.permute.xlu0 %3716 }
0x2146   :  { %v3719_v44 = vsel %vm3718_vm3, %v3713_v53, %v3715_v2  ;;  %v3720_v3 = vsel %vm3718_vm3, %v3715_v2, %v3717_v25 }
0x2147   :  { %v3723_v63 = vadd.f32 %v3719_v44, %v3684_v48  ;;  %v3724_v11 = vadd.f32 %v3720_v3, %v3685_v50 }
0x2149   :  { %v3751_v22 = vpop.permute.xlu1 %3750  ;;  %v3753_v14 = vpop.permute.xlu0 %3752 }
0x214a   :  { %v3756_v27 = vsel %vm3718_vm3, %v3751_v22, %v3753_v14 }
0x214b   :  { %v3760_v10 = vadd.f32 %v3756_v27, %v3723_v63 }
0x214d   :  { %v3755_v12 = vpop.permute.xlu1 %3754  ;;  %v3789_v24 = vpop.permute.xlu0 %3788 }
0x214e   :  { %v3757_v57 = vsel %vm3718_vm3, %v3753_v14, %v3755_v12 }
0x214f   :  { %v3761_v23 = vadd.f32 %v3757_v57, %v3724_v11 }
0x2151   :  { %v3791_v9 = vpop.permute.xlu1 %3790  ;;  %v3793_v6 = vpop.permute.xlu0 %3792 }
0x2152   :  { %v3795_v31 = vsel %vm3794_vm14, %v3789_v24, %v3791_v9  ;;  %v3796_v46 = vsel %vm3794_vm14, %v3791_v9, %v3793_v6 }
0x2153   :  { %v3799_v53 = vadd.f32 %v3795_v31, %v3760_v10  ;;  %v3800_v25 = vadd.f32 %v3796_v46, %v3761_v23 }
0x2155   :  { %v3827_v20 = vpop.permute.xlu1 %3826  ;;  %v3829_v60 = vpop.permute.xlu0 %3828 }
0x2156   :  { %v3832_v0 = vsel %vm3794_vm14, %v3827_v20, %v3829_v60 }
0x2157   :  { %v3836_v38 = vadd.f32 %v3832_v0, %v3799_v53 }
0x2159   :  { %v3831_v19 = vpop.permute.xlu1 %3830  ;;  %v3865_v41 = vpop.permute.xlu0 %3864 }
0x215a   :  { %v3833_v2 = vsel %vm3794_vm14, %v3829_v60, %v3831_v19 }
0x215b   :  { %v3837_v16 = vadd.f32 %v3833_v2, %v3800_v25 }
0x215d   :  { %v3867_v1 = vpop.permute.xlu1 %3866  ;;  %v3869_v21 = vpop.permute.xlu0 %3868 }
0x215e   :  { %v3871_v52 = vsel %vm3870_vm11, %v3865_v41, %v3867_v1  ;;  %v3872_v51 = vsel %vm3870_vm11, %v3867_v1, %v3869_v21 }
0x215f   :  { %v3875_v29 = vadd.f32 %v3871_v52, %v3836_v38  ;;  %v3876_v14 = vadd.f32 %v3872_v51, %v3837_v16 }
0x2161   :  { %v3903_v56 = vpop.permute.xlu1 %3902  ;;  %v3905_v7 = vpop.permute.xlu0 %3904 }
0x2162   :  { %v3908_v35 = vsel %vm3870_vm11, %v3903_v56, %v3905_v7 }
0x2163   :  { %v3912_v22 = vadd.f32 %v3908_v35, %v3875_v29 }
0x2165   :  { %v3914_v33 = vmul.f32 0.16666667, %v3912_v22  ;;  %v3907_v36 = vpop.permute.xlu1 %3906 }
0x2166   :  { %v3909_v45 = vsel %vm3870_vm11, %v3905_v7, %v3907_v36 }
0x2167   :  { %v3916_v42 = vadd.f32 0.5, %v3914_v33  ;;  %v3913_v58 = vadd.f32 %v3909_v45, %v3876_v14 }
0x2169   :  { %v3915_v37 = vmul.f32 0.16666667, %v3913_v58  ;;  %v3918_v5 = vmax.f32 %v3916_v42, 0.0 }
0x216b   :  { %v3917_v17 = vadd.f32 0.5, %v3915_v37  ;;  %v3920_v24 = vmin.f32 %v3918_v5, 1.0 }
0x216d   :  { %v3919_v12 = vmax.f32 %v3917_v17, 0.0 }
0x216f   :  { %v3921_v49 = vmin.f32 %v3919_v12, 1.0 }
0x2171   :  { %v3924_v30 = vcombine.low %v3920_v24, %v3921_v49 }
0x2173   :  { %3951 = vst.sshfl [vmem:[#allocation10] sm:$0x33 pattern:$0x76325410] %v3924_v30 }
0x2174   :  { %4132 = shalt.err (!%p4129_p0)
}
0x2175   :  { %s4133_s23 = scalar_lea.hbm %s6048_s3, 64 }
0x2176   :  { %p4134_p1 = scmp.ne.s32.totalorder %s6048_s3, %s4133_s23  ;;  %p4137_p2 = scmp.lt.u32.totalorder %s4133_s23, %s6048_s3 }
0x2178   :  { %p4139_p3 = pnand %p4137_p2, %p4134_p1 }
0x217a   :  { %4142 = shalt.err (!%p4139_p3)
}
0x217b   :  { %3943 = dma.vmem_to_hbm [thread:$0]  %s3941_s26, 64, %s6048_s3, [#allocation6]  }
0x217c   :  { %4147 = dma.done.wait [#allocation6], 64  }
0x217d   :  { %4148 = vsyncadd [#allocation6], 4294967232 }
0x217e   :  { %3947 = vsyncpa [#allocation5], 1 }
0x217f   :  { %3948 = vsyncpa [#allocation8], 1 }
0x2180   :  { %3949 = vsyncpa [#allocation6], 1 }

</bundles_post_ra>
